<compile_context>
chip_gen: v6e
topology: v6e:2x2x1
jax: 0.10.0
libtpu: 0.0.40
codegen_flags: <defaults>
</compile_context>

<pallas_src>
import functools

import jax
import jax.numpy as jnp
from jax import lax
from jax.experimental import pallas as pl
from jax.experimental.pallas import tpu as pltpu

BN_EPS = 1e-5                     # nn.BatchNorm2d default eps
ROW_TILE_TARGET = 2048            # target output pixels per grid step
VMEM_LIMIT = 48 * 1024 * 1024     # safe on v7x (64 MiB physical), ample on v5e/v6e


def _round_up(x, m):
    return (x + m - 1) // m * m


# ----------------------------------------------------------------------------
# Pallas kernel: stride-1 kh x kw conv + global-BN partial statistics
# ----------------------------------------------------------------------------
def _conv_stats_kernel(x_ref, w_ref, y_ref, stat_ref, *, th, wo, kh, kw, cin):
    """One (sample, row-tile) grid step.

    x_ref:    (Hp, Wp, cin)      whole padded sample, resident in VMEM
    w_ref:    (kh*kw, cin, cpad) per-tap weights, resident in VMEM
    y_ref:    (th*wo, cpad)      pre-norm conv output tile (bf16)
    stat_ref: (8, cpad)          rows 0-3: per-tile channel sum,
                                 rows 4-7: per-tile channel sum of squares
    Patches are formed in-kernel by slicing the halo'ed row window out of the
    resident sample (no HBM im2col); taps accumulate as MXU matmuls in f32.
    """
    row0 = pl.program_id(1) * th
    tm = th * wo
    cpad = y_ref.shape[-1]

    acc = jnp.zeros((tm, cpad), jnp.float32)
    for di in range(kh):
        for dj in range(kw):
            tap = x_ref[pl.ds(row0 + di, th), pl.ds(dj, wo), :]     # (th, wo, cin)
            tap = tap.reshape(tm, cin)                              # wo % 8 == 0
            acc = acc + jnp.dot(tap, w_ref[di * kw + dj],
                                preferred_element_type=jnp.float32)

    y_ref[...] = acc.astype(y_ref.dtype)                            # bf16 store

    s = jnp.sum(acc, axis=0, keepdims=True)
    sq = jnp.sum(acc * acc, axis=0, keepdims=True)
    stat_ref[...] = jnp.concatenate(
        [jnp.broadcast_to(s, (4, cpad)), jnp.broadcast_to(sq, (4, cpad))], axis=0)


def fused_conv_bn_act(x_pad, w_taps, bias_per_sample, gamma, beta, *,
                      neg_slope, kh, kw, row_tile=ROW_TILE_TARGET):
    """act(BatchNorm(conv_{kh x kw, stride 1}(x_pad) + bias_per_sample)).

    x_pad:  (B, Hp, Wp, Cin) f32, already spatially padded for the conv
    w_taps: (kh, kw, Cin, Cout) f32
    bias_per_sample: (B, Cout) f32 or None   (deferred to the epilogue)
    gamma, beta: (Cout,) f32
    returns (B, ho, wo, Cout) f32 with ho = Hp-kh+1, wo = Wp-kw+1.
    """
    B, Hp, Wp, cin = x_pad.shape
    cout = w_taps.shape[-1]
    ho, wo = Hp - kh + 1, Wp - kw + 1
    cpad = _round_up(cout, 128)                    # lane-dense outputs

    # Pad output width to a sublane multiple and output height to a multiple
    # of the row tile.  Padded rows/cols are zero (no in-kernel bias), so they
    # contribute nothing to the BN sums and are sliced off afterwards.
    wo_pad = _round_up(wo, 8)
    th = max(1, min(ho, row_tile // wo_pad))
    ho_pad = _round_up(ho, th)
    T = ho_pad // th
    tm = th * wo_pad
    # NOTE: on v7x keep B*T >= 2 so both TensorCores have work (B >= 2 here).

    xb = jnp.pad(x_pad, ((0, 0), (0, ho_pad - ho), (0, wo_pad - wo), (0, 0))
                 ).astype(jnp.bfloat16)
    wb = jnp.pad(w_taps.reshape(kh * kw, cin, cout),
                 ((0, 0), (0, 0), (0, cpad - cout))).astype(jnp.bfloat16)

    kernel = functools.partial(_conv_stats_kernel, th=th, wo=wo_pad,
                               kh=kh, kw=kw, cin=cin)

    y, stats = pl.pallas_call(
        kernel,
        out_shape=(jax.ShapeDtypeStruct((B, ho_pad * wo_pad, cpad), jnp.bfloat16),
                   jax.ShapeDtypeStruct((B, T, 8, cpad), jnp.float32)),
        grid=(B, T),
        in_specs=[
            # whole padded sample, fetched once per sample, resident across T
            pl.BlockSpec((None, ho_pad + kh - 1, wo_pad + kw - 1, cin),
                         lambda b, t: (b, 0, 0, 0)),
            # conv weights resident for the whole grid
            pl.BlockSpec((kh * kw, cin, cpad), lambda b, t: (0, 0, 0)),
        ],
        out_specs=(pl.BlockSpec((None, tm, cpad), lambda b, t: (b, t, 0)),
                   pl.BlockSpec((None, None, 8, cpad), lambda b, t: (b, t, 0, 0))),
        compiler_params=pltpu.CompilerParams(
            dimension_semantics=("parallel", "parallel"),
            vmem_limit_bytes=VMEM_LIMIT),
    )(xb, wb)

    # --- tiny global BN reduction (plain JAX, f32); deferred per-sample bias
    # is corrected analytically.
    sum_b = stats[:, :, 0, :cout].sum(axis=1)          # (B, Cout) per-sample sums
    sq_b = stats[:, :, 4, :cout].sum(axis=1)           # (B, Cout) per-sample sumsq
    m = float(ho * wo)
    bias = (jnp.zeros((B, cout), jnp.float32) if bias_per_sample is None
            else bias_per_sample.astype(jnp.float32))
    n = float(B) * m
    mean = (sum_b + m * bias).sum(axis=0) / n
    ex2 = (sq_b + 2.0 * bias * sum_b + m * bias * bias).sum(axis=0) / n
    var = jnp.maximum(ex2 - mean * mean, 0.0)
    scale = gamma.astype(jnp.float32) * lax.rsqrt(var + BN_EPS)        # (Cout,)
    shift = beta.astype(jnp.float32) - mean * scale + bias * scale     # (B, Cout)

    # --- affine + activation stay in plain JAX so XLA fuses them with the
    # following layout ops (no standalone elementwise Pallas pass).
    y4 = y.reshape(B, ho_pad, wo_pad, cpad)[:, :ho, :wo, :cout].astype(jnp.float32)
    v = y4 * scale[None, None, None, :] + shift[:, None, None, :]
    return jnp.where(v >= 0, v, neg_slope * v)


# ----------------------------------------------------------------------------
# Numerics-matched pure-JAX stage (bf16 matmul inputs, bf16 y store) for tests
# ----------------------------------------------------------------------------
def ref_conv_bn_act(x_pad, w_taps, bias_per_sample, gamma, beta, *,
                    neg_slope, kh, kw):
    B, Hp, Wp, _ = x_pad.shape
    cout = w_taps.shape[-1]
    ho, wo = Hp - kh + 1, Wp - kw + 1
    xb = x_pad.astype(jnp.bfloat16).astype(jnp.float32)
    wb = w_taps.astype(jnp.bfloat16).astype(jnp.float32)
    y = jnp.zeros((B, ho, wo, cout), jnp.float32)
    for di in range(kh):
        for dj in range(kw):
            y = y + jnp.einsum("bhwc,cn->bhwn",
                               xb[:, di:di + ho, dj:dj + wo, :], wb[di, dj],
                               precision=lax.Precision.HIGHEST)
    bias = (jnp.zeros((B, cout), jnp.float32) if bias_per_sample is None
            else bias_per_sample.astype(jnp.float32))
    yb = y + bias[:, None, None, :]
    mean = yb.mean(axis=(0, 1, 2))
    var = jnp.maximum((yb * yb).mean(axis=(0, 1, 2)) - mean * mean, 0.0)
    scale = gamma * lax.rsqrt(var + BN_EPS)
    shift = beta - mean * scale + bias * scale
    y16 = y.astype(jnp.bfloat16).astype(jnp.float32)    # kernel stores y in bf16
    v = y16 * scale + shift[:, None, None, :]
    return jnp.where(v >= 0, v, neg_slope * v)


# ----------------------------------------------------------------------------
# Plain-JAX layout glue (padding, space-to-depth, bilinear upsample)
# ----------------------------------------------------------------------------
def space_to_depth2(x):
    # (B, He, We, C) with He, We even -> (B, He/2, We/2, 4C), channel order (p, q, c)
    B, He, We, C = x.shape
    x = x.reshape(B, He // 2, 2, We // 2, 2, C)
    x = jnp.transpose(x, (0, 1, 3, 2, 4, 5))
    return x.reshape(B, He // 2, We // 2, 4 * C)


def down_weight_s2d(w):
    # (Cz, Cin, 3, 3) stride-2 kernel -> equivalent (2, 2, 4*Cin, Cz) stride-1
    # taps over the space-to-depth-by-2 input (channel order (p, q, ci)).
    cz, cin = w.shape[:2]
    wp = jnp.zeros((cz, cin, 4, 4), w.dtype).at[:, :, :3, :3].set(w)
    wp = wp.reshape(cz, cin, 2, 2, 2, 2)           # (co, ci, a, p, b, q)
    wp = jnp.transpose(wp, (2, 4, 3, 5, 1, 0))     # (a, b, p, q, ci, co)
    return wp.reshape(2, 2, 4 * cin, cz)


def _upsample2x_axis(x, axis):
    # 2x linear upsample, half-pixel centers, edge clamp
    # (== nn.Upsample(scale_factor=2, mode='bilinear', align_corners=False))
    n = x.shape[axis]
    first = lax.slice_in_dim(x, 0, 1, axis=axis)
    last = lax.slice_in_dim(x, n - 1, n, axis=axis)
    prev = jnp.concatenate([first, lax.slice_in_dim(x, 0, n - 1, axis=axis)],
                           axis=axis)
    nxt = jnp.concatenate([lax.slice_in_dim(x, 1, n, axis=axis), last],
                          axis=axis)
    even = 0.25 * prev + 0.75 * x
    odd = 0.75 * x + 0.25 * nxt
    out = jnp.stack([even, odd], axis=axis + 1)
    shp = list(x.shape)
    shp[axis] = 2 * n
    return out.reshape(shp)


def bilinear_upsample_2x(x_nhwc):
    return _upsample2x_axis(_upsample2x_axis(x_nhwc, 1), 2)


# ----------------------------------------------------------------------------
# UnetSkipConnectionBlockMsg forward (non-outermost)
# ----------------------------------------------------------------------------
def forward(params, latents_nchw, msgs, *, stage):
    B, Cin, H, W = latents_nchw.shape
    assert H % 2 == 0 and W % 2 == 0
    Cz = params["w_down"].shape[0]
    x = jnp.transpose(latents_nchw, (0, 2, 3, 1))                   # NHWC

    # ---- down: Conv2d(Cin, Cz, 3, s=2, p=1, bias=False) -> BN -> LeakyReLU(0.2)
    # stride-2 conv re-expressed as a stride-1 2x2 conv on the s2d input.
    xp = jnp.pad(x, ((0, 0), (1, 1), (1, 1), (0, 0)))
    xs = space_to_depth2(xp)                                        # (B, ho+1, wo+1, 4Cin)
    down = stage(xs, down_weight_s2d(params["w_down"]), None,
                 params["bn_down_gamma"], params["bn_down_beta"],
                 neg_slope=0.2, kh=2, kw=2)                         # (B, ho, wo, Cz)

    # ---- submodule (synthetic msg block): Linear(msgs) -> broadcast -> concat
    msg_feat = msgs @ params["w_msg"] + params["b_msg"]             # (B, Cz)

    # ---- up: Upsample(2x bilinear) -> ReflectionPad2d(1)
    #          -> Conv2d(2Cz, Cout, 3, bias=True) -> BN -> ReLU
    # msg half is spatially constant; upsample + reflection pad preserve it, so
    # its conv contribution folds into a per-sample bias (halves the up-conv K).
    w_fold = jnp.sum(params["w_up"][:, Cz:, :, :], axis=(2, 3))     # (Cout, Cz)
    bias_up = params["b_up"][None, :] + msg_feat @ w_fold.T         # (B, Cout)
    up_in = bilinear_upsample_2x(down)                              # (B, H, W, Cz)
    up_pad = jnp.pad(up_in, ((0, 0), (1, 1), (1, 1), (0, 0)), mode="reflect")
    w_up_taps = jnp.transpose(params["w_up"][:, :Cz, :, :], (2, 3, 1, 0))
    up = stage(up_pad, w_up_taps, bias_up,
               params["bn_up_gamma"], params["bn_up_beta"],
               neg_slope=0.0, kh=3, kw=3)                           # (B, H, W, Cout)

    out_nchw = jnp.transpose(up, (0, 3, 1, 2))
    # not outermost -> skip connection: cat([latents, outputs], dim=1)
    return jnp.concatenate([latents_nchw, out_nchw], axis=1)


# ----------------------------------------------------------------------------
# Pure-f32 end-to-end reference (lax.conv, un-folded msg branch, direct stride)
# ----------------------------------------------------------------------------
def _bn_train(y, gamma, beta):
    mean = y.mean(axis=(0, 1, 2))
    var = jnp.maximum((y * y).mean(axis=(0, 1, 2)) - mean * mean, 0.0)
    return (y - mean) * (gamma * lax.rsqrt(var + BN_EPS)) + beta


def forward_reference(params, latents_nchw, msgs):
    Cz = params["w_down"].shape[0]
    x = jnp.transpose(latents_nchw, (0, 2, 3, 1))
    dn = lax.conv_general_dilated(
        x, jnp.transpose(params["w_down"], (2, 3, 1, 0)),
        window_strides=(2, 2), padding=((1, 1), (1, 1)),
        dimension_numbers=("NHWC", "HWIO", "NHWC"))
    dn = _bn_train(dn, params["bn_down_gamma"], params["bn_down_beta"])
    dn = jnp.where(dn >= 0, dn, 0.2 * dn)

    msg_feat = msgs @ params["w_msg"] + params["b_msg"]
    msg_map = jnp.broadcast_to(msg_feat[:, None, None, :], dn.shape[:3] + (Cz,))
    mid = jnp.concatenate([dn, msg_map], axis=-1)

    upi = bilinear_upsample_2x(mid)
    upi = jnp.pad(upi, ((0, 0), (1, 1), (1, 1), (0, 0)), mode="reflect")
    up = lax.conv_general_dilated(
        upi, jnp.transpose(params["w_up"], (2, 3, 1, 0)),
        window_strides=(1, 1), padding="VALID",
        dimension_numbers=("NHWC", "HWIO", "NHWC")) + params["b_up"]
    up = jnp.maximum(_bn_train(up, params["bn_up_gamma"], params["bn_up_beta"]), 0.0)
    out = jnp.transpose(up, (0, 3, 1, 2))
    return jnp.concatenate([latents_nchw, out], axis=1)


# ----------------------------------------------------------------------------
# Deterministic parameter init (shapes implied by the module's __init__)
# ----------------------------------------------------------------------------
def init_params(key, cin, cout, cz, nbits):
    ks = jax.random.split(key, 8)
    f32 = jnp.float32
    return {
        # downconv: Conv2d(in_channels, z_channels, 3, stride=2, pad=1, bias=False)
        "w_down": 0.2 * jax.random.normal(ks[0], (cz, cin, 3, 3), f32),
        "bn_down_gamma": 1.0 + 0.1 * jax.random.normal(ks[1], (cz,), f32),
        "bn_down_beta": 0.1 * jax.random.normal(ks[2], (cz,), f32),
        # upconv: Conv2d(2*z_channels, out_channels, 3, stride=1, pad=0, bias=True)
        "w_up": 0.2 * jax.random.normal(ks[3], (cout, 2 * cz, 3, 3), f32),
        "b_up": 0.1 * jax.random.normal(ks[4], (cout,), f32),
        "bn_up_gamma": 1.0 + 0.1 * jax.random.normal(ks[5], (cout,), f32),
        "bn_up_beta": 0.1 * jax.random.normal(ks[6], (cout,), f32),
        # synthetic submodule: Linear(nbits -> z_channels)
        "w_msg": 0.2 * jax.random.normal(ks[7], (nbits, cz), f32),
        "b_msg": jnp.zeros((cz,), f32),
    }


if __name__ == "__main__":
    key = jax.random.PRNGKey(0)
    k_lat, k_msg, k_par = jax.random.split(key, 3)

    B, Cin, H, W = 2, 4, 16, 16          # in_channels=None -> in_channels=out_channels
    Cout, Cz, NBITS = 4, 8, 8

    latents = jax.random.normal(k_lat, (B, Cin, H, W), jnp.float32)
    msgs = jax.random.normal(k_msg, (B, NBITS), jnp.float32)
    params = init_params(k_par, Cin, Cout, Cz, NBITS)

    fwd_pallas = jax.jit(functools.partial(forward, stage=fused_conv_bn_act))
    out = jax.block_until_ready(fwd_pallas(params, latents, msgs))
    assert out.shape == (B, Cin + Cout, H, W), out.shape

    # 1) Pallas kernels vs numerics-matched (bf16 matmul / bf16 y) pure-JAX path.
    out_match = forward(params, latents, msgs, stage=ref_conv_bn_act)
    assert bool(jnp.allclose(out, out_match, atol=2e-3, rtol=2e-3)), (
        "Pallas output mismatch vs numerics-matched reference")

    # 2) End-to-end f32 lax.conv reference (direct stride-2 conv, un-folded msg
    #    branch) -> validates the s2d re-expression and the msg-fold algebra.
    out_ref = forward_reference(params, latents, msgs)
    assert bool(jnp.allclose(out, out_ref, atol=6e-2, rtol=6e-2)), (
        "Pallas output mismatch vs f32 lax.conv reference")

    print("KERNEL_OK")
</pallas_src>

<mosaic_0001>
module attributes {stable_mosaic.version = 11 : i64} {
  func.func @_conv_stats_kernel(%arg0: i32, %arg1: i32, %arg2: memref<1x9x9x16xbf16, #tpu.memory_space<vmem>>, %arg3: memref<4x16x128xbf16, #tpu.memory_space<vmem>>, %arg4: memref<1x64x128xbf16, #tpu.memory_space<vmem>>, %arg5: memref<1x1x8x128xf32, #tpu.memory_space<vmem>>) attributes {dimension_semantics = [#tpu.dimension_semantics<parallel>, #tpu.dimension_semantics<parallel>], iteration_bounds = array<i64: 2, 1>, scalar_prefetch = 0 : i64, scratch_operands = 0 : i64, tpu.core_type = #tpu.core_type<tc>, window_params = [{transform_indices = @transform_0, window_bounds = array<i64: 1, 9, 9, 16>}, {pipeline_mode = #tpu.pipeline_mode<synchronous>, transform_indices = @transform_1, window_bounds = array<i64: 4, 16, 128>}, {transform_indices = @transform_2, window_bounds = array<i64: 1, 64, 128>}, {transform_indices = @transform_3, window_bounds = array<i64: 1, 1, 8, 128>}]} {
    %c8_i32 = arith.constant 8 : i32
    %0 = arith.muli %arg1, %c8_i32 : i32
    %cst = arith.constant 0.000000e+00 : f32
    %1 = vector.broadcast %cst : f32 to vector<64x128xf32>
    %c0_i32 = arith.constant 0 : i32
    %2 = arith.addi %0, %c0_i32 : i32
    %c0 = arith.constant 0 : index
    %3 = arith.index_cast %2 : i32 to index
    %c0_0 = arith.constant 0 : index
    %c0_1 = arith.constant 0 : index
    %4 = vector.load %arg2[%c0, %3, %c0_0, %c0_1] : memref<1x9x9x16xbf16, #tpu.memory_space<vmem>>, vector<1x8x8x16xbf16>
    %5 = vector.shape_cast %4 : vector<1x8x8x16xbf16> to vector<8x8x16xbf16>
    %6 = vector.shape_cast %5 : vector<8x8x16xbf16> to vector<64x16xbf16>
    %c0_2 = arith.constant 0 : index
    %c0_3 = arith.constant 0 : index
    %c0_4 = arith.constant 0 : index
    %7 = vector.load %arg3[%c0_2, %c0_3, %c0_4] : memref<4x16x128xbf16, #tpu.memory_space<vmem>>, vector<1x16x128xbf16>
    %8 = vector.shape_cast %7 : vector<1x16x128xbf16> to vector<16x128xbf16>
    %cst_5 = arith.constant dense<0.000000e+00> : vector<64x128xf32>
    %9 = tpu.matmul %6, %8, %cst_5 {dimension_numbers = #tpu.dot_dimension_numbers<[1], [0], [0], [1], [0, 0, 1, 1], [], []>} : vector<64x16xbf16>, vector<16x128xbf16>, vector<64x128xf32> -> vector<64x128xf32>
    %10 = arith.addf %1, %9 : vector<64x128xf32>
    %c0_i32_6 = arith.constant 0 : i32
    %11 = arith.addi %0, %c0_i32_6 : i32
    %c0_7 = arith.constant 0 : index
    %12 = arith.index_cast %11 : i32 to index
    %c1 = arith.constant 1 : index
    %c0_8 = arith.constant 0 : index
    %13 = vector.load %arg2[%c0_7, %12, %c1, %c0_8] : memref<1x9x9x16xbf16, #tpu.memory_space<vmem>>, vector<1x8x8x16xbf16>
    %14 = vector.shape_cast %13 : vector<1x8x8x16xbf16> to vector<8x8x16xbf16>
    %15 = vector.shape_cast %14 : vector<8x8x16xbf16> to vector<64x16xbf16>
    %c1_9 = arith.constant 1 : index
    %c0_10 = arith.constant 0 : index
    %c0_11 = arith.constant 0 : index
    %16 = vector.load %arg3[%c1_9, %c0_10, %c0_11] : memref<4x16x128xbf16, #tpu.memory_space<vmem>>, vector<1x16x128xbf16>
    %17 = vector.shape_cast %16 : vector<1x16x128xbf16> to vector<16x128xbf16>
    %cst_12 = arith.constant dense<0.000000e+00> : vector<64x128xf32>
    %18 = tpu.matmul %15, %17, %cst_12 {dimension_numbers = #tpu.dot_dimension_numbers<[1], [0], [0], [1], [0, 0, 1, 1], [], []>} : vector<64x16xbf16>, vector<16x128xbf16>, vector<64x128xf32> -> vector<64x128xf32>
    %19 = arith.addf %10, %18 : vector<64x128xf32>
    %c1_i32 = arith.constant 1 : i32
    %20 = arith.addi %0, %c1_i32 : i32
    %c0_13 = arith.constant 0 : index
    %21 = arith.index_cast %20 : i32 to index
    %c0_14 = arith.constant 0 : index
    %c0_15 = arith.constant 0 : index
    %22 = vector.load %arg2[%c0_13, %21, %c0_14, %c0_15] : memref<1x9x9x16xbf16, #tpu.memory_space<vmem>>, vector<1x8x8x16xbf16>
    %23 = vector.shape_cast %22 : vector<1x8x8x16xbf16> to vector<8x8x16xbf16>
    %24 = vector.shape_cast %23 : vector<8x8x16xbf16> to vector<64x16xbf16>
    %c2 = arith.constant 2 : index
    %c0_16 = arith.constant 0 : index
    %c0_17 = arith.constant 0 : index
    %25 = vector.load %arg3[%c2, %c0_16, %c0_17] : memref<4x16x128xbf16, #tpu.memory_space<vmem>>, vector<1x16x128xbf16>
    %26 = vector.shape_cast %25 : vector<1x16x128xbf16> to vector<16x128xbf16>
    %cst_18 = arith.constant dense<0.000000e+00> : vector<64x128xf32>
    %27 = tpu.matmul %24, %26, %cst_18 {dimension_numbers = #tpu.dot_dimension_numbers<[1], [0], [0], [1], [0, 0, 1, 1], [], []>} : vector<64x16xbf16>, vector<16x128xbf16>, vector<64x128xf32> -> vector<64x128xf32>
    %28 = arith.addf %19, %27 : vector<64x128xf32>
    %c1_i32_19 = arith.constant 1 : i32
    %29 = arith.addi %0, %c1_i32_19 : i32
    %c0_20 = arith.constant 0 : index
    %30 = arith.index_cast %29 : i32 to index
    %c1_21 = arith.constant 1 : index
    %c0_22 = arith.constant 0 : index
    %31 = vector.load %arg2[%c0_20, %30, %c1_21, %c0_22] : memref<1x9x9x16xbf16, #tpu.memory_space<vmem>>, vector<1x8x8x16xbf16>
    %32 = vector.shape_cast %31 : vector<1x8x8x16xbf16> to vector<8x8x16xbf16>
    %33 = vector.shape_cast %32 : vector<8x8x16xbf16> to vector<64x16xbf16>
    %c3 = arith.constant 3 : index
    %c0_23 = arith.constant 0 : index
    %c0_24 = arith.constant 0 : index
    %34 = vector.load %arg3[%c3, %c0_23, %c0_24] : memref<4x16x128xbf16, #tpu.memory_space<vmem>>, vector<1x16x128xbf16>
    %35 = vector.shape_cast %34 : vector<1x16x128xbf16> to vector<16x128xbf16>
    %cst_25 = arith.constant dense<0.000000e+00> : vector<64x128xf32>
    %36 = tpu.matmul %33, %35, %cst_25 {dimension_numbers = #tpu.dot_dimension_numbers<[1], [0], [0], [1], [0, 0, 1, 1], [], []>} : vector<64x16xbf16>, vector<16x128xbf16>, vector<64x128xf32> -> vector<64x128xf32>
    %37 = arith.addf %28, %36 : vector<64x128xf32>
    %38 = arith.truncf %37 : vector<64x128xf32> to vector<64x128xbf16>
    %c0_26 = arith.constant 0 : index
    %c0_27 = arith.constant 0 : index
    %c0_28 = arith.constant 0 : index
    %39 = vector.load %arg4[%c0_26, %c0_27, %c0_28] : memref<1x64x128xbf16, #tpu.memory_space<vmem>>, vector<1x64x128xbf16>
    %40 = vector.shape_cast %39 : vector<1x64x128xbf16> to vector<64x128xbf16>
    %41 = vector.shape_cast %38 : vector<64x128xbf16> to vector<1x64x128xbf16>
    tpu.vector_store %arg4[%c0_26, %c0_27, %c0_28], %41 {strides = array<i32>} : memref<1x64x128xbf16, #tpu.memory_space<vmem>>, vector<1x64x128xbf16>,
    %cst_29 = arith.constant dense<0.000000e+00> : vector<128xf32>
    %42 = vector.multi_reduction <add>, %37, %cst_29 [0] : vector<64x128xf32> to vector<128xf32>
    %43 = vector.shape_cast %42 : vector<128xf32> to vector<1x128xf32>
    %44 = arith.mulf %37, %37 : vector<64x128xf32>
    %cst_30 = arith.constant dense<0.000000e+00> : vector<128xf32>
    %45 = vector.multi_reduction <add>, %44, %cst_30 [0] : vector<64x128xf32> to vector<128xf32>
    %46 = vector.shape_cast %45 : vector<128xf32> to vector<1x128xf32>
    %47 = vector.shape_cast %43 : vector<1x128xf32> to vector<1x128xf32>
    %48 = vector.broadcast %47 : vector<1x128xf32> to vector<4x128xf32>
    %49 = vector.shape_cast %46 : vector<1x128xf32> to vector<1x128xf32>
    %50 = vector.broadcast %49 : vector<1x128xf32> to vector<4x128xf32>
    %51 = tpu.concatenate %48, %50 in 0 : vector<4x128xf32>, vector<4x128xf32> -> vector<8x128xf32>
    %c0_31 = arith.constant 0 : index
    %c0_32 = arith.constant 0 : index
    %c0_33 = arith.constant 0 : index
    %c0_34 = arith.constant 0 : index
    %52 = vector.load %arg5[%c0_31, %c0_32, %c0_33, %c0_34] : memref<1x1x8x128xf32, #tpu.memory_space<vmem>>, vector<1x1x8x128xf32>
    %53 = vector.shape_cast %52 : vector<1x1x8x128xf32> to vector<8x128xf32>
    %54 = vector.shape_cast %51 : vector<8x128xf32> to vector<1x1x8x128xf32>
    tpu.vector_store %arg5[%c0_31, %c0_32, %c0_33, %c0_34], %54 {strides = array<i32>} : memref<1x1x8x128xf32, #tpu.memory_space<vmem>>, vector<1x1x8x128xf32>,
    return
  }
  func.func @transform_0(%arg0: i32, %arg1: i32) -> (i32, i32, i32, i32) {
    %c0_i32 = arith.constant 0 : i32
    %c0_i32_0 = arith.constant 0 : i32
    %c0_i32_1 = arith.constant 0 : i32
    %c0_i32_2 = arith.constant 0 : i32
    return %arg0, %c0_i32, %c0_i32_0, %c0_i32_1 : i32, i32, i32, i32
  }
  func.func @transform_1(%arg0: i32, %arg1: i32) -> (i32, i32, i32) {
    %c0_i32 = arith.constant 0 : i32
    %c0_i32_0 = arith.constant 0 : i32
    %c0_i32_1 = arith.constant 0 : i32
    %c0_i32_2 = arith.constant 0 : i32
    return %c0_i32, %c0_i32_0, %c0_i32_1 : i32, i32, i32
  }
  func.func @transform_2(%arg0: i32, %arg1: i32) -> (i32, i32, i32) {
    %c0_i32 = arith.constant 0 : i32
    %c0_i32_0 = arith.constant 0 : i32
    return %arg0, %arg1, %c0_i32 : i32, i32, i32
  }
  func.func @transform_3(%arg0: i32, %arg1: i32) -> (i32, i32, i32, i32) {
    %c0_i32 = arith.constant 0 : i32
    %c0_i32_0 = arith.constant 0 : i32
    %c0_i32_1 = arith.constant 0 : i32
    return %arg0, %arg1, %c0_i32, %c0_i32_0 : i32, i32, i32, i32
  }
}

module attributes {stable_mosaic.version = 11 : i64} {
  func.func @_conv_stats_kernel(%arg0: i32, %arg1: i32, %arg2: memref<1x18x18x8xbf16, #tpu.memory_space<vmem>>, %arg3: memref<9x8x128xbf16, #tpu.memory_space<vmem>>, %arg4: memref<1x256x128xbf16, #tpu.memory_space<vmem>>, %arg5: memref<1x1x8x128xf32, #tpu.memory_space<vmem>>) attributes {dimension_semantics = [#tpu.dimension_semantics<parallel>, #tpu.dimension_semantics<parallel>], iteration_bounds = array<i64: 2, 1>, scalar_prefetch = 0 : i64, scratch_operands = 0 : i64, tpu.core_type = #tpu.core_type<tc>, window_params = [{transform_indices = @transform_0, window_bounds = array<i64: 1, 18, 18, 8>}, {pipeline_mode = #tpu.pipeline_mode<synchronous>, transform_indices = @transform_1, window_bounds = array<i64: 9, 8, 128>}, {transform_indices = @transform_2, window_bounds = array<i64: 1, 256, 128>}, {transform_indices = @transform_3, window_bounds = array<i64: 1, 1, 8, 128>}]} {
    %c16_i32 = arith.constant 16 : i32
    %0 = arith.muli %arg1, %c16_i32 : i32
    %cst = arith.constant 0.000000e+00 : f32
    %1 = vector.broadcast %cst : f32 to vector<256x128xf32>
    %c0_i32 = arith.constant 0 : i32
    %2 = arith.addi %0, %c0_i32 : i32
    %c0 = arith.constant 0 : index
    %3 = arith.index_cast %2 : i32 to index
    %c0_0 = arith.constant 0 : index
    %c0_1 = arith.constant 0 : index
    %4 = vector.load %arg2[%c0, %3, %c0_0, %c0_1] : memref<1x18x18x8xbf16, #tpu.memory_space<vmem>>, vector<1x16x16x8xbf16>
    %5 = vector.shape_cast %4 : vector<1x16x16x8xbf16> to vector<16x16x8xbf16>
    %6 = vector.shape_cast %5 : vector<16x16x8xbf16> to vector<256x8xbf16>
    %c0_2 = arith.constant 0 : index
    %c0_3 = arith.constant 0 : index
    %c0_4 = arith.constant 0 : index
    %7 = vector.load %arg3[%c0_2, %c0_3, %c0_4] : memref<9x8x128xbf16, #tpu.memory_space<vmem>>, vector<1x8x128xbf16>
    %8 = vector.shape_cast %7 : vector<1x8x128xbf16> to vector<8x128xbf16>
    %cst_5 = arith.constant dense<0.000000e+00> : vector<256x128xf32>
    %9 = tpu.matmul %6, %8, %cst_5 {dimension_numbers = #tpu.dot_dimension_numbers<[1], [0], [0], [1], [0, 0, 1, 1], [], []>} : vector<256x8xbf16>, vector<8x128xbf16>, vector<256x128xf32> -> vector<256x128xf32>
    %10 = arith.addf %1, %9 : vector<256x128xf32>
    %c0_i32_6 = arith.constant 0 : i32
    %11 = arith.addi %0, %c0_i32_6 : i32
    %c0_7 = arith.constant 0 : index
    %12 = arith.index_cast %11 : i32 to index
    %c1 = arith.constant 1 : index
    %c0_8 = arith.constant 0 : index
    %13 = vector.load %arg2[%c0_7, %12, %c1, %c0_8] : memref<1x18x18x8xbf16, #tpu.memory_space<vmem>>, vector<1x16x16x8xbf16>
    %14 = vector.shape_cast %13 : vector<1x16x16x8xbf16> to vector<16x16x8xbf16>
    %15 = vector.shape_cast %14 : vector<16x16x8xbf16> to vector<256x8xbf16>
    %c1_9 = arith.constant 1 : index
    %c0_10 = arith.constant 0 : index
    %c0_11 = arith.constant 0 : index
    %16 = vector.load %arg3[%c1_9, %c0_10, %c0_11] : memref<9x8x128xbf16, #tpu.memory_space<vmem>>, vector<1x8x128xbf16>
    %17 = vector.shape_cast %16 : vector<1x8x128xbf16> to vector<8x128xbf16>
    %cst_12 = arith.constant dense<0.000000e+00> : vector<256x128xf32>
    %18 = tpu.matmul %15, %17, %cst_12 {dimension_numbers = #tpu.dot_dimension_numbers<[1], [0], [0], [1], [0, 0, 1, 1], [], []>} : vector<256x8xbf16>, vector<8x128xbf16>, vector<256x128xf32> -> vector<256x128xf32>
    %19 = arith.addf %10, %18 : vector<256x128xf32>
    %c0_i32_13 = arith.constant 0 : i32
    %20 = arith.addi %0, %c0_i32_13 : i32
    %c0_14 = arith.constant 0 : index
    %21 = arith.index_cast %20 : i32 to index
    %c2 = arith.constant 2 : index
    %c0_15 = arith.constant 0 : index
    %22 = vector.load %arg2[%c0_14, %21, %c2, %c0_15] : memref<1x18x18x8xbf16, #tpu.memory_space<vmem>>, vector<1x16x16x8xbf16>
    %23 = vector.shape_cast %22 : vector<1x16x16x8xbf16> to vector<16x16x8xbf16>
    %24 = vector.shape_cast %23 : vector<16x16x8xbf16> to vector<256x8xbf16>
    %c2_16 = arith.constant 2 : index
    %c0_17 = arith.constant 0 : index
    %c0_18 = arith.constant 0 : index
    %25 = vector.load %arg3[%c2_16, %c0_17, %c0_18] : memref<9x8x128xbf16, #tpu.memory_space<vmem>>, vector<1x8x128xbf16>
    %26 = vector.shape_cast %25 : vector<1x8x128xbf16> to vector<8x128xbf16>
    %cst_19 = arith.constant dense<0.000000e+00> : vector<256x128xf32>
    %27 = tpu.matmul %24, %26, %cst_19 {dimension_numbers = #tpu.dot_dimension_numbers<[1], [0], [0], [1], [0, 0, 1, 1], [], []>} : vector<256x8xbf16>, vector<8x128xbf16>, vector<256x128xf32> -> vector<256x128xf32>
    %28 = arith.addf %19, %27 : vector<256x128xf32>
    %c1_i32 = arith.constant 1 : i32
    %29 = arith.addi %0, %c1_i32 : i32
    %c0_20 = arith.constant 0 : index
    %30 = arith.index_cast %29 : i32 to index
    %c0_21 = arith.constant 0 : index
    %c0_22 = arith.constant 0 : index
    %31 = vector.load %arg2[%c0_20, %30, %c0_21, %c0_22] : memref<1x18x18x8xbf16, #tpu.memory_space<vmem>>, vector<1x16x16x8xbf16>
    %32 = vector.shape_cast %31 : vector<1x16x16x8xbf16> to vector<16x16x8xbf16>
    %33 = vector.shape_cast %32 : vector<16x16x8xbf16> to vector<256x8xbf16>
    %c3 = arith.constant 3 : index
    %c0_23 = arith.constant 0 : index
    %c0_24 = arith.constant 0 : index
    %34 = vector.load %arg3[%c3, %c0_23, %c0_24] : memref<9x8x128xbf16, #tpu.memory_space<vmem>>, vector<1x8x128xbf16>
    %35 = vector.shape_cast %34 : vector<1x8x128xbf16> to vector<8x128xbf16>
    %cst_25 = arith.constant dense<0.000000e+00> : vector<256x128xf32>
    %36 = tpu.matmul %33, %35, %cst_25 {dimension_numbers = #tpu.dot_dimension_numbers<[1], [0], [0], [1], [0, 0, 1, 1], [], []>} : vector<256x8xbf16>, vector<8x128xbf16>, vector<256x128xf32> -> vector<256x128xf32>
    %37 = arith.addf %28, %36 : vector<256x128xf32>
    %c1_i32_26 = arith.constant 1 : i32
    %38 = arith.addi %0, %c1_i32_26 : i32
    %c0_27 = arith.constant 0 : index
    %39 = arith.index_cast %38 : i32 to index
    %c1_28 = arith.constant 1 : index
    %c0_29 = arith.constant 0 : index
    %40 = vector.load %arg2[%c0_27, %39, %c1_28, %c0_29] : memref<1x18x18x8xbf16, #tpu.memory_space<vmem>>, vector<1x16x16x8xbf16>
    %41 = vector.shape_cast %40 : vector<1x16x16x8xbf16> to vector<16x16x8xbf16>
    %42 = vector.shape_cast %41 : vector<16x16x8xbf16> to vector<256x8xbf16>
    %c4 = arith.constant 4 : index
    %c0_30 = arith.constant 0 : index
    %c0_31 = arith.constant 0 : index
    %43 = vector.load %arg3[%c4, %c0_30, %c0_31] : memref<9x8x128xbf16, #tpu.memory_space<vmem>>, vector<1x8x128xbf16>
    %44 = vector.shape_cast %43 : vector<1x8x128xbf16> to vector<8x128xbf16>
    %cst_32 = arith.constant dense<0.000000e+00> : vector<256x128xf32>
    %45 = tpu.matmul %42, %44, %cst_32 {dimension_numbers = #tpu.dot_dimension_numbers<[1], [0], [0], [1], [0, 0, 1, 1], [], []>} : vector<256x8xbf16>, vector<8x128xbf16>, vector<256x128xf32> -> vector<256x128xf32>
    %46 = arith.addf %37, %45 : vector<256x128xf32>
    %c1_i32_33 = arith.constant 1 : i32
    %47 = arith.addi %0, %c1_i32_33 : i32
    %c0_34 = arith.constant 0 : index
    %48 = arith.index_cast %47 : i32 to index
    %c2_35 = arith.constant 2 : index
    %c0_36 = arith.constant 0 : index
    %49 = vector.load %arg2[%c0_34, %48, %c2_35, %c0_36] : memref<1x18x18x8xbf16, #tpu.memory_space<vmem>>, vector<1x16x16x8xbf16>
    %50 = vector.shape_cast %49 : vector<1x16x16x8xbf16> to vector<16x16x8xbf16>
    %51 = vector.shape_cast %50 : vector<16x16x8xbf16> to vector<256x8xbf16>
    %c5 = arith.constant 5 : index
    %c0_37 = arith.constant 0 : index
    %c0_38 = arith.constant 0 : index
    %52 = vector.load %arg3[%c5, %c0_37, %c0_38] : memref<9x8x128xbf16, #tpu.memory_space<vmem>>, vector<1x8x128xbf16>
    %53 = vector.shape_cast %52 : vector<1x8x128xbf16> to vector<8x128xbf16>
    %cst_39 = arith.constant dense<0.000000e+00> : vector<256x128xf32>
    %54 = tpu.matmul %51, %53, %cst_39 {dimension_numbers = #tpu.dot_dimension_numbers<[1], [0], [0], [1], [0, 0, 1, 1], [], []>} : vector<256x8xbf16>, vector<8x128xbf16>, vector<256x128xf32> -> vector<256x128xf32>
    %55 = arith.addf %46, %54 : vector<256x128xf32>
    %c2_i32 = arith.constant 2 : i32
    %56 = arith.addi %0, %c2_i32 : i32
    %c0_40 = arith.constant 0 : index
    %57 = arith.index_cast %56 : i32 to index
    %c0_41 = arith.constant 0 : index
    %c0_42 = arith.constant 0 : index
    %58 = vector.load %arg2[%c0_40, %57, %c0_41, %c0_42] : memref<1x18x18x8xbf16, #tpu.memory_space<vmem>>, vector<1x16x16x8xbf16>
    %59 = vector.shape_cast %58 : vector<1x16x16x8xbf16> to vector<16x16x8xbf16>
    %60 = vector.shape_cast %59 : vector<16x16x8xbf16> to vector<256x8xbf16>
    %c6 = arith.constant 6 : index
    %c0_43 = arith.constant 0 : index
    %c0_44 = arith.constant 0 : index
    %61 = vector.load %arg3[%c6, %c0_43, %c0_44] : memref<9x8x128xbf16, #tpu.memory_space<vmem>>, vector<1x8x128xbf16>
    %62 = vector.shape_cast %61 : vector<1x8x128xbf16> to vector<8x128xbf16>
    %cst_45 = arith.constant dense<0.000000e+00> : vector<256x128xf32>
    %63 = tpu.matmul %60, %62, %cst_45 {dimension_numbers = #tpu.dot_dimension_numbers<[1], [0], [0], [1], [0, 0, 1, 1], [], []>} : vector<256x8xbf16>, vector<8x128xbf16>, vector<256x128xf32> -> vector<256x128xf32>
    %64 = arith.addf %55, %63 : vector<256x128xf32>
    %c2_i32_46 = arith.constant 2 : i32
    %65 = arith.addi %0, %c2_i32_46 : i32
    %c0_47 = arith.constant 0 : index
    %66 = arith.index_cast %65 : i32 to index
    %c1_48 = arith.constant 1 : index
    %c0_49 = arith.constant 0 : index
    %67 = vector.load %arg2[%c0_47, %66, %c1_48, %c0_49] : memref<1x18x18x8xbf16, #tpu.memory_space<vmem>>, vector<1x16x16x8xbf16>
    %68 = vector.shape_cast %67 : vector<1x16x16x8xbf16> to vector<16x16x8xbf16>
    %69 = vector.shape_cast %68 : vector<16x16x8xbf16> to vector<256x8xbf16>
    %c7 = arith.constant 7 : index
    %c0_50 = arith.constant 0 : index
    %c0_51 = arith.constant 0 : index
    %70 = vector.load %arg3[%c7, %c0_50, %c0_51] : memref<9x8x128xbf16, #tpu.memory_space<vmem>>, vector<1x8x128xbf16>
    %71 = vector.shape_cast %70 : vector<1x8x128xbf16> to vector<8x128xbf16>
    %cst_52 = arith.constant dense<0.000000e+00> : vector<256x128xf32>
    %72 = tpu.matmul %69, %71, %cst_52 {dimension_numbers = #tpu.dot_dimension_numbers<[1], [0], [0], [1], [0, 0, 1, 1], [], []>} : vector<256x8xbf16>, vector<8x128xbf16>, vector<256x128xf32> -> vector<256x128xf32>
    %73 = arith.addf %64, %72 : vector<256x128xf32>
    %c2_i32_53 = arith.constant 2 : i32
    %74 = arith.addi %0, %c2_i32_53 : i32
    %c0_54 = arith.constant 0 : index
    %75 = arith.index_cast %74 : i32 to index
    %c2_55 = arith.constant 2 : index
    %c0_56 = arith.constant 0 : index
    %76 = vector.load %arg2[%c0_54, %75, %c2_55, %c0_56] : memref<1x18x18x8xbf16, #tpu.memory_space<vmem>>, vector<1x16x16x8xbf16>
    %77 = vector.shape_cast %76 : vector<1x16x16x8xbf16> to vector<16x16x8xbf16>
    %78 = vector.shape_cast %77 : vector<16x16x8xbf16> to vector<256x8xbf16>
    %c8 = arith.constant 8 : index
    %c0_57 = arith.constant 0 : index
    %c0_58 = arith.constant 0 : index
    %79 = vector.load %arg3[%c8, %c0_57, %c0_58] : memref<9x8x128xbf16, #tpu.memory_space<vmem>>, vector<1x8x128xbf16>
    %80 = vector.shape_cast %79 : vector<1x8x128xbf16> to vector<8x128xbf16>
    %cst_59 = arith.constant dense<0.000000e+00> : vector<256x128xf32>
    %81 = tpu.matmul %78, %80, %cst_59 {dimension_numbers = #tpu.dot_dimension_numbers<[1], [0], [0], [1], [0, 0, 1, 1], [], []>} : vector<256x8xbf16>, vector<8x128xbf16>, vector<256x128xf32> -> vector<256x128xf32>
    %82 = arith.addf %73, %81 : vector<256x128xf32>
    %83 = arith.truncf %82 : vector<256x128xf32> to vector<256x128xbf16>
    %c0_60 = arith.constant 0 : index
    %c0_61 = arith.constant 0 : index
    %c0_62 = arith.constant 0 : index
    %84 = vector.load %arg4[%c0_60, %c0_61, %c0_62] : memref<1x256x128xbf16, #tpu.memory_space<vmem>>, vector<1x256x128xbf16>
    %85 = vector.shape_cast %84 : vector<1x256x128xbf16> to vector<256x128xbf16>
    %86 = vector.shape_cast %83 : vector<256x128xbf16> to vector<1x256x128xbf16>
    tpu.vector_store %arg4[%c0_60, %c0_61, %c0_62], %86 {strides = array<i32>} : memref<1x256x128xbf16, #tpu.memory_space<vmem>>, vector<1x256x128xbf16>,
    %cst_63 = arith.constant dense<0.000000e+00> : vector<128xf32>
    %87 = vector.multi_reduction <add>, %82, %cst_63 [0] : vector<256x128xf32> to vector<128xf32>
    %88 = vector.shape_cast %87 : vector<128xf32> to vector<1x128xf32>
    %89 = arith.mulf %82, %82 : vector<256x128xf32>
    %cst_64 = arith.constant dense<0.000000e+00> : vector<128xf32>
    %90 = vector.multi_reduction <add>, %89, %cst_64 [0] : vector<256x128xf32> to vector<128xf32>
    %91 = vector.shape_cast %90 : vector<128xf32> to vector<1x128xf32>
    %92 = vector.shape_cast %88 : vector<1x128xf32> to vector<1x128xf32>
    %93 = vector.broadcast %92 : vector<1x128xf32> to vector<4x128xf32>
    %94 = vector.shape_cast %91 : vector<1x128xf32> to vector<1x128xf32>
    %95 = vector.broadcast %94 : vector<1x128xf32> to vector<4x128xf32>
    %96 = tpu.concatenate %93, %95 in 0 : vector<4x128xf32>, vector<4x128xf32> -> vector<8x128xf32>
    %c0_65 = arith.constant 0 : index
    %c0_66 = arith.constant 0 : index
    %c0_67 = arith.constant 0 : index
    %c0_68 = arith.constant 0 : index
    %97 = vector.load %arg5[%c0_65, %c0_66, %c0_67, %c0_68] : memref<1x1x8x128xf32, #tpu.memory_space<vmem>>, vector<1x1x8x128xf32>
    %98 = vector.shape_cast %97 : vector<1x1x8x128xf32> to vector<8x128xf32>
    %99 = vector.shape_cast %96 : vector<8x128xf32> to vector<1x1x8x128xf32>
    tpu.vector_store %arg5[%c0_65, %c0_66, %c0_67, %c0_68], %99 {strides = array<i32>} : memref<1x1x8x128xf32, #tpu.memory_space<vmem>>, vector<1x1x8x128xf32>,
    return
  }
  func.func @transform_0(%arg0: i32, %arg1: i32) -> (i32, i32, i32, i32) {
    %c0_i32 = arith.constant 0 : i32
    %c0_i32_0 = arith.constant 0 : i32
    %c0_i32_1 = arith.constant 0 : i32
    %c0_i32_2 = arith.constant 0 : i32
    return %arg0, %c0_i32, %c0_i32_0, %c0_i32_1 : i32, i32, i32, i32
  }
  func.func @transform_1(%arg0: i32, %arg1: i32) -> (i32, i32, i32) {
    %c0_i32 = arith.constant 0 : i32
    %c0_i32_0 = arith.constant 0 : i32
    %c0_i32_1 = arith.constant 0 : i32
    %c0_i32_2 = arith.constant 0 : i32
    return %c0_i32, %c0_i32_0, %c0_i32_1 : i32, i32, i32
  }
  func.func @transform_2(%arg0: i32, %arg1: i32) -> (i32, i32, i32) {
    %c0_i32 = arith.constant 0 : i32
    %c0_i32_0 = arith.constant 0 : i32
    return %arg0, %arg1, %c0_i32 : i32, i32, i32
  }
  func.func @transform_3(%arg0: i32, %arg1: i32) -> (i32, i32, i32, i32) {
    %c0_i32 = arith.constant 0 : i32
    %c0_i32_0 = arith.constant 0 : i32
    %c0_i32_1 = arith.constant 0 : i32
    return %arg0, %arg1, %c0_i32, %c0_i32_0 : i32, i32, i32, i32
  }
}

</mosaic_0001>

<bundles_post_ra>
// kernel: forward.2
= control target key start
LH: loop header
LB: loop body
LE: loop exit
PB: predicated region body
PF: predicated region fallthrough
CT: control target
= control target key end

     0   :  { %s1376_s12 = smov 0   ;;  %s1378_s13 = smov 0   ;;  %s1531_s0 = inlined_call_operand.vmem [shape: bf16[2,9,9,16], index: 0, kind: input, shape index: {}]   ;;  %s1532_s1 = inlined_call_operand.vmem [shape: bf16[4,16,128], index: 1, kind: input, shape index: {}]   ;;  %s1533_s2 = inlined_call_operand.vmem [shape: bf16[2,64,128], index: 2, kind: output, shape index: {0}]   ;;  %s1534_s3 = inlined_call_operand.vmem [shape: f32[2,1,8,128], index: 3, kind: output, shape index: {1}]  }
   0x1   :  { %s1380_s14 = smov 0  }
   0x2 LB: > { %s26_s15 = sadd.s32 1, %s1350_s13  ;;  %p1122_p0 = scmp.ge.s32.totalorder %s1354_s14, 1  ;;  %s1354_s14 = sphi %s1380_s14, %s14_s14   ;;  %s1350_s13 = sphi %s1378_s13, %s1538_s13   ;;  %s1346_s12 = sphi %s1376_s12, %s1537_s12  }
   0x3   : > { %p28_p1 = scmp.ge.s32.totalorder %s26_s15, 2  ;;  %p156_p2 = scmp.lt.s32.totalorder %s1354_s14, 3 }
   0x5   : > { %s1540_s15 = smov (%p28_p1, %s26_s15), 0  ;;  %p157_p3 = pnand %p1122_p0, %p156_p2 }
   0x6   : > { %p191_p4 = scmp.lt.s32.totalorder (!%p157_p3), %s1346_s12, 1 }
   0x7   : > { %160 = sbr.rel (%p157_p3) target bundleno = 285 (0x11d), region = 28 }
   0xc   : > { %v1320_v0 = vld [vmem:[%s1532_s1] sm:$0xff]   ;;  %v1321_v1 = vld [vmem:[%s1532_s1 + $0x8] sm:$0xff]   ;;  %s1542_s12 = smov (!%p191_p4, %s1346_s12), 1  ;;  %v1405_v2 = vld [vmem:[%s1532_s1 + $0x10] sm:$0xff]   ;;  %vm372_vm0 = vcmask 130048   ;;  %vm987_vm4 = vcmask 1043456  }
   0xd   : > { %1265 = vmatprep.subr.bf16.mxu1 %v1320_v0  ;;  %1255 = vmatprep.subr.bf16.mxu0 %v1321_v1  ;;  %s1295_s22 = smul.u32 72, %s1542_s12  ;;  %v1325_v3 = vld [vmem:[%s1532_s1 + $0x18] sm:$0xff]   ;;  %vm236_vm1 = vsmask.f32 3328  ;;  %vm237_vm2 = vsmask.f32 7440 }
   0xe   : > { %1266 = vmatpush3.bf16.msra.mxu1 %v1320_v0  ;;  %1256 = vmatpush3.bf16.msra.mxu0 %v1321_v1  ;;  %vm1428_vm3 = vmor %vm236_vm1, %vm237_vm2  ;;  %s1203_s28 = sshll.u32 %s1542_s12, 5  ;;  %s1126_s5 = sshll.u32 %s1542_s12, 3 }
   0xf   : > { %1275 = vmatprep.subr.bf16.mxu0 %v1405_v2  ;;  %s1415_s27 = scalar_lea.vmem %s1531_s0, %s1295_s22  ;;  %1285 = vmatprep.subr.bf16.mxu1 %v1325_v3  ;;  %s1512_s4 = scalar_lea.vmem %s1533_s2, %s1203_s28 }
  0x10   : > { %v218_v4 = vld [vmem:[%s1415_s27] sm:$0xf]  ;;  %v219_v5 = vld [vmem:[%s1415_s27 + $0x8] sm:$0xf]  ;;  %v220_v6 = vld [vmem:[%s1415_s27 + $0x10] sm:$0xf]  ;;  %s212_s8 = scalar_lea.vmem %s1534_s3, %s1126_s5 }
  0x11   : > { %v240_v7 = vshrl.u32 %v218_v4, 16  ;;  %v243_v8 = vshll.u32 %v218_v4, 16  ;;  %v254_v9 = vshrl.u32 %v219_v5, 16  ;;  %v257_v10 = vshll.u32 %v219_v5, 16  ;;  %v221_v11 = vld [vmem:[%s1415_s27 + $0x18] sm:$0xf] }
  0x12   : > { %v1138_v12 = vcombine.low %v218_v4, %v219_v5  ;;  %v268_v13 = vshrl.u32 %v220_v6, 16  ;;  %v271_v14 = vshll.u32 %v220_v6, 16  ;;  %v282_v15 = vshrl.u32 %v221_v11, 16  ;;  %v228_v16 = vld [vmem:[%s1415_s27 + $0x4] sm:$0x1] }
  0x13   : > { %v242_v17 = vrot.slane %v240_v7, 4  ;;  %v245_v18 = vrot.slane %v243_v8, 5  ;;  %v256_v19 = vrot.slane %v254_v9, 4  ;;  %v259_v20 = vrot.slane %v257_v10, 5  ;;  %v229_v21 = vld [vmem:[%s1415_s27 + $0xc] sm:$0x1] }
  0x14   : > { %1267 = vmatprep.mubr.msk.bf16.mxu1 %vm372_vm0, %v1138_v12  ;;  %v270_v22 = vrot.slane %v268_v13, 4  ;;  %v273_v23 = vrot.slane %v271_v14, 5  ;;  %v284_v24 = vrot.slane %v282_v15, 4  ;;  %v285_v25 = vshll.u32 %v221_v11, 16  ;;  %v230_v26 = vld [vmem:[%s1415_s27 + $0x14] sm:$0x1] }
  0x15   : > { %v1139_v27 = vcombine.low %v220_v6, %v221_v11  ;;  %v246_v28 = vor.u32 %v245_v18, %v242_v17  ;;  %v249_v29 = vshll.u32 %v228_v16, 16  ;;  %v260_v30 = vor.u32 %v259_v20, %v256_v19  ;;  %v231_v31 = vld [vmem:[%s1415_s27 + $0x1c] sm:$0x1]  ;;  %v222_v37 = vld [vmem:[%s1415_s27 + $0x20] sm:$0xf] }
  0x16   : > { %v287_v32 = vrot.slane %v285_v25, 5  ;;  %v263_v34 = vshll.u32 %v229_v21, 16  ;;  %v274_v35 = vor.u32 %v273_v23, %v270_v22  ;;  %v277_v36 = vshll.u32 %v230_v26, 16  ;;  %v223_v42 = vld [vmem:[%s1415_s27 + $0x28] sm:$0xf] }
  0x17   : > { %1268 = vmatmul.mubr.msk.bf16.vlgmr.msra.gmra.mxu1 %vm372_vm0, %v1139_v27  ;;  %v247_v38 = vrot.slane %v246_v28, 4  ;;  %v251_v39 = vrot.slane %v249_v29, 5  ;;  %v261_v40 = vrot.slane %v260_v30, 4  ;;  %v291_v41 = vshll.u32 %v231_v31, 16  ;;  %v224_v51 = vld [vmem:[%s1415_s27 + $0x30] sm:$0xf] }
  0x18   : > { %v265_v43 = vrot.slane %v263_v34, 5  ;;  %v275_v44 = vrot.slane %v274_v35, 4  ;;  %v279_v45 = vrot.slane %v277_v36, 5  ;;  %v288_v46 = vor.u32 %v287_v32, %v284_v24  ;;  %1286 = vmatpush3.bf16.msra.mxu1 %v1325_v3  ;;  %v225_v56 = vld [vmem:[%s1415_s27 + $0x38] sm:$0xf] }
  0x19   : > { %v252_v47 = vsel %vm1428_vm3, %v247_v38, %v251_v39  ;;  %v293_v48 = vrot.slane %v291_v41, 5  ;;  %v296_v49 = vshrl.u32 %v222_v37, 16  ;;  %v299_v50 = vshll.u32 %v222_v37, 16  ;;  %v232_v1 = vld [vmem:[%s1415_s27 + $0x24] sm:$0x1] }
  0x1a   : > { %v266_v52 = vsel %vm1428_vm3, %v261_v40, %v265_v43  ;;  %v280_v53 = vsel %vm1428_vm3, %v275_v44, %v279_v45  ;;  %v289_v54 = vrot.slane %v288_v46, 4  ;;  %v310_v55 = vshrl.u32 %v223_v42, 16  ;;  %v233_v3 = vld [vmem:[%s1415_s27 + $0x2c] sm:$0x1]  ;;  %v234_v8 = vld [vmem:[%s1415_s27 + $0x34] sm:$0x1] }
  0x1b   : > { %v1129_v57 = vcombine.low %v252_v47, %v266_v52  ;;  %v298_v58 = vrot.slane %v296_v49, 4  ;;  %v301_v59 = vrot.slane %v299_v50, 5  ;;  %v313_v60 = vshll.u32 %v223_v42, 16  ;;  %v235_v13 = vld [vmem:[%s1415_s27 + $0x3c] sm:$0x1] }
  0x1c   : > { %v294_v61 = vsel %vm1428_vm3, %v289_v54, %v293_v48  ;;  %v312_v62 = vrot.slane %v310_v55, 4  ;;  %v1140_v63 = vcombine.low %v222_v37, %v223_v42  ;;  %v324_v0 = vshrl.u32 %v224_v51, 16  ;;  %v1166_v14 = vld [vmem:[%s1415_s27 + $0x8] sm:$0xf]  ;;  %v1167_v19 = vld [vmem:[%s1415_s27 + $0xc] sm:$0x1] }
  0x1d   : > { %1257 = vmatprep.mubr.msk.bf16.mxu0 %vm372_vm0, %v1129_v57  ;;  %v1130_v4 = vcombine.low %v280_v53, %v294_v61  ;;  %v315_v5 = vrot.slane %v313_v60, 5  ;;  %v327_v6 = vshll.u32 %v224_v51, 16  ;;  %v338_v7 = vshrl.u32 %v225_v56, 16  ;;  %v1168_v24 = vld [vmem:[%s1415_s27 + $0x10] sm:$0xf] }
  0x1e   : > { %1271 = vmatprep.mubr.msk.bf16.mxu1 %vm372_vm0, %v1140_v63  ;;  %v326_v9 = vrot.slane %v324_v0, 4  ;;  %v341_v10 = vshll.u32 %v225_v56, 16  ;;  %v1141_v11 = vcombine.low %v224_v51, %v225_v56  ;;  %v302_v12 = vor.u32 %v301_v59, %v298_v58  ;;  %v1169_v29 = vld [vmem:[%s1415_s27 + $0x14] sm:$0x1]  ;;  %v1171_v39 = vld [vmem:[%s1415_s27 + $0x1c] sm:$0x1] }
  0x1f   : > { %1258 = vmatmul.mubr.msk.bf16.vlgmr.msra.gmra.mxu0 %vm372_vm0, %v1130_v4  ;;  %v329_v15 = vrot.slane %v327_v6, 5  ;;  %v340_v16 = vrot.slane %v338_v7, 4  ;;  %v305_v17 = vshll.u32 %v232_v1, 16  ;;  %v316_v18 = vor.u32 %v315_v5, %v312_v62  ;;  %v1172_v44 = vld [vmem:[%s1415_s27 + $0x20] sm:$0xf] }
  0x20   : > { %1276 = vmatpush3.bf16.msra.mxu0 %v1405_v2  ;;  %v343_v20 = vrot.slane %v341_v10, 5  ;;  %1272 = vmatmul.mubr.msk.bf16.gmra.mxu1 %vm372_vm0, %v1141_v11  ;;  %v303_v21 = vrot.slane %v302_v12, 4  ;;  %v319_v22 = vshll.u32 %v233_v3, 16  ;;  %v333_v23 = vshll.u32 %v234_v8, 16  ;;  %v1170_v2 = vld [vmem:[%s1415_s27 + $0x18] sm:$0xf] }
  0x21   : > { %v307_v25 = vrot.slane %v305_v17, 5  ;;  %v317_v26 = vrot.slane %v316_v18, 4  ;;  %v330_v27 = vor.u32 %v329_v15, %v326_v9  ;;  %v347_v28 = vshll.u32 %v235_v13, 16  ;;  %v1328_v53 = vld [vmem:[%s1415_s27 + $0x8] ss:$8 sps:$4 sm:$0xff]  }
  0x22   : > { %v321_v30 = vrot.slane %v319_v22, 5  ;;  %v335_v31 = vrot.slane %v333_v23, 5  ;;  %v344_v32 = vor.u32 %v343_v20, %v340_v16  ;;  %v696_v34 = vshrl.u32 %v1166_v14, 16  ;;  %v1173_v57 = vld [vmem:[%s1415_s27 + $0x24] sm:$0x1] }
  0x23   : > { %v308_v35 = vsel %vm1428_vm3, %v303_v21, %v307_v25  ;;  %v331_v36 = vrot.slane %v330_v27, 4  ;;  %v349_v37 = vrot.slane %v347_v28, 5  ;;  %v699_v38 = vshll.u32 %v1166_v14, 16  ;;  %v1174_v63 = vld [vmem:[%s1415_s27 + $0x28] sm:$0xf] }
  0x24   : > { %v322_v40 = vsel %vm1428_vm3, %v317_v26, %v321_v30  ;;  %v345_v41 = vrot.slane %v344_v32, 4  ;;  %v698_v42 = vrot.slane %v696_v34, 4  ;;  %v705_v43 = vshll.u32 %v1167_v19, 16  ;;  %v1175_v5 = vld [vmem:[%s1415_s27 + $0x2c] sm:$0x1] }
  0x25   : > { %v1131_v45 = vcombine.low %v308_v35, %v322_v40  ;;  %v336_v46 = vsel %vm1428_vm3, %v331_v36, %v335_v31  ;;  %v701_v47 = vrot.slane %v699_v38, 5  ;;  %v710_v48 = vshrl.u32 %v1168_v24, 16  ;;  %v1176_v10 = vld [vmem:[%s1415_s27 + $0x30] sm:$0xf]  ;;  %v1329_v14 = vld [vmem:[%s1415_s27 + $0x18] ss:$8 sps:$4 sm:$0xff]  }
  0x26   : > { %v350_v49 = vsel %vm1428_vm3, %v345_v41, %v349_v37  ;;  %v707_v50 = vrot.slane %v705_v43, 5  ;;  %v713_v51 = vshll.u32 %v1168_v24, 16  ;;  %v719_v52 = vshll.u32 %v1169_v29, 16  ;;  %v1177_v15 = vld [vmem:[%s1415_s27 + $0x34] sm:$0x1] }
  0x27   : > { %1261 = vmatprep.mubr.msk.bf16.mxu0 %vm372_vm0, %v1131_v45  ;;  %v1132_v54 = vcombine.low %v336_v46, %v350_v49  ;;  %v702_v55 = vor.u32 %v701_v47, %v698_v42  ;;  %v712_v56 = vrot.slane %v710_v48, 4  ;;  %v724_v58 = vshrl.u32 %v1170_v2, 16  ;;  %v1178_v21 = vld [vmem:[%s1415_s27 + $0x38] sm:$0xf]  ;;  %v1179_v26 = vld [vmem:[%s1415_s27 + $0x3c] sm:$0x1] }
  0x28   : > { %v715_v59 = vrot.slane %v713_v51, 5  ;;  %v721_v60 = vrot.slane %v719_v52, 5  ;;  %v727_v61 = vshll.u32 %v1170_v2, 16  ;;  %v733_v62 = vshll.u32 %v1171_v39, 16  ;;  %v1180_v31 = vld [vmem:[%s1415_s27 + $0x40] sm:$0xf] }
  0x29   : > { %1262 = vmatmul.mubr.msk.bf16.gmra.mxu0 %vm372_vm0, %v1132_v54  ;;  %v703_v0 = vrot.slane %v702_v55, 4  ;;  %v726_v1 = vrot.slane %v724_v58, 4  ;;  %v738_v3 = vshrl.u32 %v1172_v44, 16  ;;  %v741_v4 = vshll.u32 %v1172_v44, 16  ;;  %v1181_v36 = vld [vmem:[%s1415_s27 + $0x44] sm:$0x1] }
  0x2a   : > { %v716_v6 = vor.u32 %v715_v59, %v712_v56  ;;  %v729_v7 = vrot.slane %v727_v61, 5  ;;  %v735_v8 = vrot.slane %v733_v62, 5  ;;  %v747_v9 = vshll.u32 %v1173_v57, 16  ;;  %1277 = vmatprep.mubr.msk.bf16.mxu0 %vm372_vm0, %v1328_v53  ;;  %v1330_v41 = vld [vmem:[%s1415_s27 + $0x28] ss:$8 sps:$4 sm:$0xff]  }
  0x2b   : > { %v708_v11 = vsel %vm1428_vm3, %v703_v0, %v707_v50  ;;  %v740_v12 = vrot.slane %v738_v3, 4  ;;  %v743_v13 = vrot.slane %v741_v4, 5  ;;  %v752_v16 = vshrl.u32 %v1174_v63, 16  ;;  %v1331_v59 = vld [vmem:[%s1415_s27 + $0x38] ss:$8 sps:$4 sm:$0xff]  }
  0x2c   : > { %v717_v17 = vrot.slane %v716_v6, 4  ;;  %v730_v18 = vor.u32 %v729_v7, %v726_v1  ;;  %v749_v19 = vrot.slane %v747_v9, 5  ;;  %v755_v20 = vshll.u32 %v1174_v63, 16 }
  0x2d   : > { %v744_v22 = vor.u32 %v743_v13, %v740_v12  ;;  %v754_v23 = vrot.slane %v752_v16, 4  ;;  %v761_v24 = vshll.u32 %v1175_v5, 16  ;;  %v766_v25 = vshrl.u32 %v1176_v10, 16 }
  0x2e   : > { %v722_v27 = vsel %vm1428_vm3, %v717_v17, %v721_v60  ;;  %v731_v28 = vrot.slane %v730_v18, 4  ;;  %v757_v29 = vrot.slane %v755_v20, 5  ;;  %v769_v30 = vshll.u32 %v1176_v10, 16 }
  0x2f   : > { %v1184_v32 = vcombine.low %v708_v11, %v722_v27  ;;  %v745_v34 = vrot.slane %v744_v22, 4  ;;  %v763_v2 = vrot.slane %v761_v24, 5  ;;  %v768_v35 = vrot.slane %v766_v25, 4 }
  0x30   : > { %v736_v37 = vsel %vm1428_vm3, %v731_v28, %v735_v8  ;;  %v758_v38 = vor.u32 %v757_v29, %v754_v23  ;;  %v771_v39 = vrot.slane %v769_v30, 5  ;;  %v775_v40 = vshll.u32 %v1177_v15, 16 }
  0x31   : > { %1287 = vmatprep.mubr.msk.bf16.mxu1 %vm372_vm0, %v1184_v32  ;;  %v750_v42 = vsel %vm1428_vm3, %v745_v34, %v749_v19  ;;  %1278 = vmatmul.mubr.msk.bf16.vlgmr.msra.gmra.mxu0 %vm372_vm0, %v1329_v14  ;;  %v780_v43 = vshrl.u32 %v1178_v21, 16  ;;  %v783_v44 = vshll.u32 %v1178_v21, 16  ;;  %v789_v45 = vshll.u32 %v1179_v26, 16 }
  0x32   : > { %v1185_v46 = vcombine.low %v736_v37, %v750_v42  ;;  %v759_v47 = vrot.slane %v758_v38, 4  ;;  %v772_v48 = vor.u32 %v771_v39, %v768_v35  ;;  %v777_v49 = vrot.slane %v775_v40, 5  ;;  %1281 = vmatprep.mubr.msk.bf16.mxu0 %vm372_vm0, %v1330_v41 }
  0x33   : > { %v782_v50 = vrot.slane %v780_v43, 4  ;;  %v785_v51 = vrot.slane %v783_v44, 5  ;;  %v794_v52 = vshrl.u32 %v1180_v31, 16  ;;  %v797_v55 = vshll.u32 %v1180_v31, 16 }
  0x34   : > { %1288 = vmatmul.mubr.msk.bf16.vlgmr.msra.gmra.mxu1 %vm372_vm0, %v1185_v46  ;;  %v764_v53 = vsel %vm1428_vm3, %v759_v47, %v763_v2  ;;  %v773_v54 = vrot.slane %v772_v48, 4  ;;  %v803_v56 = vshll.u32 %v1181_v36, 16  ;;  %v791_v61 = vrot.slane %v789_v45, 5 }
  0x35   : > { %v786_v57 = vor.u32 %v785_v51, %v782_v50  ;;  %v796_v58 = vrot.slane %v794_v52, 4  ;;  %v799_v62 = vrot.slane %v797_v55, 5 }
  0x36   : > { %v778_v60 = vsel %vm1428_vm3, %v773_v54, %v777_v49  ;;  %v805_v3 = vrot.slane %v803_v56, 5 }
  0x37   : > { %v1186_v63 = vcombine.low %v764_v53, %v778_v60  ;;  %v787_v0 = vrot.slane %v786_v57, 4  ;;  %v800_v1 = vor.u32 %v799_v62, %v796_v58 }
  0x39   : > { %1291 = vmatprep.mubr.msk.bf16.mxu1 %vm372_vm0, %v1186_v63  ;;  %1282 = vmatmul.mubr.msk.bf16.gmra.mxu0 %vm372_vm0, %v1331_v59  ;;  %v792_v4 = vsel %vm1428_vm3, %v787_v0, %v791_v61  ;;  %v801_v5 = vrot.slane %v800_v1, 4 }
  0x3b   : > { %v806_v6 = vsel %vm1428_vm3, %v801_v5, %v805_v3 }
  0x3c   : > { %v1187_v7 = vcombine.low %v792_v4, %v806_v6 }
  0x3e   : > { %1292 = vmatmul.mubr.msk.bf16.gmra.mxu1 %vm372_vm0, %v1187_v7 }
  0xd7   : > { %v1269_v8 = vpop.f32.mrf.mxu1 }
  0xd9   : > { %v522_v9 = vpop.f32.mrf.mxu1 }
  0xdb   : > { %v1270_v10 = vpop.f32.mrf.mxu1 }
  0xdd   : > { %v525_v12 = vpop.f32.mrf.mxu1 }
  0xdf   : > { %v1259_v11 = vpop.f32.mrf.mxu0 }
  0xe0   : > { %v1273_v15 = vpop.f32.mrf.mxu1  ;;  %v531_v24 = vadd.f32 %v1269_v8, %v1259_v11 }
  0xe1   : > { %v419_v13 = vpop.f32.mrf.mxu0 }
  0xe2   : > { %v538_v17 = vpop.f32.mrf.mxu1  ;;  %v523_v25 = vadd.f32 %v522_v9, %v419_v13 }
  0xe3   : > { %v1260_v14 = vpop.f32.mrf.mxu0 }
  0xe4   : > { %v1274_v20 = vpop.f32.mrf.mxu1  ;;  %v534_v27 = vadd.f32 %v1270_v10, %v1260_v14 }
  0xe5   : > { %v422_v16 = vpop.f32.mrf.mxu0 }
  0xe6   : > { %v541_v22 = vpop.f32.mrf.mxu1  ;;  %v526_v32 = vadd.f32 %v525_v12, %v422_v16 }
  0xe9   : > { %v1263_v18 = vpop.f32.mrf.mxu0 }
  0xea   : > { %v547_v52 = vadd.f32 %v1273_v15, %v1263_v18 }
  0xeb   : > { %v435_v19 = vpop.f32.mrf.mxu0 }
  0xec   : > { %v539_v46 = vadd.f32 %v538_v17, %v435_v19 }
  0xed   : > { %v1264_v21 = vpop.f32.mrf.mxu0 }
  0xee   : > { %v550_v53 = vadd.f32 %v1274_v20, %v1264_v21 }
  0xef   : > { %v438_v33 = vpop.f32.mrf.mxu0 }
  0xf0   : > { %v542_v60 = vadd.f32 %v541_v22, %v438_v33 }
  0xf1   : > { %v1279_v23 = vpop.f32.mrf.mxu0 }
  0xf2   : > { %v673_v29 = vadd.f32 %v1279_v23, %v531_v24 }
  0xf3   : > { %v640_v26 = vpop.f32.mrf.mxu0 }
  0xf4   : > { %v1289_v28 = vpop.f32.mrf.mxu1  ;;  %v671_v30 = vadd.f32 %v640_v26, %v523_v25 }
  0xf5   : > { %v1280_v31 = vpop.f32.mrf.mxu0  ;;  %v907_v38 = vadd.f32 %v1289_v28, %v673_v29 }
  0xf6   : > { %v874_v34 = vpop.f32.mrf.mxu1  ;;  %v674_v2 = vadd.f32 %v1280_v31, %v534_v27 }
  0xf7   : > { %v643_v35 = vpop.f32.mrf.mxu0  ;;  %v905_v39 = vadd.f32 %v874_v34, %v671_v30  ;;  %v968_v55 = vmul.f32 %v907_v38, %v907_v38 }
  0xf8   : > { %v1290_v36 = vpop.f32.mrf.mxu1  ;;  %v672_v37 = vadd.f32 %v643_v35, %v526_v32 }
  0xf9   : > { %v908_v40 = vadd.f32 %v1290_v36, %v674_v2  ;;  %v1283_v41 = vpop.f32.mrf.mxu0  ;;  %v966_v47 = vmul.f32 %v905_v39, %v905_v39 }
  0xfa   : > { %v877_v42 = vpop.f32.mrf.mxu1  ;;  %v677_v61 = vadd.f32 %v1283_v41, %v547_v52 }
  0xfb   : > { %v1220_v43 = vpack.c.bf16 %v908_v40, %v907_v38  ;;  %v906_v44 = vadd.f32 %v877_v42, %v672_v37  ;;  %v656_v45 = vpop.f32.mrf.mxu0  ;;  %v969_v63 = vmul.f32 %v908_v40, %v908_v40 }
  0xfc   : > { %v675_v54 = vadd.f32 %v656_v45, %v539_v46 }
  0xfd   : > { %1232 = vst [vmem:[%s1512_s4 + $0x8] sm:$0xff] %v1220_v43   ;;  %v1215_v48 = vpack.c.bf16 %v906_v44, %v905_v39  ;;  %v953_v49 = vadd.f32 %v906_v44, %v905_v39  ;;  %v967_v50 = vmul.f32 %v906_v44, %v906_v44  ;;  %v1284_v51 = vpop.f32.mrf.mxu0 }
  0xfe   : > { %v1293_v56 = vpop.f32.mrf.mxu1  ;;  %v678_v62 = vadd.f32 %v1284_v51, %v550_v53 }
  0xff   : > { %1216 = vst [vmem:[%s1512_s4] sm:$0xff] %v1215_v48   ;;  %v954_v57 = vadd.f32 %v953_v49, %v907_v38  ;;  %v974_v58 = vadd.f32 %v967_v50, %v966_v47  ;;  %v659_v59 = vpop.f32.mrf.mxu0  ;;  %v911_v8 = vadd.f32 %v1293_v56, %v677_v61 }
 0x100   : > { %v890_v1 = vpop.f32.mrf.mxu1  ;;  %v676_v5 = vadd.f32 %v659_v59, %v542_v60 }
 0x101   : > { %v975_v0 = vadd.f32 %v974_v58, %v968_v55  ;;  %v955_v3 = vadd.f32 %v954_v57, %v908_v40  ;;  %v909_v4 = vadd.f32 %v890_v1, %v675_v54  ;;  %v972_v19 = vmul.f32 %v911_v8, %v911_v8 }
 0x102   : > { %v1294_v6 = vpop.f32.mrf.mxu1 }
 0x103   : > { %v976_v7 = vadd.f32 %v975_v0, %v969_v63  ;;  %v956_v9 = vadd.f32 %v955_v3, %v909_v4  ;;  %v970_v10 = vmul.f32 %v909_v4, %v909_v4  ;;  %v912_v11 = vadd.f32 %v1294_v6, %v678_v62 }
 0x104   : > { %v893_v12 = vpop.f32.mrf.mxu1 }
 0x105   : > { %v977_v13 = vadd.f32 %v976_v7, %v970_v10  ;;  %v1230_v14 = vpack.c.bf16 %v912_v11, %v911_v8  ;;  %v910_v15 = vadd.f32 %v893_v12, %v676_v5  ;;  %v973_v33 = vmul.f32 %v912_v11, %v912_v11 }
 0x107   : > { %1234 = vst [vmem:[%s1512_s4 + $0x18] sm:$0xff] %v1230_v14   ;;  %v1225_v16 = vpack.c.bf16 %v910_v15, %v909_v4  ;;  %v957_v17 = vadd.f32 %v956_v9, %v910_v15  ;;  %v971_v18 = vmul.f32 %v910_v15, %v910_v15 }
 0x109   : > { %1233 = vst [vmem:[%s1512_s4 + $0x10] sm:$0xff] %v1225_v16   ;;  %v958_v20 = vadd.f32 %v957_v17, %v911_v8  ;;  %v978_v21 = vadd.f32 %v977_v13, %v971_v18 }
 0x10b   : > { %v959_v22 = vadd.f32 %v958_v20, %v912_v11  ;;  %v979_v23 = vadd.f32 %v978_v21, %v972_v19 }
 0x10d   : > { %v960_v24 = vrot.slane %v959_v22, 4  ;;  %v980_v25 = vadd.f32 %v979_v23, %v973_v33 }
 0x10f   : > { %v961_v26 = vadd.f32 %v960_v24, %v959_v22  ;;  %v981_v27 = vrot.slane %v980_v25, 4 }
 0x111   : > { %v962_v28 = vrot.slane %v961_v26, 2  ;;  %v982_v29 = vadd.f32 %v981_v27, %v980_v25 }
 0x113   : > { %v963_v30 = vadd.f32 %v962_v28, %v961_v26  ;;  %v983_v31 = vrot.slane %v982_v29, 2 }
 0x115   : > { %v964_v32 = vrot.slane %v963_v30, 1  ;;  %v984_v34 = vadd.f32 %v983_v31, %v982_v29 }
 0x117   : > { %v985_v2 = vrot.slane %v984_v34, 1  ;;  %v965_v35 = vadd.f32 %v964_v32, %v963_v30 }
 0x119   : > { %v986_v36 = vadd.f32 %v985_v2, %v984_v34 }
 0x11b   : > { %v988_v37 = vsel %vm987_vm4, %v965_v35, %v986_v36 }
 0x11c   : > { %989 = vst [vmem:[%s212_s8] sm:$0xff] %v988_v37 }
 0x11d PF: > { %s14_s14 = sadd.s32 1, %s1354_s14   ;;  %s1537_s12 = smov %s1350_s13 }
 0x11e   : > { %p11_p5 = scmp.ge.s32.totalorder %s14_s14, 4   ;;  %s1538_s13 = smov %s1540_s15 }
 0x120   :  { %13 = sbr.rel (!%p11_p5) target bundleno = 2 (0x2), region = 75 }

// kernel: forward.3
= control target key start
LH: loop header
LB: loop body
LE: loop exit
PB: predicated region body
PF: predicated region fallthrough
CT: control target
= control target key end

     0   :  { %s6480_s12 = smov 0   ;;  %s6482_s13 = smov 0   ;;  %s9075_s0 = inlined_call_operand.vmem [shape: bf16[2,18,18,8], index: 0, kind: input, shape index: {}]   ;;  %s9076_s1 = inlined_call_operand.vmem [shape: bf16[9,8,128], index: 1, kind: input, shape index: {}]   ;;  %s9077_s2 = inlined_call_operand.vmem [shape: bf16[2,256,128], index: 2, kind: output, shape index: {0}]   ;;  %s9078_s3 = inlined_call_operand.vmem [shape: f32[2,1,8,128], index: 3, kind: output, shape index: {1}]  }
   0x1   :  { %s6484_s14 = smov 0  }
   0x2 LB: > { %s26_s15 = sadd.s32 1, %s6454_s13  ;;  %p5187_p0 = scmp.ge.s32.totalorder %s6458_s14, 1  ;;  %s6458_s14 = sphi %s6484_s14, %s14_s14   ;;  %s6454_s13 = sphi %s6482_s13, %s9328_s13   ;;  %s6450_s12 = sphi %s6480_s12, %s9327_s12  }
   0x3   : > { %p28_p1 = scmp.ge.s32.totalorder %s26_s15, 2  ;;  %p156_p2 = scmp.lt.s32.totalorder %s6458_s14, 3 }
   0x5   : > { %s9330_s15 = smov (%p28_p1, %s26_s15), 0  ;;  %p157_p3 = pnand %p5187_p0, %p156_p2 }
   0x7   : > { %160 = sbr.rel (%p157_p3) target bundleno = 575 (0x23f), region = 28 }
   0xc   : > { %v5192_v0 = vld [vmem:[%s9076_s1 + $0x4] sm:$0xf]  ;;  %vm753_vm0 = vcmask 1043456   ;;  %p191_p4 = scmp.lt.s32.totalorder %s6450_s12, 1  ;;  %v250_v2 = vld [vmem:[%s9076_s1] sm:$0xf] }
   0xd   : > { %6352 = vmatprep.subr.msk.bf16.mxu1 %vm753_vm0, %v5192_v0  ;;  %6351 = vmatprep.subr.msk.bf16.mxu0 %vm753_vm0, %v5192_v0  ;;  %v755_v1 = vsel %vm753_vm0, %v5192_v0, 0  ;;  %v5273_v3 = vld [vmem:[%s9076_s1 + $0x8] sm:$0xf]  ;;  %vm267_vm1 = vsmask.f32 3328  ;;  %v6521_v4 = vsel %vm753_vm0, %v250_v2, 0 }
   0xe   : > { %6350 = vmatpush3.bf16.msra.mxu1 %v755_v1  ;;  %6044 = vmatpush3.bf16.msra.mxu0 %v755_v1  ;;  %s9332_s12 = smov (!%p191_p4, %s6450_s12), 1  ;;  %vm268_vm2 = vsmask.f32 7440  ;;  %vm704_vm3 = vcmask 64512   ;;  %v6547_v16 = vsel %vm753_vm0, %v5273_v3, 0  ;;  %vm1258_vm5 = vcmask 1042432  }
   0xf   : > { %6353 = vmatprep.subr.msk.bf16.mxu1 %vm753_vm0, %v250_v2  ;;  %6354 = vmatprep.subr.msk.bf16.mxu0 %vm753_vm0, %v5273_v3  ;;  %s6361_s22 = smul.u32 216, %s9332_s12  ;;  %vm6562_vm4 = vmor %vm267_vm1, %vm268_vm2  ;;  %vm1259_vm6 = vcmask 1046532   ;;  %s5762_s11 = sshll.u32 %s9332_s12, 7 }
  0x10   : > { %vm6848_vm7 = vmor %vm1258_vm5, %vm1259_vm6  ;;  %s8979_s18 = scalar_lea.vmem %s9077_s2, %s5762_s11  ;;  %s5191_s19 = sshll.u32 %s9332_s12, 3 }
  0x11   : > { %s6518_s25 = scalar_lea.vmem %s9075_s0, %s6361_s22  ;;  %s212_s22 = scalar_lea.vmem %s9078_s3, %s5191_s19 }
  0x12   : > { %v6524_v5 = vld [vmem:[%s6518_s25] sm:$0xf]  ;;  %v6527_v6 = vld [vmem:[%s6518_s25 + $0x4] sm:$0xf]  ;;  %v6530_v7 = vld [vmem:[%s6518_s25 + $0x8] sm:$0x1] }
  0x13   : > { %v271_v8 = vshrl.u32 %v6524_v5, 16  ;;  %v274_v9 = vshll.u32 %v6524_v5, 16  ;;  %v280_v10 = vshll.u32 %v6527_v6, 16  ;;  %v284_v11 = vshrl.u32 %v6527_v6, 16  ;;  %v6537_v12 = vld [vmem:[%s6518_s25 + $0x60] sm:$0xf] }
  0x14   : > { %v290_v13 = vshll.u32 %v6530_v7, 16  ;;  %v6541_v14 = vld [vmem:[%s6518_s25 + $0x64] sm:$0xf]  ;;  %v6544_v15 = vld [vmem:[%s6518_s25 + $0x68] sm:$0x1]  ;;  %v463_v22 = vshrl.u32 %v6537_v12, 16 }
  0x15   : > { %v273_v17 = vrot.slane %v271_v8, 4  ;;  %v276_v18 = vrot.slane %v274_v9, 5  ;;  %v282_v19 = vrot.slane %v280_v10, 5  ;;  %v286_v20 = vrot.slane %v284_v11, 4  ;;  %v6555_v29 = vld [vmem:[%s6518_s25 + $0xc] sm:$0xf] }
  0x16   : > { %v292_v21 = vrot.slane %v290_v13, 5  ;;  %v466_v23 = vshll.u32 %v6537_v12, 16  ;;  %v472_v24 = vshll.u32 %v6541_v14, 16  ;;  %v476_v27 = vshrl.u32 %v6541_v14, 16  ;;  %v6558_v30 = vld [vmem:[%s6518_s25 + $0x10] sm:$0xf] }
  0x17   : > { %v277_v25 = vor.u32 %v276_v18, %v273_v17  ;;  %v287_v26 = vor.u32 %v286_v20, %v282_v19  ;;  %v482_v28 = vshll.u32 %v6544_v15, 16  ;;  %v465_v33 = vrot.slane %v463_v22, 4  ;;  %v6568_v41 = vld [vmem:[%s6518_s25 + $0x14] sm:$0x1]  ;;  %v6579_v53 = vld [vmem:[%s6518_s25 + $0x6c] sm:$0xf] }
  0x18   : > { %v468_v34 = vrot.slane %v466_v23, 5  ;;  %v474_v35 = vrot.slane %v472_v24, 5  ;;  %v478_v38 = vrot.slane %v476_v27, 4  ;;  %v295_v42 = vshrl.u32 %v6555_v29, 16  ;;  %v6583_v58 = vld [vmem:[%s6518_s25 + $0x70] sm:$0xf] }
  0x19   : > { %v278_v36 = vrot.slane %v277_v25, 4  ;;  %v288_v37 = vrot.slane %v287_v26, 4  ;;  %v484_v39 = vrot.slane %v482_v28, 5  ;;  %v298_v43 = vshll.u32 %v6555_v29, 16  ;;  %v6591_v63 = vld [vmem:[%s6518_s25 + $0x74] sm:$0x1] }
  0x1a   : > { %v469_v40 = vor.u32 %v468_v34, %v465_v33  ;;  %v304_v44 = vshll.u32 %v6558_v30, 16  ;;  %v479_v47 = vor.u32 %v478_v38, %v474_v35  ;;  %v308_v48 = vshrl.u32 %v6558_v30, 16  ;;  %v6597_v8 = vld [vmem:[%s6518_s25 + $0x18] sm:$0xf]  ;;  %v6610_v25 = vld [vmem:[%s6518_s25 + $0x20] sm:$0x1] }
  0x1b   : > { %v283_v45 = vsel %vm6562_vm4, %v278_v36, %v282_v19  ;;  %v293_v46 = vsel %vm6562_vm4, %v288_v37, %v292_v21  ;;  %v297_v51 = vrot.slane %v295_v42, 4  ;;  %v300_v52 = vrot.slane %v298_v43, 5  ;;  %v6604_v21 = vld [vmem:[%s6518_s25 + $0x1c] sm:$0xf] }
  0x1c   : > { %v5193_v49 = vcombine.low %v283_v45, %v293_v46  ;;  %v470_v50 = vrot.slane %v469_v40, 4  ;;  %v480_v54 = vrot.slane %v479_v47, 4  ;;  %v306_v55 = vrot.slane %v304_v44, 5  ;;  %v6623_v40 = vld [vmem:[%s9076_s1 + $0x10] sm:$0xf] }
  0x1d   : > { %v310_v56 = vrot.slane %v308_v48, 4  ;;  %v314_v57 = vshll.u32 %v6568_v41, 16  ;;  %v301_v60 = vor.u32 %v300_v52, %v297_v51  ;;  %v487_v3 = vshrl.u32 %v6579_v53, 16  ;;  %v6628_v46 = vld [vmem:[%s6518_s25 + $0x7c] sm:$0xf] }
  0x1e   : > { %6045 = vmatprep.mubr.msk.bf16.mxu0 %vm704_vm3, %v5193_v49  ;;  %v475_v59 = vsel %vm6562_vm4, %v470_v50, %v474_v35  ;;  %v485_v0 = vsel %vm6562_vm4, %v480_v54, %v484_v39  ;;  %v490_v11 = vshll.u32 %v6579_v53, 16  ;;  %v496_v13 = vshll.u32 %v6583_v58, 16  ;;  %v6617_v35 = vld [vmem:[%s6518_s25 + $0x78] sm:$0xf] }
  0x1f   : > { %v311_v1 = vor.u32 %v310_v56, %v306_v55  ;;  %v316_v2 = vrot.slane %v314_v57, 5  ;;  %v5201_v9 = vcombine.low %v475_v59, %v485_v0  ;;  %v302_v10 = vrot.slane %v301_v60, 4  ;;  %v6635_v56 = vld [vmem:[%s6518_s25 + $0x80] sm:$0x1] }
  0x20   : > { %v489_v18 = vrot.slane %v487_v3, 4  ;;  %v500_v19 = vshrl.u32 %v6583_v58, 16  ;;  %v506_v20 = vshll.u32 %v6591_v63, 16  ;;  %v492_v23 = vrot.slane %v490_v11, 5  ;;  %9114 = vst [vmem:[#allocation2_spill] sm:$0xff] %v6635_v56 }
  0x21   : > { %v312_v17 = vrot.slane %v311_v1, 4  ;;  %6061 = vmatprep.mubr.msk.bf16.mxu1 %vm704_vm3, %v5201_v9  ;;  %v307_v22 = vsel %vm6562_vm4, %v302_v10, %v306_v55  ;;  %v498_v24 = vrot.slane %v496_v13, 5  ;;  %v319_v26 = vshrl.u32 %v6597_v8, 16  ;;  %v6641_v1 = vld [vmem:[%s6518_s25 + $0x24] sm:$0xf] }
  0x22   : > { %v502_v28 = vrot.slane %v500_v19, 4  ;;  %v508_v33 = vrot.slane %v506_v20, 5  ;;  %v322_v34 = vshll.u32 %v6597_v8, 16  ;;  %v493_v37 = vor.u32 %v492_v23, %v489_v18  ;;  %v6649_v10 = vld [vmem:[%s6518_s25 + $0x28] sm:$0xf] }
  0x23   : > { %v317_v27 = vsel %vm6562_vm4, %v312_v17, %v316_v2  ;;  %v321_v38 = vrot.slane %v319_v26, 4  ;;  %v328_v39 = vshll.u32 %v6604_v21, 16  ;;  %v332_v44 = vshrl.u32 %v6604_v21, 16  ;;  %v6655_v19 = vld [vmem:[%s9076_s1 + $0xc] sm:$0xf] }
  0x24   : > { %v5194_v36 = vcombine.low %v307_v22, %v317_v27  ;;  %v503_v42 = vor.u32 %v502_v28, %v498_v24  ;;  %v324_v43 = vrot.slane %v322_v34, 5  ;;  %v338_v45 = vshll.u32 %v6610_v25, 16 }
  0x25   : > { %v494_v47 = vrot.slane %v493_v37, 4  ;;  %v330_v48 = vrot.slane %v328_v39, 5  ;;  %v511_v49 = vshrl.u32 %v6617_v35, 16  ;;  %v514_v50 = vshll.u32 %v6617_v35, 16 }
  0x26   : > { %6046 = vmatmul.mubr.msk.bf16.vlgmr.msra.gmra.mxu0 %vm704_vm3, %v5194_v36  ;;  %v504_v51 = vrot.slane %v503_v42, 4  ;;  %v325_v52 = vor.u32 %v324_v43, %v321_v38  ;;  %v334_v54 = vrot.slane %v332_v44, 4  ;;  %v340_v55 = vrot.slane %v338_v45, 5  ;;  %v6667_v36 = vld [vmem:[%s6518_s25 + $0x84] sm:$0xf] }
  0x27   : > { %6112 = vmatpush3.bf16.msra.mxu0 %v6547_v16  ;;  %v499_v57 = vsel %vm6562_vm4, %v494_v47, %v498_v24  ;;  %v513_v59 = vrot.slane %v511_v49, 4  ;;  %v516_v60 = vrot.slane %v514_v50, 5  ;;  %v520_v0 = vshll.u32 %v6628_v46, 16  ;;  %v6660_v24 = vld [vmem:[%s6518_s25 + $0x2c] sm:$0x1] }
  0x28   : > { %6356 = vmatprep.subr.msk.bf16.mxu0 %vm753_vm0, %v6623_v40  ;;  %v509_v16 = vsel %vm6562_vm4, %v504_v51, %v508_v33  ;;  %v326_v2 = vrot.slane %v325_v52, 4  ;;  %v335_v3 = vor.u32 %v334_v54, %v330_v48  ;;  %v524_v9 = vshrl.u32 %v6628_v46, 16  ;;  %v6674_v43 = vld [vmem:[%s6518_s25 + $0x88] sm:$0xf]  ;;  %v6682_v51 = vld [vmem:[%s6518_s25 + $0x8c] sm:$0x1] }
  0x29   : > { %v5202_v11 = vcombine.low %v499_v57, %v509_v16  ;;  %v517_v13 = vor.u32 %v516_v60, %v513_v59  ;;  %v522_v17 = vrot.slane %v520_v0, 5  ;;  %v530_v18 = vshll.u32 %v6635_v56, 16  ;;  %9115 = vst [vmem:[#allocation3_spill] sm:$0xff] %v6682_v51  ;;  %v6690_v60 = vld [vmem:[%s6518_s25 + $0x30] sm:$0xf] }
  0x2a   : > { %v331_v20 = vsel %vm6562_vm4, %v326_v2, %v330_v48  ;;  %v336_v22 = vrot.slane %v335_v3, 4  ;;  %v526_v23 = vrot.slane %v524_v9, 4  ;;  %v343_v26 = vshrl.u32 %v6641_v1, 16  ;;  %v6695_v9 = vld [vmem:[%s6518_s25 + $0x34] sm:$0xf] }
  0x2b   : > { %6062 = vmatmul.mubr.msk.bf16.vlgmr.msra.gmra.mxu1 %vm704_vm3, %v5202_v11  ;;  %v518_v27 = vrot.slane %v517_v13, 4  ;;  %v532_v28 = vrot.slane %v530_v18, 5  ;;  %v346_v33 = vshll.u32 %v6641_v1, 16  ;;  %v352_v34 = vshll.u32 %v6649_v10, 16 }
  0x2c   : > { %6078 = vmatpush3.bf16.msra.mxu1 %v6521_v4  ;;  %v341_v37 = vsel %vm6562_vm4, %v336_v22, %v340_v55  ;;  %v527_v38 = vor.u32 %v526_v23, %v522_v17  ;;  %v345_v39 = vrot.slane %v343_v26, 4  ;;  %v356_v42 = vshrl.u32 %v6649_v10, 16 }
  0x2d   : > { %v5195_v44 = vcombine.low %v331_v20, %v341_v37  ;;  %v523_v45 = vsel %vm6562_vm4, %v518_v27, %v522_v17  ;;  %v348_v47 = vrot.slane %v346_v33, 5  ;;  %v354_v48 = vrot.slane %v352_v34, 5  ;;  %6355 = vmatprep.subr.msk.bf16.mxu1 %vm753_vm0, %v6655_v19  ;;  %v6703_v33 = vld [vmem:[%s6518_s25 + $0x38] sm:$0x1] }
  0x2e   : > { %v528_v4 = vrot.slane %v527_v38, 4  ;;  %v358_v49 = vrot.slane %v356_v42, 4  ;;  %v362_v50 = vshll.u32 %v6660_v24, 16  ;;  %v535_v52 = vshrl.u32 %v6667_v36, 16  ;;  %v6708_v38 = vld [vmem:[%s6518_s25 + $0x90] sm:$0xf] }
  0x2f   : > { %6049 = vmatprep.mubr.msk.bf16.mxu0 %vm704_vm3, %v5195_v44  ;;  %v349_v54 = vor.u32 %v348_v47, %v345_v39  ;;  %v538_v55 = vshll.u32 %v6667_v36, 16  ;;  %v544_v57 = vshll.u32 %v6674_v43, 16  ;;  %v548_v59 = vshrl.u32 %v6674_v43, 16  ;;  %9116 = vst [vmem:[#allocation4_spill] sm:$0xff] %v6708_v38  ;;  %v6713_v47 = vld [vmem:[%s6518_s25 + $0x94] sm:$0xf] }
  0x30   : > { %v533_v0 = vsel %vm6562_vm4, %v528_v4, %v532_v28  ;;  %v359_v16 = vor.u32 %v358_v49, %v354_v48  ;;  %v364_v2 = vrot.slane %v362_v50, 5  ;;  %v537_v3 = vrot.slane %v535_v52, 4  ;;  %9117 = vst [vmem:[#allocation5_spill] sm:$0xff] %v6713_v47 }
  0x31   : > { %v5203_v11 = vcombine.low %v523_v45, %v533_v0  ;;  %v350_v13 = vrot.slane %v349_v54, 4  ;;  %v540_v17 = vrot.slane %v538_v55, 5  ;;  %v546_v18 = vrot.slane %v544_v57, 5 }
  0x32   : > { %v360_v20 = vrot.slane %v359_v16, 4  ;;  %v550_v22 = vrot.slane %v548_v59, 4  ;;  %v554_v23 = vshll.u32 %v6682_v51, 16  ;;  %v367_v26 = vshrl.u32 %v6690_v60, 16  ;;  %v6722_v16 = vld [vmem:[%s6518_s25 + $0x98] sm:$0x1] }
  0x33   : > { %6065 = vmatprep.mubr.msk.bf16.mxu1 %vm704_vm3, %v5203_v11  ;;  %v355_v27 = vsel %vm6562_vm4, %v350_v13, %v354_v48  ;;  %v541_v28 = vor.u32 %v540_v17, %v537_v3  ;;  %v370_v34 = vshll.u32 %v6690_v60, 16  ;;  %v376_v37 = vshll.u32 %v6695_v9, 16  ;;  %9118 = vst [vmem:[#allocation6_spill] sm:$0xff] %v6722_v16  ;;  %v6727_v11 = vld [vmem:[%s6518_s25 + $0x3c] sm:$0xf] }
  0x34   : > { %v365_v39 = vsel %vm6562_vm4, %v360_v20, %v364_v2  ;;  %v551_v42 = vor.u32 %v550_v22, %v546_v18  ;;  %v556_v44 = vrot.slane %v554_v23, 5  ;;  %v369_v45 = vrot.slane %v367_v26, 4  ;;  %v6732_v23 = vld [vmem:[%s6518_s25 + $0x40] sm:$0xf]  ;;  %v1211_v51 = vld [vmem:[%s6518_s25 + $0xc] sm:$0xe] }
  0x35   : > { %v5196_v48 = vcombine.low %v355_v27, %v365_v39  ;;  %v542_v4 = vrot.slane %v541_v28, 4  ;;  %v372_v49 = vrot.slane %v370_v34, 5  ;;  %v378_v50 = vrot.slane %v376_v37, 5 }
  0x36   : > { %v552_v52 = vrot.slane %v551_v42, 4  ;;  %v380_v54 = vshrl.u32 %v6695_v9, 16  ;;  %v386_v55 = vshll.u32 %v6703_v33, 16  ;;  %v559_v57 = vshrl.u32 %v6708_v38, 16 }
  0x37   : > { %6050 = vmatmul.mubr.msk.bf16.gmra.mxu0 %vm704_vm3, %v5196_v48  ;;  %v547_v59 = vsel %vm6562_vm4, %v542_v4, %v546_v18  ;;  %v373_v0 = vor.u32 %v372_v49, %v369_v45  ;;  %v562_v2 = vshll.u32 %v6708_v38, 16  ;;  %v568_v3 = vshll.u32 %v6713_v47, 16  ;;  %v6741_v48 = vld [vmem:[%s6518_s25 + $0x44] sm:$0x1] }
  0x38   : > { %v557_v13 = vsel %vm6562_vm4, %v552_v52, %v556_v44  ;;  %v382_v17 = vrot.slane %v380_v54, 4  ;;  %v388_v20 = vrot.slane %v386_v55, 5  ;;  %v561_v22 = vrot.slane %v559_v57, 4  ;;  %v6746_v52 = vld [vmem:[%s6518_s25 + $0x9c] sm:$0xf] }
  0x39   : > { %v5204_v18 = vcombine.low %v547_v59, %v557_v13  ;;  %v374_v26 = vrot.slane %v373_v0, 4  ;;  %v564_v27 = vrot.slane %v562_v2, 5  ;;  %v570_v28 = vrot.slane %v568_v3, 5  ;;  %9119 = vst [vmem:[#allocation7_spill] sm:$0xff] %v6746_v52  ;;  %v6750_v13 = vld [vmem:[%s6518_s25 + $0xa0] sm:$0xf] }
  0x3a   : > { %v383_v34 = vor.u32 %v382_v17, %v378_v50  ;;  %v572_v37 = vshrl.u32 %v6713_v47, 16  ;;  %v578_v39 = vshll.u32 %v6722_v16, 16  ;;  %v391_v42 = vshrl.u32 %v6727_v11, 16  ;;  %9120 = vst [vmem:[#allocation8_spill] sm:$0xff] %v6750_v13 }
  0x3b   : > { %6066 = vmatmul.mubr.msk.bf16.gmra.mxu1 %vm704_vm3, %v5204_v18  ;;  %v379_v44 = vsel %vm6562_vm4, %v374_v26, %v378_v50  ;;  %v565_v45 = vor.u32 %v564_v27, %v561_v22  ;;  %v394_v4 = vshll.u32 %v6727_v11, 16  ;;  %v400_v49 = vshll.u32 %v6732_v23, 16  ;;  %v6756_v26 = vld [vmem:[%s6518_s25 + $0xa4] sm:$0x1] }
  0x3c   : > { %v384_v54 = vrot.slane %v383_v34, 4  ;;  %v574_v55 = vrot.slane %v572_v37, 4  ;;  %v580_v57 = vrot.slane %v578_v39, 5  ;;  %v393_v59 = vrot.slane %v391_v42, 4  ;;  %9121 = vst [vmem:[#allocation9_spill] sm:$0xff] %v6756_v26 }
  0x3d   : > { %v566_v0 = vrot.slane %v565_v45, 4  ;;  %v396_v2 = vrot.slane %v394_v4, 5  ;;  %v402_v3 = vrot.slane %v400_v49, 5  ;;  %v404_v50 = vshrl.u32 %v6732_v23, 16  ;;  %v6760_v34 = vld [vmem:[%s6518_s25 + $0x48] sm:$0xf] }
  0x3e   : > { %v389_v17 = vsel %vm6562_vm4, %v384_v54, %v388_v20  ;;  %v575_v22 = vor.u32 %v574_v55, %v570_v28  ;;  %v410_v18 = vshll.u32 %v6741_v48, 16  ;;  %v583_v27 = vshrl.u32 %v6746_v52, 16 }
  0x3f   : > { %v5197_v37 = vcombine.low %v379_v44, %v389_v17  ;;  %v571_v39 = vsel %vm6562_vm4, %v566_v0, %v570_v28  ;;  %v397_v42 = vor.u32 %v396_v2, %v393_v59  ;;  %v406_v45 = vrot.slane %v404_v50, 4  ;;  %v6769_v17 = vld [vmem:[%s6518_s25 + $0x4c] sm:$0xf]  ;;  %v6775_v2 = vld [vmem:[%s6518_s25 + $0x50] sm:$0x1] }
  0x40   : > { %v576_v4 = vrot.slane %v575_v22, 4  ;;  %v412_v49 = vrot.slane %v410_v18, 5  ;;  %v585_v20 = vrot.slane %v583_v27, 4  ;;  %v586_v54 = vshll.u32 %v6746_v52, 16 }
  0x41   : > { %6053 = vmatprep.mubr.msk.bf16.mxu0 %vm704_vm3, %v5197_v37  ;;  %v398_v55 = vrot.slane %v397_v42, 4  ;;  %v407_v62 = vor.u32 %v406_v45, %v402_v3  ;;  %v592_v32 = vshll.u32 %v6750_v13, 16  ;;  %v596_v44 = vshrl.u32 %v6750_v13, 16  ;;  %v6781_v42 = vld [vmem:[%s6518_s25 + $0xa8] sm:$0xf] }
  0x42   : > { %v581_v28 = vsel %vm6562_vm4, %v576_v4, %v580_v57  ;;  %v588_v59 = vrot.slane %v586_v54, 5  ;;  %v602_v0 = vshll.u32 %v6756_v26, 16  ;;  %v415_v50 = vshrl.u32 %v6760_v34, 16  ;;  %9122 = vst [vmem:[#allocation10_spill] sm:$0xff] %v6781_v42 }
  0x43   : > { %v5205_v22 = vcombine.low %v571_v39, %v581_v28  ;;  %v403_v18 = vsel %vm6562_vm4, %v398_v55, %v402_v3  ;;  %v408_v27 = vrot.slane %v407_v62, 4  ;;  %v594_v37 = vrot.slane %v592_v32, 5 }
  0x44   : > { %v589_v45 = vor.u32 %v588_v59, %v585_v20  ;;  %v598_v61 = vrot.slane %v596_v44, 4  ;;  %v604_v57 = vrot.slane %v602_v0, 5  ;;  %v417_v4 = vrot.slane %v415_v50, 4  ;;  %v6791_v44 = vld [vmem:[%s6518_s25 + $0xac] sm:$0xf] }
  0x45   : > { %6069 = vmatprep.mubr.msk.bf16.mxu1 %vm704_vm3, %v5205_v22  ;;  %v413_v54 = vsel %vm6562_vm4, %v408_v27, %v412_v49  ;;  %v418_v39 = vshll.u32 %v6760_v34, 16  ;;  %v424_v28 = vshll.u32 %v6769_v17, 16  ;;  %v428_v62 = vshrl.u32 %v6769_v17, 16  ;;  %9123 = vst [vmem:[#allocation11_spill] sm:$0xff] %v6791_v44  ;;  %v6794_v22 = vld [vmem:[%s6518_s25 + $0xb0] sm:$0x1] }
  0x46   : > { %v5198_v3 = vcombine.low %v403_v18, %v413_v54  ;;  %v590_v32 = vrot.slane %v589_v45, 4  ;;  %v599_v55 = vor.u32 %v598_v61, %v594_v37  ;;  %v434_v20 = vshll.u32 %v6775_v2, 16  ;;  %9124 = vst [vmem:[#allocation12_spill] sm:$0xff] %v6794_v22 }
  0x47   : > { %v420_v59 = vrot.slane %v418_v39, 5  ;;  %v426_v0 = vrot.slane %v424_v28, 5  ;;  %v430_v50 = vrot.slane %v428_v62, 4  ;;  %v607_v49 = vshrl.u32 %v6781_v42, 16  ;;  %v6803_v62 = vld [vmem:[%s6518_s25 + $0x54] sm:$0xf] }
  0x48   : > { %6054 = vmatmul.mubr.msk.bf16.gmra.mxu0 %vm704_vm3, %v5198_v3  ;;  %v595_v18 = vsel %vm6562_vm4, %v590_v32, %v594_v37  ;;  %v600_v27 = vrot.slane %v599_v55, 4  ;;  %v436_v61 = vrot.slane %v434_v20, 5  ;;  %v610_v45 = vshll.u32 %v6781_v42, 16  ;;  %v6810_v55 = vld [vmem:[%s6518_s25 + $0x58] sm:$0xf] }
  0x49   : > { %v421_v54 = vor.u32 %v420_v59, %v417_v4  ;;  %v431_v56 = vor.u32 %v430_v50, %v426_v0  ;;  %v609_v39 = vrot.slane %v607_v49, 4  ;;  %v616_v28 = vshll.u32 %v6791_v44, 16  ;;  %v6813_v49 = vld [vmem:[%s6518_s25 + $0x5c] sm:$0x1] }
  0x4a   : > { %v605_v3 = vsel %vm6562_vm4, %v600_v27, %v604_v57  ;;  %v612_v26 = vrot.slane %v610_v45, 5  ;;  %v620_v37 = vshrl.u32 %v6791_v44, 16  ;;  %v626_v32 = vshll.u32 %v6794_v22, 16  ;;  %v1210_v22 = vld [vmem:[%s6518_s25] sm:$0xe] }
  0x4b   : > { %v5206_v4 = vcombine.low %v595_v18, %v605_v3  ;;  %v422_v20 = vrot.slane %v421_v54, 4  ;;  %v432_v59 = vrot.slane %v431_v56, 4  ;;  %v618_v50 = vrot.slane %v616_v28, 5  ;;  %v6824_v54 = vld [vmem:[%s6518_s25 + $0xb4] sm:$0xf] }
  0x4c   : > { %v613_v42 = vor.u32 %v612_v26, %v609_v39  ;;  %v622_v52 = vrot.slane %v620_v37, 4  ;;  %v628_v13 = vrot.slane %v626_v32, 5  ;;  %v439_v57 = vshrl.u32 %v6803_v62, 16  ;;  %9125 = vst [vmem:[#allocation13_spill] sm:$0xff] %v6824_v54  ;;  %v6827_v37 = vld [vmem:[%s6518_s25 + $0xb8] sm:$0xf] }
  0x4d   : > { %6070 = vmatmul.mubr.msk.bf16.gmra.mxu1 %vm704_vm3, %v5206_v4  ;;  %v427_v27 = vsel %vm6562_vm4, %v422_v20, %v426_v0  ;;  %v437_v18 = vsel %vm6562_vm4, %v432_v59, %v436_v61  ;;  %v442_v56 = vshll.u32 %v6803_v62, 16  ;;  %v448_v45 = vshll.u32 %v6810_v55, 16  ;;  %v6832_v61 = vld [vmem:[%s6518_s25 + $0xbc] sm:$0x1] }
  0x4e   : > { %v5199_v26 = vcombine.low %v427_v27, %v437_v18  ;;  %v614_v39 = vrot.slane %v613_v42, 4  ;;  %v623_v28 = vor.u32 %v622_v52, %v618_v50  ;;  %v441_v3 = vrot.slane %v439_v57, 4 }
  0x4f   : > { %v444_v32 = vrot.slane %v442_v56, 5  ;;  %v450_v4 = vrot.slane %v448_v45, 5  ;;  %v452_v0 = vshrl.u32 %v6810_v55, 16  ;;  %v458_v20 = vshll.u32 %v6813_v49, 16 }
  0x50   : > { %6057 = vmatprep.mubr.msk.bf16.mxu0 %vm704_vm3, %v5199_v26  ;;  %v619_v59 = vsel %vm6562_vm4, %v614_v39, %v618_v50  ;;  %v624_v27 = vrot.slane %v623_v28, 4  ;;  %v631_v52 = vshrl.u32 %v6824_v54, 16  ;;  %v634_v42 = vshll.u32 %v6824_v54, 16 }
  0x51   : > { %v445_v57 = vor.u32 %v444_v32, %v441_v3  ;;  %v454_v18 = vrot.slane %v452_v0, 4  ;;  %v460_v56 = vrot.slane %v458_v20, 5  ;;  %v640_v45 = vshll.u32 %v6827_v37, 16 }
  0x52   : > { %v629_v44 = vsel %vm6562_vm4, %v624_v27, %v628_v13  ;;  %v633_v16 = vrot.slane %v631_v52, 4  ;;  %v636_v26 = vrot.slane %v634_v42, 5  ;;  %v644_v38 = vshrl.u32 %v6827_v37, 16 }
  0x53   : > { %v5207_v50 = vcombine.low %v619_v59, %v629_v44  ;;  %v446_v39 = vrot.slane %v445_v57, 4  ;;  %v455_v28 = vor.u32 %v454_v18, %v450_v4  ;;  %v642_v47 = vrot.slane %v640_v45, 5  ;;  %v1212_v57 = vld [vmem:[%s6518_s25 + $0x18] sm:$0xe] }
  0x54   : > { %v637_v54 = vor.u32 %v636_v26, %v633_v16  ;;  %v646_v3 = vrot.slane %v644_v38, 4  ;;  %v650_v32 = vshll.u32 %v6832_v61, 16  ;;  %v5257_v13 = vrot.slane %v1210_v22, 9 }
  0x55   : > { %6073 = vmatprep.mubr.msk.bf16.mxu1 %vm704_vm3, %v5207_v50  ;;  %v451_v44 = vsel %vm6562_vm4, %v446_v39, %v450_v4  ;;  %v456_v20 = vrot.slane %v455_v28, 4  ;;  %v1263_v59 = vrot.slane %v6527_v6, 5  ;;  %v5226_v38 = vcombine.low %v6555_v29, %v6558_v30 }
  0x56   : > { %v638_v16 = vrot.slane %v637_v54, 4  ;;  %v647_v27 = vor.u32 %v646_v3, %v642_v47  ;;  %v652_v52 = vrot.slane %v650_v32, 5  ;;  %v5258_v42 = vrot.slane %v1211_v51, 9 }
  0x57   : > { %v461_v18 = vsel %vm6562_vm4, %v456_v20, %v460_v56  ;;  %v1264_v22 = vsel %vm6848_vm7, %v5257_v13, %v1263_v59  ;;  %v1265_v45 = vrot.slane %v1263_v59, 4  ;;  %v9128_v4 = vrot.slane %v6558_v30, 5 }
  0x58   : > { %v5200_v50 = vcombine.low %v451_v44, %v461_v18  ;;  %v643_v54 = vsel %vm6562_vm4, %v638_v16, %v642_v47  ;;  %v648_v39 = vrot.slane %v647_v27, 4  ;;  %v5225_v51 = vcombine.low %v6524_v5, %v6527_v6  ;;  %v1213_v27 = vld [vmem:[%s6518_s25 + $0x24] sm:$0xe] }
  0x59   : > { %v1272_v26 = vrot.slane %v9128_v4, 4  ;;  %v9129_v28 = vrot.slane %v6530_v7, 5  ;;  %v9130_v3 = vmov %v9128_v4  ;;  %v5227_v13 = vcombine.low %v6597_v8, %v6604_v21  ;;  %v1215_v4 = vld [vmem:[%s6518_s25 + $0x3c] sm:$0xe] }
  0x5a   : > { %v1271_v32 = vsel %vm6848_vm7, %v5258_v42, %v9130_v3  ;;  %v5259_v44 = vrot.slane %v1212_v57, 9  ;;  %6058 = vmatmul.mubr.msk.bf16.gmra.mxu0 %vm704_vm3, %v5200_v50  ;;  %v653_v47 = vsel %vm6562_vm4, %v648_v39, %v652_v52  ;;  %v9131_v6 = vrot.slane %v6568_v41, 5  ;;  %v1214_v42 = vld [vmem:[%s6518_s25 + $0x30] sm:$0xe]  ;;  %v1216_v39 = vld [vmem:[%s6518_s25 + $0x48] sm:$0xe] }
  0x5b   : > { %v1267_v56 = vsel %vm6848_vm7, %v1265_v45, %v9129_v28  ;;  %v1277_v20 = vrot.slane %v6604_v21, 5  ;;  %v5208_v59 = vcombine.low %v643_v54, %v653_v47  ;;  %v1280_v16 = vrot.slane %v6610_v25, 5  ;;  %v1217_v47 = vld [vmem:[%s6518_s25 + $0x54] sm:$0xe]  ;;  %v7143_v21 = vld [vmem:[%s6518_s25 + $0x2c] sm:$0x1] }
  0x5c   : > { %v5274_v5 = vcombine.low %v1264_v22, %v1267_v56  ;;  %v1274_v7 = vsel %vm6848_vm7, %v1272_v26, %v9131_v6  ;;  %v1834_v52 = vsel %vm753_vm0, %v6655_v19, 0  ;;  %v1284_v18 = vrot.slane %v6649_v10, 5 }
  0x5d   : > { %v1278_v41 = vsel %vm6848_vm7, %v5259_v44, %v1277_v20  ;;  %v1279_v57 = vrot.slane %v1277_v20, 4  ;;  %6074 = vmatmul.mubr.msk.bf16.gmra.mxu1 %vm704_vm3, %v5208_v59  ;;  %v5275_v22 = vcombine.low %v1271_v32, %v1274_v7  ;;  %v2560_v25 = vsel %vm753_vm0, %v6623_v40, 0 }
  0x5e   : > { %6113 = vmatprep.mubr.msk.bf16.mxu0 %vm704_vm3, %v5274_v5  ;;  %v1291_v45 = vrot.slane %v6695_v9, 5  ;;  %6079 = vmatprep.mubr.msk.bf16.mxu1 %vm704_vm3, %v5225_v51  ;;  %v5260_v26 = vrot.slane %v1213_v27, 9  ;;  %v1287_v50 = vrot.slane %v6660_v24, 5  ;;  %v5261_v54 = vrot.slane %v1214_v42, 9  ;;  %v6915_v24 = vld [vmem:[%s9076_s1 + $0x18] sm:$0xf] }
  0x5f   : > { %v1281_v19 = vsel %vm6848_vm7, %v1279_v57, %v1280_v16  ;;  %v1286_v56 = vrot.slane %v1284_v18, 4  ;;  %v1294_v32 = vrot.slane %v6703_v33, 5  ;;  %v5262_v44 = vrot.slane %v1215_v4, 9 }
  0x60   : > { %v5276_v28 = vcombine.low %v1278_v41, %v1281_v19  ;;  %v1293_v3 = vrot.slane %v1291_v45, 4  ;;  %v1298_v40 = vrot.slane %v6732_v23, 5  ;;  %v1322_v5 = vrot.slane %v6544_v15, 5 }
  0x61   : > { %v1301_v51 = vrot.slane %v6741_v48, 5  ;;  %v5263_v6 = vrot.slane %v1216_v39, 9  ;;  %v1305_v7 = vrot.slane %v6769_v17, 5  ;;  %v5228_v33 = vcombine.low %v6641_v1, %v6649_v10  ;;  %v1218_v1 = vld [vmem:[%s6518_s25 + $0x60] sm:$0xe] }
  0x62   : > { %6114 = vmatmul.mubr.msk.bf16.vlgmr.msra.gmra.mxu0 %vm704_vm3, %v5275_v22  ;;  %v1285_v20 = vsel %vm6848_vm7, %v5260_v26, %v1284_v18  ;;  %v1300_v59 = vrot.slane %v1298_v40, 4  ;;  %v1308_v16 = vrot.slane %v6775_v2, 5  ;;  %v1288_v48 = vsel %vm6848_vm7, %v1286_v56, %v1287_v50  ;;  %v6943_v22 = vld [vmem:[%s9076_s1 + $0x14] sm:$0xf]  ;;  %v6968_v50 = vld [vmem:[%s6518_s25 + $0x6c] sm:$0xe] }
  0x63   : > { %6180 = vmatpush3.bf16.msra.mxu0 %v2560_v25  ;;  %6117 = vmatprep.mubr.msk.bf16.mxu0 %vm704_vm3, %v5276_v28  ;;  %v1292_v27 = vsel %vm6848_vm7, %v5261_v54, %v1291_v45  ;;  %v1295_v42 = vsel %vm6848_vm7, %v1293_v3, %v1294_v32  ;;  %v1307_v41 = vrot.slane %v1305_v7, 4  ;;  %v6933_v10 = vsel %vm6848_vm7, %v5262_v44, %v1298_v40  ;;  %v1221_v39 = vld [vmem:[%s6518_s25 + $0x84] sm:$0xe]  ;;  %v6997_v44 = vld [vmem:[%s6518_s25 + $0x78] sm:$0xe] }
  0x64   : > { %v6937_v2 = vsel %vm6848_vm7, %v5263_v6, %v1305_v7  ;;  %v5264_v57 = vrot.slane %v1217_v47, 9  ;;  %v1312_v18 = vrot.slane %v6810_v55, 5  ;;  %6358 = vmatprep.subr.msk.bf16.mxu0 %vm753_vm0, %v6915_v24  ;;  %v6953_v25 = vsel %vm6848_vm7, %v1300_v59, %v1301_v51  ;;  %v1222_v40 = vld [vmem:[%s6518_s25 + $0x90] sm:$0xe] }
  0x65   : > { %6080 = vmatmul.mubr.msk.bf16.vlgmr.msra.gmra.mxu1 %vm704_vm3, %v5226_v38  ;;  %v6957_v45 = vsel %vm6848_vm7, %v1307_v41, %v1308_v16  ;;  %v1315_v4 = vrot.slane %v6813_v49, 5  ;;  %v1319_v19 = vrot.slane %v6541_v14, 5  ;;  %v5277_v29 = vcombine.low %v1285_v20, %v1288_v48  ;;  %v9132_v48 = vld [vmem:[#allocation3_spill] sm:$0xff] }
  0x66   : > { %6146 = vmatpush3.bf16.msra.mxu1 %v1834_v52  ;;  %6083 = vmatprep.mubr.msk.bf16.mxu1 %vm704_vm3, %v5227_v13  ;;  %v5229_v30 = vcombine.low %v6690_v60, %v6695_v9  ;;  %v1314_v38 = vrot.slane %v1312_v18, 4  ;;  %v5265_v26 = vrot.slane %v1218_v1, 9  ;;  %v5278_v49 = vcombine.low %v1292_v27, %v1295_v42  ;;  %v1223_v42 = vld [vmem:[%s6518_s25 + $0x9c] sm:$0xe] }
  0x67   : > { %v5230_v52 = vcombine.low %v6727_v11, %v6732_v23  ;;  %v5231_v8 = vcombine.low %v6760_v34, %v6769_v17  ;;  %6357 = vmatprep.subr.msk.bf16.mxu1 %vm753_vm0, %v6943_v22  ;;  %v5279_v60 = vcombine.low %v6933_v10, %v6953_v25  ;;  %v5280_v9 = vcombine.low %v6937_v2, %v6957_v45  ;;  %v9133_v10 = vld [vmem:[#allocation5_spill] sm:$0xff]  ;;  %v9134_v2 = vld [vmem:[#allocation4_spill] sm:$0xff] }
  0x68   : > { %v1321_v54 = vrot.slane %v1319_v19, 4  ;;  %v6987_v28 = vsel %vm6848_vm7, %v5264_v57, %v1312_v18  ;;  %v6991_v56 = vsel %vm6848_vm7, %v1314_v38, %v1315_v4  ;;  %v5266_v32 = vrot.slane %v6968_v50, 9  ;;  %v1224_v18 = vld [vmem:[%s6518_s25 + $0xa8] sm:$0xe]  ;;  %v9136_v38 = vld [vmem:[#allocation8_spill] sm:$0xff] }
  0x69   : > { %v7003_v47 = vsel %vm6848_vm7, %v5265_v26, %v1319_v19  ;;  %v1326_v51 = vrot.slane %v6583_v58, 5  ;;  %v1329_v6 = vrot.slane %v6591_v63, 5  ;;  %v5268_v59 = vrot.slane %v1221_v39, 9  ;;  %v9135_v19 = vld [vmem:[#allocation6_spill] sm:$0xff]  ;;  %v9137_v26 = vld [vmem:[#allocation7_spill] sm:$0xff] }
  0x6a   : > { %6118 = vmatmul.mubr.msk.bf16.gmra.mxu0 %vm704_vm3, %v5277_v29  ;;  %v1340_v16 = vrot.slane %v6674_v43, 5  ;;  %v1343_v27 = vrot.slane %v9132_v48, 5  ;;  %v5281_v41 = vcombine.low %v6987_v28, %v6991_v56  ;;  %v7021_v63 = vsel %vm6848_vm7, %v1321_v54, %v1322_v5  ;;  %v9139_v48 = vld [vmem:[#allocation11_spill] sm:$0xff] }
  0x6b   : > { %6121 = vmatprep.mubr.msk.bf16.mxu0 %vm704_vm3, %v5278_v49  ;;  %v5267_v1 = vrot.slane %v6997_v44, 9  ;;  %v5269_v4 = vrot.slane %v1222_v40, 9  ;;  %v1347_v15 = vrot.slane %v9133_v10, 5  ;;  %v1328_v5 = vrot.slane %v1326_v51, 4  ;;  %v5371_v57 = vld [vmem:[%s6518_s25 + $0xc] sm:$0xf] }
  0x6c   : > { %v7030_v25 = vsel %vm6848_vm7, %v5268_v59, %v1340_v16  ;;  %v1342_v45 = vrot.slane %v1340_v16, 4  ;;  %v1350_v29 = vrot.slane %v9135_v19, 5  ;;  %v5270_v49 = vrot.slane %v1223_v42, 9  ;;  %v9138_v59 = vld [vmem:[#allocation9_spill] sm:$0xff]  ;;  %v9140_v42 = vld [vmem:[#allocation10_spill] sm:$0xff] }
  0x6d   : > { %6084 = vmatmul.mubr.msk.bf16.gmra.mxu1 %vm704_vm3, %v5228_v33  ;;  %v1333_v33 = vrot.slane %v6628_v46, 5  ;;  %v7044_v39 = vsel %vm6848_vm7, %v5269_v4, %v1347_v15  ;;  %v1349_v44 = vrot.slane %v1347_v15, 4  ;;  %v1354_v40 = vrot.slane %v9136_v38, 5  ;;  %v9141_v15 = vld [vmem:[#allocation12_spill] sm:$0xff] }
  0x6e   : > { %6087 = vmatprep.mubr.msk.bf16.mxu1 %vm704_vm3, %v5229_v30  ;;  %v7040_v54 = vsel %vm6848_vm7, %v1342_v45, %v1343_v27  ;;  %v1357_v16 = vrot.slane %v9138_v59, 5  ;;  %v5271_v45 = vrot.slane %v1224_v18, 9  ;;  %v1361_v4 = vrot.slane %v9139_v48, 5 }
  0x6f   : > { %v7054_v27 = vsel %vm6848_vm7, %v1349_v44, %v1350_v29  ;;  %v1364_v50 = vrot.slane %v9141_v15, 5  ;;  %v7064_v19 = vsel %vm6848_vm7, %v5270_v49, %v1354_v40  ;;  %v1356_v7 = vrot.slane %v1354_v40, 4  ;;  %v9142_v29 = vld [vmem:[#allocation13_spill] sm:$0xff]  ;;  %v9143_v15 = vld [vmem:[#allocation2_spill] sm:$0xff]  ;;  %v7079_v49 = vld [vmem:[%s6518_s25 + $0x10] sm:$0xf] }
  0x70   : > { %v7071_v18 = vsel %vm6848_vm7, %v5266_v32, %v1326_v51  ;;  %v7076_v59 = vsel %vm6848_vm7, %v5271_v45, %v1361_v4  ;;  %v1363_v30 = vrot.slane %v1361_v4, 4  ;;  %v5374_v40 = vld [vmem:[%s6518_s25 + $0x18] sm:$0xf]  ;;  %v1335_v20 = vrot.slane %v1333_v33, 4 }
  0x71   : > { %v2078_v44 = vshrl.u32 %v5371_v57, 16  ;;  %v2081_v32 = vshll.u32 %v5371_v57, 16  ;;  %v5282_v51 = vcombine.low %v7003_v47, %v7021_v63  ;;  %v7094_v45 = vsel %vm6848_vm7, %v1328_v5, %v1329_v6  ;;  %v1225_v57 = vld [vmem:[%s6518_s25 + $0xb4] sm:$0xe]  ;;  %v7115_v47 = vld [vmem:[%s6518_s25 + $0x14] sm:$0x1] }
  0x72   : > { %6122 = vmatmul.mubr.msk.bf16.gmra.mxu0 %vm704_vm3, %v5279_v60  ;;  %v1336_v60 = vrot.slane %v9143_v15, 5  ;;  %v7109_v11 = vsel %vm6848_vm7, %v5267_v1, %v1333_v33  ;;  %v2087_v6 = vshll.u32 %v7079_v49, 16  ;;  %v5375_v63 = vld [vmem:[%s6518_s25 + $0x1c] sm:$0xf]  ;;  %v2091_v17 = vshrl.u32 %v7079_v49, 16 }
  0x73   : > { %6125 = vmatprep.mubr.msk.bf16.mxu0 %vm704_vm3, %v5280_v9  ;;  %v7084_v9 = vsel %vm6848_vm7, %v1356_v7, %v1357_v16  ;;  %v7100_v7 = vsel %vm6848_vm7, %v1363_v30, %v1364_v50  ;;  %v2080_v5 = vrot.slane %v2078_v44, 4  ;;  %v2083_v34 = vrot.slane %v2081_v32, 5  ;;  %v5377_v15 = vld [vmem:[%s6518_s25 + $0x24] sm:$0xf]  ;;  %v7128_v44 = vld [vmem:[%s6518_s25 + $0x28] sm:$0xf] }
  0x74   : > { %v2102_v50 = vshrl.u32 %v5374_v40, 16  ;;  %v1337_v1 = vsel %vm6848_vm7, %v1335_v20, %v1336_v60  ;;  %v5272_v33 = vrot.slane %v1225_v57, 9  ;;  %v7123_v30 = vrot.slane %v2087_v6, 5 }
  0x75   : > { %6088 = vmatmul.mubr.msk.bf16.gmra.mxu1 %vm704_vm3, %v5230_v52  ;;  %v1368_v52 = vrot.slane %v6827_v37, 5  ;;  %v2105_v16 = vshll.u32 %v5374_v40, 16  ;;  %v1371_v23 = vrot.slane %v6832_v61, 5  ;;  %v2093_v4 = vrot.slane %v2091_v17, 4 }
  0x76   : > { %6091 = vmatprep.mubr.msk.bf16.mxu1 %vm704_vm3, %v5231_v8  ;;  %v5376_v8 = vld [vmem:[%s6518_s25 + $0x20] sm:$0x1]  ;;  %v2104_v3 = vrot.slane %v2102_v50, 4  ;;  %v2111_v13 = vshll.u32 %v5375_v63, 16  ;;  %v2097_v20 = vshll.u32 %v7115_v47, 16  ;;  %v2115_v57 = vshrl.u32 %v5375_v63, 16 }
  0x77   : > { %v1370_v32 = vrot.slane %v1368_v52, 4  ;;  %v2107_v60 = vrot.slane %v2105_v16, 5  ;;  %v5283_v61 = vcombine.low %v7071_v18, %v7094_v45  ;;  %v5284_v40 = vcombine.low %v7109_v11, %v1337_v1 }
  0x78   : > { %v2084_v6 = vor.u32 %v2083_v34, %v2080_v5  ;;  %v7139_v17 = vrot.slane %v2111_v13, 5  ;;  %v2094_v28 = vor.u32 %v2093_v4, %v7123_v30  ;;  %v2121_v50 = vshll.u32 %v5376_v8, 16  ;;  %v7166_v5 = vld [vmem:[%s6518_s25 + $0x34] sm:$0xf] }
  0x79   : > { %v2108_v56 = vor.u32 %v2107_v60, %v2104_v3  ;;  %v7151_v18 = vsel %vm6848_vm7, %v5272_v33, %v1368_v52  ;;  %v2126_v13 = vshrl.u32 %v5377_v15, 16  ;;  %v2129_v45 = vshll.u32 %v5377_v15, 16  ;;  %v5380_v52 = vld [vmem:[%s6518_s25 + $0x30] sm:$0xf] }
  0x7a   : > { %6126 = vmatmul.mubr.msk.bf16.gmra.mxu0 %vm704_vm3, %v5281_v41  ;;  %v2117_v41 = vrot.slane %v2115_v57, 4  ;;  %v2135_v11 = vshll.u32 %v7128_v44, 16  ;;  %v9145_v3 = vcombine.low %v6537_v12, %v6541_v14  ;;  %v7160_v4 = vsel %vm6848_vm7, %v1370_v32, %v1371_v23 }
  0x7b   : > { %6129 = vmatprep.mubr.msk.bf16.mxu0 %vm704_vm3, %v5282_v51  ;;  %v9144_v51 = vcombine.low %v6803_v62, %v6810_v55  ;;  %v2099_v62 = vrot.slane %v2097_v20, 5  ;;  %v2139_v63 = vshrl.u32 %v7128_v44, 16  ;;  %v2085_v34 = vrot.slane %v2084_v6, 4 }
  0x7c   : > { %v2118_v55 = vor.u32 %v2117_v41, %v7139_v17  ;;  %v2128_v8 = vrot.slane %v2126_v13, 4  ;;  %v2131_v1 = vrot.slane %v2129_v45, 5  ;;  %v7168_v33 = vrot.slane %v2135_v11, 5  ;;  %v7174_v41 = vld [vmem:[%s6518_s25 + $0x38] sm:$0x1] }
  0x7d   : > { %6092 = vmatmul.mubr.msk.bf16.gmra.mxu1 %vm704_vm3, %v9144_v51  ;;  %v2095_v12 = vrot.slane %v2094_v28, 4  ;;  %v2109_v14 = vrot.slane %v2108_v56, 4  ;;  %v2123_v16 = vrot.slane %v2121_v50, 5  ;;  %v2141_v23 = vrot.slane %v2139_v63, 4  ;;  %v5383_v13 = vld [vmem:[%s6518_s25 + $0x3c] sm:$0xf] }
  0x7e   : > { %6095 = vmatprep.mubr.msk.bf16.mxu1 %vm704_vm3, %v9145_v3  ;;  %v2119_v15 = vrot.slane %v2118_v55, 4  ;;  %v2145_v32 = vshll.u32 %v7143_v21, 16  ;;  %v2150_v20 = vshrl.u32 %v5380_v52, 16  ;;  %v2153_v60 = vshll.u32 %v5380_v52, 16 }
  0x7f   : > { %v2132_v57 = vor.u32 %v2131_v1, %v2128_v8  ;;  %v2142_v6 = vor.u32 %v2141_v23, %v7168_v33  ;;  %v2159_v28 = vshll.u32 %v7166_v5, 16  ;;  %v2163_v56 = vshrl.u32 %v7166_v5, 16  ;;  %v5386_v8 = vld [vmem:[%s6518_s25 + $0x48] sm:$0xf]  ;;  %v7201_v1 = vld [vmem:[%s6518_s25 + $0x4c] sm:$0xf] }
  0x80   : > { %v2152_v50 = vrot.slane %v2150_v20, 4  ;;  %v2155_v51 = vrot.slane %v2153_v60, 5  ;;  %v9146_v3 = vcombine.low %v6579_v53, %v6583_v58  ;;  %v5289_v55 = vcombine.low %v7151_v18, %v7160_v4 }
  0x81   : > { %v7180_v45 = vrot.slane %v2159_v28, 5  ;;  %v2165_v11 = vrot.slane %v2163_v56, 4  ;;  %v2100_v63 = vsel %vm6562_vm4, %v2095_v12, %v2099_v62  ;;  %v2114_v52 = vsel %vm6562_vm4, %v2109_v14, %v7139_v17 }
  0x82   : > { %6130 = vmatmul.mubr.msk.bf16.gmra.mxu0 %vm704_vm3, %v5283_v61  ;;  %v7183_v61 = vld [vmem:[%s6518_s25 + $0x40] sm:$0xf]  ;;  %v9147_v53 = vcombine.low %v6617_v35, %v6628_v46  ;;  %v2124_v58 = vsel %vm6562_vm4, %v2119_v15, %v2123_v16  ;;  %v2133_v23 = vrot.slane %v2132_v57, 4  ;;  %v2156_v20 = vor.u32 %v2155_v51, %v2152_v50  ;;  %v7235_v50 = vld [vmem:[%s6518_s25 + $0x44] sm:$0x1] }
  0x83   : > { %6133 = vmatprep.mubr.msk.bf16.mxu0 %vm704_vm3, %v5284_v40  ;;  %v2090_v40 = vsel %vm6562_vm4, %v2085_v34, %v7123_v30  ;;  %v2143_v30 = vrot.slane %v2142_v6, 4  ;;  %v2147_v34 = vrot.slane %v2145_v32, 5  ;;  %v2169_v62 = vshll.u32 %v7174_v41, 16  ;;  %v5389_v51 = vld [vmem:[%s6518_s25 + $0x54] sm:$0xf] }
  0x84   : > { %v2174_v12 = vshrl.u32 %v5383_v13, 16  ;;  %v2177_v17 = vshll.u32 %v5383_v13, 16  ;;  %v7212_v14 = vsel %vm753_vm0, %v6943_v22, 0  ;;  %v2166_v35 = vor.u32 %v2165_v11, %v7180_v45 }
  0x85   : > { %6096 = vmatmul.mubr.msk.bf16.gmra.mxu1 %vm704_vm3, %v9146_v3  ;;  %v2183_v46 = vshll.u32 %v7183_v61, 16  ;;  %v2187_v16 = vshrl.u32 %v7183_v61, 16  ;;  %v7217_v15 = vcombine.low %v2090_v40, %v2100_v63  ;;  %v7221_v32 = vsel %vm753_vm0, %v6915_v24, 0  ;;  %v7244_v40 = vld [vmem:[%s6518_s25 + $0x58] sm:$0xf] }
  0x86   : > { %6099 = vmatprep.mubr.msk.bf16.mxu1 %vm704_vm3, %v9147_v53  ;;  %v2198_v60 = vshrl.u32 %v5386_v8, 16  ;;  %v2201_v57 = vshll.u32 %v5386_v8, 16  ;;  %v9148_v6 = vcombine.low %v7030_v25, %v7040_v54  ;;  %v7227_v22 = vcombine.low %v2114_v52, %v2124_v58  ;;  %v7249_v8 = vld [vmem:[%s6518_s25 + $0x50] sm:$0x1] }
  0x87   : > { %v2138_v28 = vsel %vm6562_vm4, %v2133_v23, %v7168_v33  ;;  %v2148_v56 = vsel %vm6562_vm4, %v2143_v30, %v2147_v34  ;;  %v2207_v24 = vshll.u32 %v7201_v1, 16  ;;  %v9149_v25 = vcombine.low %v7044_v39, %v7054_v27  ;;  %v5392_v34 = vld [vmem:[%s6518_s25 + $0x60] sm:$0xf] }
  0x88   : > { %v2157_v54 = vrot.slane %v2156_v20, 4  ;;  %v2171_v13 = vrot.slane %v2169_v62, 5  ;;  %v2176_v11 = vrot.slane %v2174_v12, 4  ;;  %v2179_v3 = vrot.slane %v2177_v17, 5 }
  0x89   : > { %v2167_v33 = vrot.slane %v2166_v35, 4  ;;  %v7246_v63 = vrot.slane %v2183_v46, 5  ;;  %v2189_v52 = vrot.slane %v2187_v16, 4  ;;  %v2211_v53 = vshrl.u32 %v7201_v1, 16  ;;  %v7266_v35 = vld [vmem:[%s6518_s25 + $0x5c] sm:$0x1] }
  0x8a   : > { %6134 = vmatmul.mubr.msk.bf16.gmra.mxu0 %vm704_vm3, %v9148_v6  ;;  %v9150_v39 = vcombine.low %v6667_v36, %v6674_v43  ;;  %v2200_v27 = vrot.slane %v2198_v60, 4  ;;  %v2203_v58 = vrot.slane %v2201_v57, 5  ;;  %v2222_v23 = vshrl.u32 %v5389_v51, 16 }
  0x8b   : > { %6137 = vmatprep.mubr.msk.bf16.mxu0 %vm704_vm3, %v9149_v25  ;;  %v2225_v30 = vshll.u32 %v5389_v51, 16  ;;  %v9151_v20 = vcombine.low %v9134_v2, %v9133_v10  ;;  %v7261_v62 = vcombine.low %v2138_v28, %v2148_v56  ;;  %v7263_v12 = vrot.slane %v2207_v24, 5  ;;  %v7279_v28 = vld [vmem:[%s6518_s25 + $0x64] sm:$0xf] }
  0x8c   : > { %v2213_v17 = vrot.slane %v2211_v53, 4  ;;  %v2231_v36 = vshll.u32 %v7244_v40, 16  ;;  %v2193_v43 = vshll.u32 %v7235_v50, 16  ;;  %v2224_v46 = vrot.slane %v2222_v23, 4 }
  0x8d   : > { %6100 = vmatmul.mubr.msk.bf16.gmra.mxu1 %vm704_vm3, %v9150_v39  ;;  %v2227_v16 = vrot.slane %v2225_v30, 5  ;;  %v2235_v60 = vshrl.u32 %v7244_v40, 16  ;;  %v2162_v10 = vsel %vm6562_vm4, %v2157_v54, %v7180_v45  ;;  %v2172_v2 = vsel %vm6562_vm4, %v2167_v33, %v2171_v13  ;;  %v7301_v30 = vld [vmem:[%s6518_s25 + $0x68] sm:$0x1] }
  0x8e   : > { %6103 = vmatprep.mubr.msk.bf16.mxu1 %vm704_vm3, %v9151_v20  ;;  %v2180_v57 = vor.u32 %v2179_v3, %v2176_v11  ;;  %v7276_v6 = vrot.slane %v2231_v36, 5  ;;  %v2190_v56 = vor.u32 %v2189_v52, %v7246_v63  ;;  %v2204_v24 = vor.u32 %v2203_v58, %v2200_v27  ;;  %v5395_v3 = vld [vmem:[%s6518_s25 + $0x6c] sm:$0xf]  ;;  %v7298_v27 = vld [vmem:[%s6518_s25 + $0x70] sm:$0xf] }
  0x8f   : > { %v2217_v51 = vshll.u32 %v7249_v8, 16  ;;  %v2237_v25 = vrot.slane %v2235_v60, 4  ;;  %v9152_v53 = vcombine.low %v7064_v19, %v7084_v9  ;;  %v2214_v45 = vor.u32 %v2213_v17, %v7263_v12 }
  0x90   : > { %v2228_v54 = vor.u32 %v2227_v16, %v2224_v46  ;;  %v2246_v13 = vshrl.u32 %v5392_v34, 16  ;;  %v2249_v11 = vshll.u32 %v5392_v34, 16  ;;  %v9153_v33 = vcombine.low %v7076_v59, %v7100_v7  ;;  %v5398_v16 = vld [vmem:[%s6518_s25 + $0x78] sm:$0xf] }
  0x91   : > { %v2238_v52 = vor.u32 %v2237_v25, %v7276_v6  ;;  %v2241_v39 = vshll.u32 %v7266_v35, 16  ;;  %v2255_v19 = vshll.u32 %v7279_v28, 16  ;;  %v2259_v9 = vshrl.u32 %v7279_v28, 16 }
  0x92   : > { %6138 = vmatmul.mubr.msk.bf16.gmra.mxu0 %vm704_vm3, %v9152_v53  ;;  %v2181_v58 = vrot.slane %v2180_v57, 4  ;;  %v2195_v23 = vrot.slane %v2193_v43, 5  ;;  %v2248_v34 = vrot.slane %v2246_v13, 4  ;;  %v2251_v20 = vrot.slane %v2249_v11, 5 }
  0x93   : > { %6141 = vmatprep.mubr.msk.bf16.mxu0 %vm704_vm3, %v9153_v33  ;;  %v9154_v59 = vcombine.low %v9137_v26, %v9136_v38  ;;  %v7307_v7 = vcombine.low %v2162_v10, %v2172_v2  ;;  %v2191_v17 = vrot.slane %v2190_v56, 4  ;;  %v2205_v36 = vrot.slane %v2204_v24, 4  ;;  %v7317_v2 = vld [vmem:[%s6518_s25 + $0x7c] sm:$0xf] }
  0x94   : > { %v7309_v46 = vrot.slane %v2255_v19, 5  ;;  %v9155_v43 = vcombine.low %v9140_v42, %v9139_v48  ;;  %v2215_v60 = vrot.slane %v2214_v45, 4  ;;  %v2219_v57 = vrot.slane %v2217_v51, 5  ;;  %9156 = vst [vmem:[#allocation3_spill] sm:$0xff] %v7317_v2  ;;  %v5401_v19 = vld [vmem:[%s6518_s25 + $0x84] sm:$0xf] }
  0x95   : > { %6104 = vmatmul.mubr.msk.bf16.gmra.mxu1 %vm704_vm3, %v9154_v59  ;;  %v2229_v25 = vrot.slane %v2228_v54, 4  ;;  %v2261_v38 = vrot.slane %v2259_v9, 4  ;;  %v2239_v26 = vrot.slane %v2238_v52, 4  ;;  %v2243_v53 = vrot.slane %v2241_v39, 5 }
  0x96   : > { %6107 = vmatprep.mubr.msk.bf16.mxu1 %vm704_vm3, %v9155_v43  ;;  %v2252_v13 = vor.u32 %v2251_v20, %v2248_v34  ;;  %v2270_v10 = vshrl.u32 %v5395_v3, 16  ;;  %v2186_v56 = vsel %vm6562_vm4, %v2181_v58, %v7246_v63  ;;  %v2273_v24 = vshll.u32 %v5395_v3, 16  ;;  %v6402_v63 = vld [vmem:[%s6518_s25 + $0xc] sm:$0xff]   ;;  %v7351_v34 = vld [vmem:[%s6518_s25 + $0x88] sm:$0xf] }
  0x97   : > { %v2279_v48 = vshll.u32 %v7298_v27, 16  ;;  %v2283_v42 = vshrl.u32 %v7298_v27, 16  ;;  %v2196_v51 = vsel %vm6562_vm4, %v2191_v17, %v2195_v23  ;;  %v2210_v45 = vsel %vm6562_vm4, %v2205_v36, %v7263_v12  ;;  %9157 = vst [vmem:[#allocation5_spill] sm:$0xff] %v7351_v34  ;;  %v7360_v36 = vld [vmem:[%s6518_s25 + $0x74] sm:$0x1] }
  0x98   : > { %v2262_v54 = vor.u32 %v2261_v38, %v7309_v46  ;;  %v2265_v11 = vshll.u32 %v7301_v30, 16  ;;  %v2220_v3 = vsel %vm6562_vm4, %v2215_v60, %v2219_v57  ;;  %v2234_v33 = vsel %vm6562_vm4, %v2229_v25, %v7276_v6  ;;  %9159 = vst [vmem:[#allocation4_spill] sm:$0xff] %v7360_v36  ;;  %v7370_v38 = vld [vmem:[%s6518_s25 + $0x80] sm:$0x1] }
  0x99   : > { %v2294_v52 = vshrl.u32 %v5398_v16, 16  ;;  %v2297_v12 = vshll.u32 %v5398_v16, 16  ;;  %v2244_v18 = vsel %vm6562_vm4, %v2239_v26, %v2243_v53  ;;  %v2253_v4 = vrot.slane %v2252_v13, 4  ;;  %9160 = vst [vmem:[#allocation6_spill] sm:$0xff] %v7370_v38  ;;  %v7373_v26 = vld [vmem:[%s6518_s25 + $0x8c] sm:$0x1] }
  0x9a   : > { %6142 = vmatmul.mubr.msk.bf16.gmra.mxu0 %vm704_vm3, %v5289_v55  ;;  %v2272_v55 = vrot.slane %v2270_v10, 4  ;;  %v2303_v39 = vshll.u32 %v7317_v2, 16  ;;  %v2275_v9 = vrot.slane %v2273_v24, 5  ;;  %v7347_v58 = vrot.slane %v2279_v48, 5  ;;  %9161 = vst [vmem:[#allocation8_spill] sm:$0xff] %v7373_v26  ;;  %v6403_v10 = vld [vmem:[%s6518_s25 + $0x18] sm:$0xff]  }
  0x9b   : > { %6181 = vmatprep.mubr.msk.bf16.mxu0 %vm704_vm3, %v7217_v15  ;;  %v2285_v23 = vrot.slane %v2283_v42, 4  ;;  %v2307_v6 = vshrl.u32 %v7317_v2, 16  ;;  %v9158_v15 = vcombine.low %v9142_v29, %v6827_v37  ;;  %v7357_v20 = vcombine.low %v2186_v56, %v2196_v51  ;;  %v5404_v51 = vld [vmem:[%s6518_s25 + $0x90] sm:$0xf] }
  0x9c   : > { %v2263_v59 = vrot.slane %v2262_v54, 4  ;;  %v2267_v17 = vrot.slane %v2265_v11, 5  ;;  %v2296_v16 = vrot.slane %v2294_v52, 4  ;;  %v2299_v43 = vrot.slane %v2297_v12, 5 }
  0x9d   : > { %6108 = vmatmul.mubr.msk.bf16.gmra.mxu1 %vm704_vm3, %v9158_v15  ;;  %v7363_v60 = vrot.slane %v2303_v39, 5  ;;  %v2309_v57 = vrot.slane %v2307_v6, 4  ;;  %v2318_v25 = vshrl.u32 %v5401_v19, 16  ;;  %v7365_v37 = vcombine.low %v2210_v45, %v2220_v3  ;;  %v7384_v45 = vld [vmem:[%s6518_s25 + $0x94] sm:$0xf] }
  0x9e   : > { %6147 = vmatprep.mubr.msk.bf16.mxu1 %vm704_vm3, %v6402_v63  ;;  %v7367_v29 = vcombine.low %v2234_v33, %v2244_v18  ;;  %v2321_v53 = vshll.u32 %v5401_v19, 16  ;;  %v2327_v13 = vshll.u32 %v7351_v34, 16  ;;  %v2258_v56 = vsel %vm6562_vm4, %v2253_v4, %v7309_v46  ;;  %9162 = vst [vmem:[#allocation7_spill] sm:$0xff] %v7384_v45  ;;  %v7392_v33 = vld [vmem:[%s9076_s1 + $0x20] sm:$0xf]  ;;  %v6404_v46 = vld [vmem:[%s6518_s25 + $0x24] sm:$0xff]  }
  0x9f   : > { %v2276_v24 = vor.u32 %v2275_v9, %v2272_v55  ;;  %v2286_v48 = vor.u32 %v2285_v23, %v7347_v58  ;;  %v2289_v42 = vshll.u32 %v7360_v36, 16  ;;  %v2320_v54 = vrot.slane %v2318_v25, 4  ;;  %9163 = vst [vmem:[#allocation9_spill] sm:$0xff] %v7392_v33 }
  0xa0   : > { %v2323_v11 = vrot.slane %v2321_v53, 5  ;;  %v7386_v63 = vrot.slane %v2327_v13, 5  ;;  %v2331_v3 = vshrl.u32 %v7351_v34, 16  ;;  %v2268_v52 = vsel %vm6562_vm4, %v2263_v59, %v2267_v17 }
  0xa1   : > { %v2300_v12 = vor.u32 %v2299_v43, %v2296_v16  ;;  %v2310_v18 = vor.u32 %v2309_v57, %v7363_v60  ;;  %v2313_v4 = vshll.u32 %v7370_v38, 16  ;;  %v2342_v19 = vshrl.u32 %v5404_v51, 16  ;;  %v7426_v57 = vld [vmem:[%s6518_s25 + $0xa0] sm:$0xf] }
  0xa2   : > { %6182 = vmatmul.mubr.msk.bf16.vlgmr.msra.gmra.mxu0 %vm704_vm3, %v7227_v22  ;;  %v2324_v55 = vor.u32 %v2323_v11, %v2320_v54  ;;  %v2333_v39 = vrot.slane %v2331_v3, 4  ;;  %v2345_v9 = vshll.u32 %v5404_v51, 16  ;;  %v5407_v22 = vld [vmem:[%s6518_s25 + $0x9c] sm:$0xf]  ;;  %v7405_v23 = vrot.slane %v2276_v24, 4  ;;  %9165 = vst [vmem:[#allocation10_spill] sm:$0xff] %v7426_v57 }
  0xa3   : > { %6248 = vmatpush3.bf16.msra.mxu0 %v7221_v32  ;;  %6185 = vmatprep.mubr.msk.bf16.mxu0 %vm704_vm3, %v7261_v62  ;;  %v7407_v6 = vrot.slane %v2289_v42, 5  ;;  %v2337_v15 = vshll.u32 %v7373_v26, 16  ;;  %v2351_v59 = vshll.u32 %v7384_v45, 16  ;;  %v7414_v32 = vld [vmem:[%s9076_s1 + $0x1c] sm:$0xf]  ;;  %v7419_v62 = vcombine.low %v2258_v56, %v2268_v52 }
  0xa4   : > { %9164 = vst [vmem:[#allocation11_spill] sm:$0xff] %v7414_v32  ;;  %6360 = vmatprep.subr.msk.bf16.mxu0 %vm753_vm0, %v7392_v33  ;;  %v7421_v17 = vrot.slane %v2286_v48, 4  ;;  %v2334_v16 = vor.u32 %v2333_v39, %v7386_v63  ;;  %v2355_v43 = vshrl.u32 %v7384_v45, 16  ;;  %v7430_v25 = vrot.slane %v2300_v12, 4  ;;  %v7439_v56 = vld [vmem:[%s6518_s25 + $0x98] sm:$0x1] }
  0xa5   : > { %6148 = vmatmul.mubr.msk.bf16.vlgmr.msra.gmra.mxu1 %vm704_vm3, %v6403_v10  ;;  %v7432_v53 = vrot.slane %v2310_v18, 4  ;;  %v7434_v13 = vrot.slane %v2313_v4, 5  ;;  %v7436_v10 = vrot.slane %v2324_v55, 4  ;;  %9166 = vst [vmem:[#allocation12_spill] sm:$0xff] %v7439_v56  ;;  %v2344_v24 = vrot.slane %v2342_v19, 4  ;;  %v6406_v19 = vld [vmem:[%s6518_s25 + $0x3c] sm:$0xff]  }
  0xa6   : > { %6214 = vmatpush3.bf16.msra.mxu1 %v7212_v14  ;;  %6151 = vmatprep.mubr.msk.bf16.mxu1 %vm704_vm3, %v6404_v46  ;;  %v2347_v48 = vrot.slane %v2345_v9, 5  ;;  %v2366_v42 = vshrl.u32 %v5407_v22, 16  ;;  %v2369_v51 = vshll.u32 %v5407_v22, 16  ;;  %v6405_v14 = vld [vmem:[%s6518_s25 + $0x30] sm:$0xff]   ;;  %v7448_v11 = vrot.slane %v2337_v15, 5 }
  0xa7   : > { %6359 = vmatprep.subr.msk.bf16.mxu1 %vm753_vm0, %v7414_v32  ;;  %v7450_v3 = vrot.slane %v2351_v59, 5  ;;  %v2375_v46 = vshll.u32 %v7426_v57, 16  ;;  %v5410_v52 = vld [vmem:[%s6518_s25 + $0xa8] sm:$0xf]  ;;  %v7454_v12 = vrot.slane %v2334_v16, 4  ;;  %v2357_v18 = vrot.slane %v2355_v43, 4 }
  0xa8   : > { %v2361_v4 = vshll.u32 %v7439_v56, 16  ;;  %v2379_v55 = vshrl.u32 %v7426_v57, 16  ;;  %v7459_v39 = vld [vmem:[%s6518_s25 + $0xac] sm:$0xf]  ;;  %v2348_v59 = vor.u32 %v2347_v48, %v2344_v24  ;;  %v7483_v16 = vld [vmem:[%s6518_s25 + $0xa4] sm:$0x1] }
  0xa9   : > { %9167 = vst [vmem:[#allocation13_spill] sm:$0xff] %v7459_v39  ;;  %9168 = vst [vmem:[#allocation2_spill] sm:$0xff] %v7483_v16  ;;  %v2368_v43 = vrot.slane %v2366_v42, 4  ;;  %v2371_v22 = vrot.slane %v2369_v51, 5  ;;  %v2390_v54 = vshrl.u32 %v5410_v52, 16  ;;  %v7485_v9 = vrot.slane %v2375_v46, 5 }
  0xaa   : > { %6186 = vmatmul.mubr.msk.bf16.gmra.mxu0 %vm704_vm3, %v7307_v7  ;;  %v2381_v32 = vrot.slane %v2379_v55, 4  ;;  %v2393_v15 = vshll.u32 %v5410_v52, 16  ;;  %v2399_v33 = vshll.u32 %v7459_v39, 16  ;;  %v5413_v57 = vld [vmem:[%s6518_s25 + $0xb4] sm:$0xf]  ;;  %v2358_v24 = vor.u32 %v2357_v18, %v7450_v3 }
  0xab   : > { %6189 = vmatprep.mubr.msk.bf16.mxu0 %vm704_vm3, %v7357_v20  ;;  %v2340_v20 = vsel %vm6562_vm4, %v7454_v12, %v7448_v11  ;;  %v7495_v48 = vrot.slane %v2361_v4, 5  ;;  %v7498_v42 = vld [vmem:[%s6518_s25 + $0xb0] sm:$0x1]  ;;  %v2392_v51 = vrot.slane %v2390_v54, 4  ;;  %v7501_v46 = vld [vmem:[%s6518_s25 + $0xb8] sm:$0xf]  ;;  %v2372_v18 = vor.u32 %v2371_v22, %v2368_v43 }
  0xac   : > { %9169 = vst [vmem:[#allocation14_spill] sm:$0xff] %v7498_v42  ;;  %9170 = vst [vmem:[#allocation15_spill] sm:$0xff] %v7501_v46  ;;  %v2395_v52 = vrot.slane %v2393_v15, 5  ;;  %v7505_v55 = vrot.slane %v2399_v33, 5  ;;  %v2403_v11 = vshrl.u32 %v7459_v39, 16  ;;  %v7508_v12 = vrot.slane %v2348_v59, 4 }
  0xad   : > { %6152 = vmatmul.mubr.msk.bf16.gmra.mxu1 %vm704_vm3, %v6405_v14  ;;  %v2385_v14 = vshll.u32 %v7483_v16, 16  ;;  %v7511_v4 = vld [vmem:[%s6518_s25 + $0xbc] sm:$0x1]  ;;  %v2414_v54 = vshrl.u32 %v5413_v57, 16  ;;  %v2417_v7 = vshll.u32 %v5413_v57, 16  ;;  %v2382_v56 = vor.u32 %v2381_v32, %v7485_v9  ;;  %v6407_v16 = vld [vmem:[%s6518_s25 + $0x48] sm:$0xff]  }
  0xae   : > { %6155 = vmatprep.mubr.msk.bf16.mxu1 %vm704_vm3, %v6406_v19  ;;  %v2405_v45 = vrot.slane %v2403_v11, 4  ;;  %v2409_v19 = vshll.u32 %v7498_v42, 16  ;;  %v2423_v15 = vshll.u32 %v7501_v46, 16  ;;  %v5416_v33 = vld [vmem:[%s6518_s25 + $0xc0] sm:$0xf]  ;;  %v2396_v26 = vor.u32 %v2395_v52, %v2392_v51  ;;  %v6408_v57 = vld [vmem:[%s6518_s25 + $0x54] sm:$0xff]  }
  0xaf   : > { %v2416_v39 = vrot.slane %v2414_v54, 4  ;;  %v2419_v34 = vrot.slane %v2417_v7, 5  ;;  %v2427_v59 = vshrl.u32 %v7501_v46, 16  ;;  %v7520_v22 = vld [vmem:[%s6518_s25 + $0xc4] sm:$0xf]  ;;  %v2359_v43 = vrot.slane %v2358_v24, 4 }
  0xb0   : > { %v2387_v32 = vrot.slane %v2385_v14, 5  ;;  %v2406_v11 = vor.u32 %v2405_v45, %v7505_v55  ;;  %v2425_v42 = vrot.slane %v2423_v15, 5  ;;  %v2433_v7 = vshll.u32 %v7511_v4, 16  ;;  %v7532_v45 = vld [vmem:[%s6518_s25 + $0xc8] sm:$0x1] }
  0xb1   : > { %v2420_v51 = vor.u32 %v2419_v34, %v2416_v39  ;;  %v2429_v52 = vrot.slane %v2427_v59, 4  ;;  %v2438_v54 = vshrl.u32 %v5416_v33, 16  ;;  %v2373_v46 = vrot.slane %v2372_v18, 4 }
  0xb2   : > { %6190 = vmatmul.mubr.msk.bf16.gmra.mxu0 %vm704_vm3, %v7365_v37  ;;  %v2383_v38 = vrot.slane %v2382_v56, 4  ;;  %v2441_v2 = vshll.u32 %v5416_v33, 16  ;;  %v2447_v37 = vshll.u32 %v7520_v22, 16  ;;  %v2397_v24 = vrot.slane %v2396_v26, 4 }
  0xb3   : > { %6193 = vmatprep.mubr.msk.bf16.mxu0 %vm704_vm3, %v7367_v29  ;;  %v2411_v14 = vrot.slane %v2409_v19, 5  ;;  %v2430_v36 = vor.u32 %v2429_v52, %v2425_v42  ;;  %v2440_v15 = vrot.slane %v2438_v54, 4  ;;  %v2407_v34 = vrot.slane %v2406_v11, 4 }
  0xb4   : > { %v2443_v29 = vrot.slane %v2441_v2, 5  ;;  %v7535_v39 = vrot.slane %v2447_v37, 5  ;;  %v2451_v56 = vshrl.u32 %v7520_v22, 16  ;;  %v9171_v26 = vsel %vm6562_vm4, %v7421_v17, %v7407_v6 }
  0xb5   : > { %6156 = vmatmul.mubr.msk.bf16.gmra.mxu1 %vm704_vm3, %v6407_v16  ;;  %v9172_v16 = vsel %vm6562_vm4, %v7405_v23, %v7347_v58  ;;  %v2421_v19 = vrot.slane %v2420_v51, 4  ;;  %v2431_v33 = vrot.slane %v2430_v36, 4  ;;  %v2435_v2 = vrot.slane %v2433_v7, 5  ;;  %v6409_v23 = vld [vmem:[%s6518_s25 + $0x60] sm:$0xff]  }
  0xb6   : > { %6159 = vmatprep.mubr.msk.bf16.mxu1 %vm704_vm3, %v6408_v57  ;;  %v5428_v18 = vcombine.low %v9172_v16, %v9171_v26  ;;  %v9173_v59 = vsel %vm6562_vm4, %v7432_v53, %v7434_v13  ;;  %v9174_v6 = vsel %vm6562_vm4, %v7430_v25, %v7363_v60  ;;  %v2444_v57 = vor.u32 %v2443_v29, %v2440_v15  ;;  %v5454_v13 = vld [vmem:[%s6518_s25 + $0x24] sm:$0xe]  ;;  %v5457_v26 = vld [vmem:[%s6518_s25 + $0x48] sm:$0xe] }
  0xb7   : > { %v5429_v17 = vcombine.low %v9174_v6, %v9173_v59  ;;  %v2453_v11 = vrot.slane %v2451_v56, 4  ;;  %v2457_v58 = vshll.u32 %v7532_v45, 16  ;;  %v9175_v36 = vsel %vm6562_vm4, %v7436_v10, %v7386_v63  ;;  %v6410_v63 = vld [vmem:[%s6518_s25 + $0x6c] sm:$0xff]   ;;  %v5458_v6 = vld [vmem:[%s6518_s25 + $0x54] sm:$0xe] }
  0xb8   : > { %v5430_v51 = vcombine.low %v9175_v36, %v2340_v20  ;;  %v2354_v53 = vsel %vm6562_vm4, %v7508_v12, %v7450_v3  ;;  %v2364_v60 = vsel %vm6562_vm4, %v2359_v43, %v7495_v48  ;;  %v2378_v25 = vsel %vm6562_vm4, %v2373_v46, %v7485_v9  ;;  %v7588_v12 = vld [vmem:[%s6518_s25 + $0xc] sm:$0xe] }
  0xb9   : > { %v2388_v10 = vsel %vm6562_vm4, %v2383_v38, %v2387_v32  ;;  %v2402_v3 = vsel %vm6562_vm4, %v2397_v24, %v7505_v55  ;;  %v2412_v20 = vsel %vm6562_vm4, %v2407_v34, %v2411_v14  ;;  %v2454_v48 = vor.u32 %v2453_v11, %v7535_v39  ;;  %v5455_v55 = vld [vmem:[%s6518_s25 + $0x30] sm:$0xe]  ;;  %v5456_v14 = vld [vmem:[%s6518_s25 + $0x3c] sm:$0xe] }
  0xba   : > { %6194 = vmatmul.mubr.msk.bf16.gmra.mxu0 %vm704_vm3, %v7419_v62  ;;  %v2426_v62 = vsel %vm6562_vm4, %v2421_v19, %v2425_v42  ;;  %v2436_v38 = vsel %vm6562_vm4, %v2431_v33, %v2435_v2  ;;  %v7595_v9 = vrot.slane %v2444_v57, 4  ;;  %v2821_v46 = vrot.slane %v7079_v49, 5  ;;  %v6411_v57 = vld [vmem:[%s6518_s25 + $0x78] sm:$0xff]  }
  0xbb   : > { %6197 = vmatprep.mubr.msk.bf16.mxu0 %vm704_vm3, %v5428_v18  ;;  %v7599_v43 = vcombine.low %v2354_v53, %v2364_v60  ;;  %v7601_v32 = vrot.slane %v2454_v48, 4  ;;  %v7603_v52 = vrot.slane %v2457_v58, 5  ;;  %v5470_v7 = vrot.slane %v5454_v13, 9  ;;  %v6412_v53 = vld [vmem:[%s6518_s25 + $0x84] sm:$0xff]   ;;  %v5459_v13 = vld [vmem:[%s6518_s25 + $0x60] sm:$0xe] }
  0xbc   : > { %v7606_v54 = vcombine.low %v2378_v25, %v2388_v10  ;;  %v7608_v42 = vcombine.low %v2402_v3, %v2412_v20  ;;  %v5468_v37 = vrot.slane %v7588_v12, 9  ;;  %v2835_v24 = vrot.slane %v7128_v44, 5  ;;  %v6418_v49 = vld [vmem:[%s6518_s25 + $0x18] sm:$0xff]  }
  0xbd   : > { %6160 = vmatmul.mubr.msk.bf16.gmra.mxu1 %vm704_vm3, %v6409_v23  ;;  %v7614_v15 = vcombine.low %v2426_v62, %v2436_v38  ;;  %v2824_v34 = vrot.slane %v7115_v47, 5  ;;  %v2838_v29 = vrot.slane %v7143_v21, 5  ;;  %v5471_v56 = vrot.slane %v5455_v55, 9  ;;  %v5461_v55 = vld [vmem:[%s6518_s25 + $0x78] sm:$0xe] }
  0xbe   : > { %6163 = vmatprep.mubr.msk.bf16.mxu1 %vm704_vm3, %v6410_v63  ;;  %v2450_v16 = vsel %vm6562_vm4, %v7595_v9, %v7535_v39  ;;  %v7625_v44 = vrot.slane %v2821_v46, 4  ;;  %v7629_v18 = vsel %vm6848_vm7, %v5470_v7, %v2835_v24  ;;  %v2837_v19 = vrot.slane %v2835_v24, 4 }
  0xbf   : > { %v2460_v21 = vsel %vm6562_vm4, %v7601_v32, %v7603_v52  ;;  %v2842_v33 = vrot.slane %v7166_v5, 5  ;;  %v2845_v2 = vrot.slane %v7174_v41, 5  ;;  %v5472_v59 = vrot.slane %v5456_v14, 9  ;;  %v6417_v52 = vld [vmem:[%s6518_s25 + $0xc0] sm:$0xff]  }
  0xc0   : > { %v7641_v11 = vsel %vm6848_vm7, %v2837_v19, %v2838_v29  ;;  %v2849_v58 = vrot.slane %v7183_v61, 5  ;;  %v2852_v23 = vrot.slane %v7235_v50, 5  ;;  %v5473_v36 = vrot.slane %v5457_v26, 9  ;;  %v5462_v19 = vld [vmem:[%s6518_s25 + $0x84] sm:$0xe] }
  0xc1   : > { %v5487_v5 = vcombine.low %v7629_v18, %v7641_v11  ;;  %v7651_v41 = vsel %vm6848_vm7, %v5471_v56, %v2842_v33  ;;  %v2844_v60 = vrot.slane %v2842_v33, 4  ;;  %v2856_v25 = vrot.slane %v7201_v1, 5 }
  0xc2   : > { %6198 = vmatmul.mubr.msk.bf16.gmra.mxu0 %vm704_vm3, %v5429_v17  ;;  %v7658_v61 = vsel %vm6848_vm7, %v5472_v59, %v2849_v58  ;;  %v2851_v50 = vrot.slane %v2849_v58, 4  ;;  %v2859_v17 = vrot.slane %v7249_v8, 5  ;;  %v5474_v63 = vrot.slane %v5458_v6, 9  ;;  %v9176_v59 = vld [vmem:[#allocation4_spill] sm:$0xff] }
  0xc3   : > { %6201 = vmatprep.mubr.msk.bf16.mxu0 %vm704_vm3, %v5430_v51  ;;  %v7663_v10 = vsel %vm6848_vm7, %v2844_v60, %v2845_v2  ;;  %v7667_v3 = vsel %vm6848_vm7, %v5473_v36, %v2856_v25  ;;  %v2858_v1 = vrot.slane %v2856_v25, 4  ;;  %v2863_v20 = vrot.slane %v7244_v40, 5  ;;  %v5460_v51 = vld [vmem:[%s6518_s25 + $0x6c] sm:$0xe]  ;;  %v6413_v58 = vld [vmem:[%s6518_s25 + $0x90] sm:$0xff]  }
  0xc4   : > { %v5488_v48 = vcombine.low %v7651_v41, %v7663_v10  ;;  %v7676_v8 = vsel %vm6848_vm7, %v2851_v50, %v2852_v23  ;;  %v2866_v62 = vrot.slane %v7266_v35, 5  ;;  %v5475_v38 = vrot.slane %v5459_v13, 9  ;;  %v9177_v36 = vld [vmem:[#allocation3_spill] sm:$0xff]  ;;  %v5463_v60 = vld [vmem:[%s6518_s25 + $0x90] sm:$0xe]  ;;  %v9178_v50 = vld [vmem:[#allocation6_spill] sm:$0xff] }
  0xc5   : > { %6164 = vmatmul.mubr.msk.bf16.gmra.mxu1 %vm704_vm3, %v6411_v57  ;;  %v5489_v40 = vcombine.low %v7658_v61, %v7676_v8  ;;  %v7685_v7 = vsel %vm6848_vm7, %v2858_v1, %v2859_v17  ;;  %v7689_v24 = vsel %vm6848_vm7, %v5474_v63, %v2863_v20  ;;  %v2865_v14 = vrot.slane %v2863_v20, 4 }
  0xc6   : > { %6167 = vmatprep.mubr.msk.bf16.mxu1 %vm704_vm3, %v6412_v53  ;;  %v5490_v35 = vcombine.low %v7667_v3, %v7685_v7  ;;  %v2870_v29 = vrot.slane %v7279_v28, 5  ;;  %v2873_v56 = vrot.slane %v7301_v30, 5  ;;  %v5476_v26 = vrot.slane %v5460_v51, 9  ;;  %v9179_v51 = vld [vmem:[#allocation5_spill] sm:$0xff]  ;;  %v5594_v3 = vld [vmem:[%s6518_s25 + $0x48] sm:$0xf] }
  0xc7   : > { %v7698_v33 = vsel %vm6848_vm7, %v2865_v14, %v2866_v62  ;;  %v2877_v2 = vrot.slane %v7298_v27, 5  ;;  %v2880_v6 = vrot.slane %v9176_v59, 5  ;;  %v5477_v57 = vrot.slane %v5461_v55, 9  ;;  %v6414_v27 = vld [vmem:[%s6518_s25 + $0x9c] sm:$0xff]   ;;  %v9187_v55 = vld [vmem:[#allocation15_spill] sm:$0xff] }
  0xc8   : > { %v5491_v23 = vcombine.low %v7689_v24, %v7698_v33  ;;  %v7707_v28 = vsel %vm6848_vm7, %v5475_v38, %v2870_v29  ;;  %v2872_v30 = vrot.slane %v2870_v29, 4  ;;  %v2884_v53 = vrot.slane %v9177_v36, 5  ;;  %v5464_v38 = vld [vmem:[%s6518_s25 + $0x9c] sm:$0xe]  ;;  %v9182_v36 = vld [vmem:[#allocation12_spill] sm:$0xff] }
  0xc9   : > { %v7716_v25 = vsel %vm6848_vm7, %v5476_v26, %v2877_v2  ;;  %v2879_v13 = vrot.slane %v2877_v2, 4  ;;  %v2887_v17 = vrot.slane %v9178_v50, 5  ;;  %v5478_v63 = vrot.slane %v5462_v19, 9  ;;  %v5465_v26 = vld [vmem:[%s6518_s25 + $0xa8] sm:$0xe] }
  0xca   : > { %6202 = vmatmul.mubr.msk.bf16.gmra.mxu0 %vm704_vm3, %v7599_v43  ;;  %v7723_v1 = vsel %vm6848_vm7, %v2872_v30, %v2873_v56  ;;  %v7727_v43 = vsel %vm6848_vm7, %v5477_v57, %v2884_v53  ;;  %v2886_v20 = vrot.slane %v2884_v53, 4  ;;  %v2891_v62 = vrot.slane %v9179_v51, 5  ;;  %v5467_v57 = vld [vmem:[%s6518_s25 + $0xc0] sm:$0xe]  ;;  %v6415_v19 = vld [vmem:[%s6518_s25 + $0xa8] sm:$0xff]  }
  0xcb   : > { %6205 = vmatprep.mubr.msk.bf16.mxu0 %vm704_vm3, %v7606_v54  ;;  %v7735_v14 = vsel %vm6848_vm7, %v2879_v13, %v2880_v6  ;;  %v9180_v54 = vld [vmem:[#allocation8_spill] sm:$0xff]  ;;  %v5479_v56 = vrot.slane %v5463_v60, 9  ;;  %v2901_v53 = vrot.slane %v9182_v36, 5  ;;  %v5480_v60 = vrot.slane %v5464_v38, 9  ;;  %v9185_v38 = vld [vmem:[#allocation13_spill] sm:$0xff] }
  0xcc   : > { %v2894_v29 = vrot.slane %v9180_v54, 5  ;;  %v7744_v2 = vsel %vm6848_vm7, %v2886_v20, %v2887_v17  ;;  %v7748_v59 = vsel %vm6848_vm7, %v5478_v63, %v2891_v62  ;;  %v2893_v6 = vrot.slane %v2891_v62, 4  ;;  %v5466_v13 = vld [vmem:[%s6518_s25 + $0xb4] sm:$0xe]  ;;  %v9183_v17 = vld [vmem:[#allocation10_spill] sm:$0xff] }
  0xcd   : > { %6168 = vmatmul.mubr.msk.bf16.gmra.mxu1 %vm704_vm3, %v6413_v58  ;;  %v9181_v58 = vld [vmem:[#allocation7_spill] sm:$0xff]  ;;  %v2905_v63 = vrot.slane %v9183_v17, 5  ;;  %v9184_v20 = vld [vmem:[#allocation2_spill] sm:$0xff]  ;;  %v5481_v62 = vrot.slane %v5465_v26, 9  ;;  %v2912_v36 = vrot.slane %v9185_v38, 5  ;;  %v5482_v26 = vrot.slane %v5466_v13, 9 }
  0xce   : > { %6171 = vmatprep.mubr.msk.bf16.mxu1 %vm704_vm3, %v6414_v27  ;;  %v2898_v30 = vrot.slane %v9181_v58, 5  ;;  %v7758_v50 = vsel %vm6848_vm7, %v2893_v6, %v2894_v29  ;;  %v2908_v51 = vrot.slane %v9184_v20, 5  ;;  %v9186_v17 = vld [vmem:[#allocation14_spill] sm:$0xff]  ;;  %v6416_v27 = vld [vmem:[%s6518_s25 + $0xb4] sm:$0xff]   ;;  %v2825_v39 = vsel %vm6848_vm7, %v7625_v44, %v2824_v34  ;;  %v7975_v7 = vld [vmem:[%s6518_s25 + $0x4c] sm:$0xf] }
  0xcf   : > { %v7773_v29 = vsel %vm6848_vm7, %v5480_v60, %v2905_v63  ;;  %v2907_v6 = vrot.slane %v2905_v63, 4  ;;  %v2915_v20 = vrot.slane %v9186_v17, 5  ;;  %v2914_v38 = vrot.slane %v2912_v36, 4  ;;  %v6435_v44 = vld [vmem:[%s6518_s25 + $0x20] sm:$0x1] }
  0xd0   : > { %v7766_v54 = vsel %vm6848_vm7, %v5479_v56, %v2898_v30  ;;  %v2900_v58 = vrot.slane %v2898_v30, 4  ;;  %v7785_v30 = vsel %vm6848_vm7, %v5481_v62, %v2912_v36  ;;  %v2919_v60 = vrot.slane %v9187_v55, 5 }
  0xd1   : > { %v5483_v63 = vrot.slane %v5467_v57, 9  ;;  %v7801_v55 = vsel %vm6848_vm7, %v2914_v38, %v2915_v20  ;;  %v2926_v57 = vrot.slane %v7520_v22, 5  ;;  %v2822_v22 = vsel %vm6848_vm7, %v5468_v37, %v2821_v46  ;;  %v6420_v38 = vld [vmem:[%s6518_s25 + $0x30] sm:$0xff]  }
  0xd2   : > { %6206 = vmatmul.mubr.msk.bf16.gmra.mxu0 %vm704_vm3, %v7608_v42  ;;  %v7781_v56 = vsel %vm6848_vm7, %v2900_v58, %v2901_v53  ;;  %v7794_v42 = vsel %vm6848_vm7, %v2907_v6, %v2908_v51  ;;  %v2922_v53 = vrot.slane %v7511_v4, 5  ;;  %v2921_v58 = vrot.slane %v2919_v60, 4 }
  0xd3   : > { %6209 = vmatprep.mubr.msk.bf16.mxu0 %vm704_vm3, %v7614_v15  ;;  %v7805_v15 = vsel %vm6848_vm7, %v5482_v26, %v2919_v60  ;;  %v2929_v51 = vrot.slane %v7532_v45, 5  ;;  %v5453_v45 = vld [vmem:[%s6518_s25 + $0x18] sm:$0xe]  ;;  %v7845_v9 = vsel %vm6848_vm7, %v5483_v63, %v2926_v57  ;;  %v2928_v46 = vrot.slane %v2926_v57, 4  ;;  %v6419_v26 = vld [vmem:[%s6518_s25 + $0x24] sm:$0xff]  }
  0xd4   : > { %v7833_v32 = vsel %vm6848_vm7, %v2921_v58, %v2922_v53  ;;  %v5469_v37 = vrot.slane %v5453_v45, 9  ;;  %v5485_v34 = vcombine.low %v2822_v22, %v2825_v39  ;;  %v9188_v60 = vld [vmem:[#allocation9_spill] sm:$0xff] }
  0xd5   : > { %6172 = vmatmul.mubr.msk.bf16.gmra.mxu1 %vm704_vm3, %v6415_v19  ;;  %v5435_v19 = vcombine.low %v2450_v16, %v2460_v21  ;;  %v7850_v47 = vsel %vm6848_vm7, %v2928_v46, %v2929_v51  ;;  %v2831_v21 = vrot.slane %v6435_v44, 5  ;;  %v4588_v53 = vsel %vm753_vm0, %v9188_v60, 0  ;;  %v5582_v63 = vld [vmem:[%s6518_s25 + $0x18] sm:$0xf]  ;;  %v5583_v57 = vld [vmem:[%s6518_s25 + $0x1c] sm:$0xf] }
  0xd6   : > { %6175 = vmatprep.mubr.msk.bf16.mxu1 %vm704_vm3, %v6416_v27  ;;  %v6434_v27 = vld [vmem:[%s6518_s25 + $0x1c] sm:$0xf]  ;;  %v5585_v51 = vld [vmem:[%s6518_s25 + $0x24] sm:$0xf]  ;;  %v3636_v45 = vshrl.u32 %v5582_v63, 16  ;;  %v3645_v39 = vshll.u32 %v5583_v57, 16 }
  0xd7   : > { %v2828_v36 = vrot.slane %v6434_v27, 5  ;;  %v3639_v27 = vshll.u32 %v5582_v63, 16  ;;  %v3660_v46 = vshrl.u32 %v5585_v51, 16  ;;  %v6422_v44 = vld [vmem:[%s6518_s25 + $0x48] sm:$0xff]   ;;  %v5663_v60 = vld [vmem:[%s6518_s25 + $0x18] sm:$0xe] }
  0xd8   : > { %v7891_v63 = vld [vmem:[%s6518_s25 + $0x2c] sm:$0x1] }
  0xd9   : > { %v2830_v16 = vrot.slane %v2828_v36, 4  ;;  %v2829_v17 = vsel %vm6848_vm7, %v5469_v37, %v2828_v36  ;;  %v7875_v36 = vld [vmem:[%s6518_s25 + $0x28] sm:$0xf]  ;;  %v6421_v37 = vld [vmem:[%s6518_s25 + $0x3c] sm:$0xff]   ;;  %v3662_v18 = vrot.slane %v3660_v46, 4 }
  0xda   : > { %6210 = vmatmul.mubr.msk.bf16.gmra.mxu0 %vm704_vm3, %v5435_v19  ;;  %v9189_v19 = vld [vmem:[#allocation11_spill] sm:$0xff] }
  0xdb   : > { %6249 = vmatprep.mubr.msk.bf16.mxu0 %vm704_vm3, %v6418_v49  ;;  %v2832_v20 = vsel %vm6848_vm7, %v2830_v16, %v2831_v21  ;;  %v4118_v22 = vsel %vm753_vm0, %v9189_v19, 0  ;;  %v3649_v49 = vshrl.u32 %v5583_v57, 16  ;;  %v3673_v16 = vshrl.u32 %v7875_v36, 16  ;;  %v5584_v21 = vld [vmem:[%s6518_s25 + $0x20] sm:$0x1] }
  0xdc   : > { %v5486_v58 = vcombine.low %v2829_v17, %v2832_v20  ;;  %v3638_v17 = vrot.slane %v3636_v45, 4  ;;  %v3641_v20 = vrot.slane %v3639_v27, 5  ;;  %v5588_v19 = vld [vmem:[%s6518_s25 + $0x30] sm:$0xf]  ;;  %v3655_v45 = vshll.u32 %v5584_v21, 16 }
  0xdd   : > { %6176 = vmatmul.mubr.msk.bf16.gmra.mxu1 %vm704_vm3, %v6417_v52  ;;  %v3663_v52 = vshll.u32 %v5585_v51, 16  ;;  %v3675_v51 = vrot.slane %v3673_v16, 4  ;;  %v5679_v27 = vrot.slane %v5663_v60, 9  ;;  %v4382_v46 = vrot.slane %v5584_v21, 5  ;;  %v5664_v16 = vld [vmem:[%s6518_s25 + $0x24] sm:$0xe] }
  0xde   : > { %6215 = vmatprep.mubr.msk.bf16.mxu1 %vm704_vm3, %v5485_v34  ;;  %v3669_v34 = vshll.u32 %v7875_v36, 16  ;;  %v6423_v21 = vld [vmem:[%s6518_s25 + $0x54] sm:$0xff]   ;;  %v3687_v10 = vshll.u32 %v5588_v19, 16  ;;  %v6424_v60 = vld [vmem:[%s6518_s25 + $0x60] sm:$0xff]  }
  0xdf   : > { %v3665_v11 = vrot.slane %v3663_v52, 5  ;;  %v3679_v52 = vshll.u32 %v7891_v63, 16 }
  0xe2   : > { %6250 = vmatmul.mubr.msk.bf16.vlgmr.msra.gmra.mxu0 %vm704_vm3, %v6419_v26  ;;  %v7887_v26 = vrot.slane %v3645_v39, 5 }
  0xe3   : > { %6316 = vmatpush3.bf16.msra.mxu0 %v4588_v53  ;;  %6253 = vmatprep.mubr.msk.bf16.mxu0 %vm704_vm3, %v6420_v38  ;;  %v3651_v38 = vrot.slane %v3649_v49, 4  ;;  %v4379_v53 = vrot.slane %v5583_v57, 5  ;;  %v7901_v57 = vld [vmem:[%s6518_s25 + $0x34] sm:$0xf] }
  0xe5   : > { %6216 = vmatmul.mubr.msk.bf16.vlgmr.msra.gmra.mxu1 %vm704_vm3, %v5486_v58  ;;  %v7896_v58 = vrot.slane %v3669_v34, 5  ;;  %v3652_v39 = vor.u32 %v3651_v38, %v7887_v26  ;;  %v4381_v49 = vrot.slane %v4379_v53, 4  ;;  %v3666_v34 = vor.u32 %v3665_v11, %v3662_v18 }
  0xe6   : > { %6282 = vmatpush3.bf16.msra.mxu1 %v4118_v22  ;;  %6219 = vmatprep.mubr.msk.bf16.mxu1 %vm704_vm3, %v5487_v5  ;;  %v7894_v5 = vpop.f32.mrf.mxu0  ;;  %v3642_v22 = vor.u32 %v3641_v20, %v3638_v17  ;;  %v3684_v17 = vshrl.u32 %v5588_v19, 16  ;;  %v3697_v38 = vshrl.u32 %v7901_v57, 16  ;;  %v7926_v61 = vsel %vm6848_vm7, %v5679_v27, %v4379_v53  ;;  %v5591_v19 = vld [vmem:[%s6518_s25 + $0x3c] sm:$0xf] }
  0xe7   : > { %v3676_v41 = vor.u32 %v3675_v51, %v7896_v58  ;;  %v3653_v8 = vrot.slane %v3652_v39, 4  ;;  %v3681_v11 = vrot.slane %v3679_v52, 5  ;;  %v5680_v51 = vrot.slane %v5664_v16, 9  ;;  %v7940_v39 = vld [vmem:[%s6518_s25 + $0x38] sm:$0x1] }
  0xe8   : > { %v7918_v20 = vpop.f32.mrf.mxu0  ;;  %v3643_v18 = vrot.slane %v3642_v22, 4  ;;  %v3667_v12 = vrot.slane %v3666_v34, 4  ;;  %v4389_v22 = vrot.slane %v7891_v63, 5  ;;  %v3699_v52 = vrot.slane %v3697_v38, 4 }
  0xe9   : > { %v3677_v27 = vrot.slane %v3676_v41, 4  ;;  %v3708_v34 = vshrl.u32 %v5591_v19, 16  ;;  %v3711_v16 = vshll.u32 %v5591_v19, 16  ;;  %v7953_v41 = vld [vmem:[%s6518_s25 + $0x40] sm:$0xf] }
  0xea   : > { %6254 = vmatmul.mubr.msk.bf16.gmra.mxu0 %vm704_vm3, %v6421_v37  ;;  %v7937_v53 = vpop.f32.mrf.mxu0  ;;  %v3648_v63 = vsel %vm6562_vm4, %v3643_v18, %v7887_v26  ;;  %v3672_v26 = vsel %vm6562_vm4, %v3667_v12, %v7896_v58  ;;  %v5665_v18 = vld [vmem:[%s6518_s25 + $0x30] sm:$0xe]  ;;  %v3717_v24 = vshll.u32 %v7953_v41, 16  ;;  %v3721_v33 = vshrl.u32 %v7953_v41, 16 }
  0xeb   : > { %6257 = vmatprep.mubr.msk.bf16.mxu0 %vm704_vm3, %v6422_v44  ;;  %v7909_v37 = vpop.f32.mrf.mxu1  ;;  %v4386_v44 = vrot.slane %v7875_v36, 5  ;;  %v3657_v36 = vrot.slane %v3655_v45, 5  ;;  %v3686_v45 = vrot.slane %v3684_v17, 4  ;;  %v3682_v58 = vsel %vm6562_vm4, %v3677_v27, %v3681_v11 }
  0xec   : > { %9190 = vst [vmem:[#allocation4_spill] sm:$0xff] %v7909_v37  ;;  %v7982_v12 = vpop.f32.mrf.mxu0  ;;  %v3713_v19 = vrot.slane %v3711_v16, 5  ;;  %v3745_v11 = vshrl.u32 %v7975_v7, 16 }
  0xed   : > { %6220 = vmatmul.mubr.msk.bf16.gmra.mxu1 %vm704_vm3, %v5488_v48  ;;  %v3693_v48 = vshll.u32 %v7901_v57, 16  ;;  %v7933_v6 = vpop.f32.mrf.mxu1  ;;  %v4388_v4 = vrot.slane %v4386_v44, 4  ;;  %v3658_v17 = vsel %vm6562_vm4, %v3653_v8, %v3657_v36  ;;  %v4393_v36 = vrot.slane %v7901_v57, 5  ;;  %v6426_v8 = vld [vmem:[%s6518_s25 + $0x78] sm:$0xff]  }
  0xee   : > { %6223 = vmatprep.mubr.msk.bf16.mxu1 %vm704_vm3, %v5489_v40  ;;  %v7930_v40 = vsel %vm6848_vm7, %v4381_v49, %v4382_v46  ;;  %9191 = vst [vmem:[#allocation3_spill] sm:$0xff] %v7933_v6  ;;  %v3689_v49 = vrot.slane %v3687_v10, 5  ;;  %v7996_v27 = vcombine.low %v3648_v63, %v3658_v17  ;;  %v7998_v57 = vcombine.low %v3672_v26, %v3682_v58  ;;  %v8012_v17 = vld [vmem:[%s6518_s25 + $0x58] sm:$0xf]  ;;  %v8018_v58 = vld [vmem:[%s6518_s25 + $0x44] sm:$0x1] }
  0xef   : > { %v7942_v46 = vrot.slane %v3693_v48, 5  ;;  %v7959_v10 = vpop.f32.mrf.mxu1  ;;  %v7966_v48 = vsel %vm6848_vm7, %v5680_v51, %v4386_v44  ;;  %v7970_v38 = vsel %vm6848_vm7, %v4388_v4, %v4389_v22  ;;  %v3710_v51 = vrot.slane %v3708_v34, 4  ;;  %v5597_v34 = vld [vmem:[%s6518_s25 + $0x54] sm:$0xf] }
  0xf0   : > { %9192 = vst [vmem:[#allocation6_spill] sm:$0xff] %v7959_v10  ;;  %v3690_v44 = vor.u32 %v3689_v49, %v3686_v45  ;;  %v3735_v22 = vshll.u32 %v5594_v3, 16  ;;  %v4395_v13 = vrot.slane %v4393_v36, 4  ;;  %v4396_v63 = vrot.slane %v7940_v39, 5  ;;  %v5666_v49 = vld [vmem:[%s6518_s25 + $0x3c] sm:$0xe] }
  0xf1   : > { %v3700_v4 = vor.u32 %v3699_v52, %v7942_v46  ;;  %v7994_v45 = vpop.f32.mrf.mxu1  ;;  %v5681_v52 = vrot.slane %v5665_v18, 9  ;;  %v3714_v18 = vor.u32 %v3713_v19, %v3710_v51  ;;  %v9195_v6 = vcombine.low %v7707_v28, %v7723_v1 }
  0xf2   : > { %6258 = vmatmul.mubr.msk.bf16.gmra.mxu0 %vm704_vm3, %v6423_v21  ;;  %v3741_v21 = vshll.u32 %v7975_v7, 16  ;;  %9193 = vst [vmem:[#allocation5_spill] sm:$0xff] %v7994_v45  ;;  %v3737_v45 = vrot.slane %v3735_v22, 5  ;;  %v3756_v51 = vshrl.u32 %v5597_v34, 16  ;;  %v3759_v19 = vshll.u32 %v5597_v34, 16 }
  0xf3   : > { %6261 = vmatprep.mubr.msk.bf16.mxu0 %vm704_vm3, %v6424_v60  ;;  %v3703_v60 = vshll.u32 %v7940_v39, 16  ;;  %v8015_v26 = vrot.slane %v3700_v4, 4  ;;  %v3747_v39 = vrot.slane %v3745_v11, 4  ;;  %v8053_v22 = vsel %vm6848_vm7, %v4395_v13, %v4396_v63 }
  0xf4   : > { %v8023_v10 = vrot.slane %v3741_v21, 5  ;;  %v9197_v21 = vcombine.low %v7716_v25, %v7735_v14  ;;  %v4400_v25 = vrot.slane %v7953_v41, 5  ;;  %v6428_v14 = vld [vmem:[%s6518_s25 + $0x90] sm:$0xff]   ;;  %v5682_v1 = vrot.slane %v5666_v49, 9  ;;  %v5600_v41 = vld [vmem:[%s6518_s25 + $0x60] sm:$0xf] }
  0xf5   : > { %6224 = vmatmul.mubr.msk.bf16.gmra.mxu1 %vm704_vm3, %v5490_v35  ;;  %v6425_v35 = vld [vmem:[%s6518_s25 + $0x6c] sm:$0xff]   ;;  %v8008_v62 = vrot.slane %v3703_v60, 5  ;;  %v3758_v37 = vrot.slane %v3756_v51, 4 }
  0xf6   : > { %6227 = vmatprep.mubr.msk.bf16.mxu1 %vm704_vm3, %v5491_v23  ;;  %v3732_v23 = vshrl.u32 %v5594_v3, 16  ;;  %v8006_v3 = vrot.slane %v3690_v44, 4  ;;  %v3723_v44 = vrot.slane %v3721_v33, 4  ;;  %v3769_v33 = vshrl.u32 %v8012_v17, 16 }
  0xf7   : > { %v8004_v16 = vpop.f32.mrf.mxu0  ;;  %v3748_v13 = vor.u32 %v3747_v39, %v8023_v10  ;;  %v4407_v39 = vrot.slane %v7975_v7, 5  ;;  %v9201_v7 = vcombine.low %v7727_v43, %v7744_v2  ;;  %v9203_v43 = vcombine.low %v7748_v59, %v7758_v50  ;;  %v6429_v2 = vld [vmem:[%s6518_s25 + $0x9c] sm:$0xff]  }
  0xf8   : > { %9194 = vst [vmem:[#allocation8_spill] sm:$0xff] %v8004_v16  ;;  %v3734_v60 = vrot.slane %v3732_v23, 4  ;;  %v6427_v23 = vld [vmem:[%s6518_s25 + $0x84] sm:$0xff]   ;;  %v8080_v16 = vld [vmem:[%s6518_s25 + $0x5c] sm:$0x1]  ;;  %v4414_v59 = vrot.slane %v8012_v17, 5 }
  0xf9   : > { %v8041_v28 = vpop.f32.mrf.mxu0 }
  0xfa   : > { %6262 = vmatmul.mubr.msk.bf16.gmra.mxu0 %vm704_vm3, %v6425_v35  ;;  %v8020_v35 = vrot.slane %v3717_v24, 5  ;;  %v3765_v24 = vshll.u32 %v8012_v17, 16  ;;  %9198 = vst [vmem:[#allocation12_spill] sm:$0xff] %v8041_v28  ;;  %v3761_v28 = vrot.slane %v3759_v19, 5 }
  0xfb   : > { %6265 = vmatprep.mubr.msk.bf16.mxu0 %vm704_vm3, %v6426_v8  ;;  %v8029_v4 = vpop.f32.mrf.mxu1  ;;  %v8032_v8 = vld [vmem:[%s6518_s25 + $0x50] sm:$0x1]  ;;  %v8073_v49 = vpop.f32.mrf.mxu0 }
  0xfc   : > { %9196 = vst [vmem:[#allocation7_spill] sm:$0xff] %v8029_v4  ;;  %v3724_v34 = vor.u32 %v3723_v44, %v8020_v35  ;;  %v8063_v4 = vrot.slane %v3714_v18, 4  ;;  %v8070_v11 = vrot.slane %v3765_v24, 5  ;;  %v3771_v44 = vrot.slane %v3769_v33, 4  ;;  %9200 = vst [vmem:[#allocation2_spill] sm:$0xff] %v8073_v49 }
  0xfd   : > { %6228 = vmatmul.mubr.msk.bf16.gmra.mxu1 %vm704_vm3, %v9195_v6  ;;  %v8049_v6 = vsel %vm6848_vm7, %v5681_v52, %v4393_v36  ;;  %v3738_v36 = vor.u32 %v3737_v45, %v3734_v60  ;;  %v3751_v52 = vshll.u32 %v8032_v8, 16  ;;  %v8068_v63 = vpop.f32.mrf.mxu1  ;;  %v4402_v18 = vrot.slane %v4400_v25, 4  ;;  %v5667_v24 = vld [vmem:[%s6518_s25 + $0x48] sm:$0xe] }
  0xfe   : > { %6231 = vmatprep.mubr.msk.bf16.mxu1 %vm704_vm3, %v9197_v21  ;;  %v3727_v21 = vshll.u32 %v8018_v58, 16  ;;  %9199 = vst [vmem:[#allocation10_spill] sm:$0xff] %v8068_v63  ;;  %v4403_v60 = vrot.slane %v8018_v58, 5  ;;  %v3725_v51 = vrot.slane %v3724_v34, 4  ;;  %v3780_v33 = vshrl.u32 %v5600_v41, 16 }
  0xff   : > { %v8086_v63 = vsel %vm6848_vm7, %v5682_v1, %v4400_v25  ;;  %v3739_v45 = vrot.slane %v3738_v36, 4  ;;  %v3749_v49 = vrot.slane %v3748_v13, 4  ;;  %v3753_v58 = vrot.slane %v3751_v52, 5  ;;  %v8101_v36 = vld [vmem:[%s6518_s25 + $0x64] sm:$0xf]  ;;  %v8108_v13 = vpop.f32.mrf.mxu0 }
 0x100   : > { %v3729_v19 = vrot.slane %v3727_v21, 5  ;;  %v3720_v34 = vsel %vm6562_vm4, %v8063_v4, %v8020_v35  ;;  %v3762_v21 = vor.u32 %v3761_v28, %v3758_v37  ;;  %v3772_v1 = vor.u32 %v3771_v44, %v8070_v11  ;;  %9204 = vst [vmem:[#allocation14_spill] sm:$0xff] %v8108_v13  ;;  %v5668_v28 = vld [vmem:[%s6518_s25 + $0x54] sm:$0xe]  ;;  %v6433_v13 = vld [vmem:[%s6518_s25 + $0xcc] sm:$0xff]  }
 0x101   : > { %v3775_v25 = vshll.u32 %v8080_v16, 16  ;;  %v8112_v52 = vsel %vm6848_vm7, %v4402_v18, %v4403_v60  ;;  %v5683_v35 = vrot.slane %v5667_v24, 9  ;;  %v4409_v37 = vrot.slane %v4407_v39, 4 }
 0x102   : > { %6266 = vmatmul.mubr.msk.bf16.gmra.mxu0 %vm704_vm3, %v6427_v23  ;;  %v3783_v23 = vshll.u32 %v5600_v41, 16  ;;  %v4410_v4 = vrot.slane %v8032_v8, 5  ;;  %v6430_v41 = vld [vmem:[%s6518_s25 + $0xa8] sm:$0xff]   ;;  %v3730_v44 = vsel %vm6562_vm4, %v3725_v51, %v3729_v19  ;;  %v3782_v50 = vrot.slane %v3780_v33, 4 }
 0x103   : > { %6269 = vmatprep.mubr.msk.bf16.mxu0 %vm704_vm3, %v6428_v14  ;;  %v8092_v14 = vpop.f32.mrf.mxu1  ;;  %v3754_v18 = vsel %vm6562_vm4, %v3749_v49, %v3753_v58  ;;  %v3789_v60 = vshll.u32 %v8101_v36, 16  ;;  %v3793_v8 = vshrl.u32 %v8101_v36, 16  ;;  %v3773_v51 = vrot.slane %v3772_v1, 4  ;;  %v8130_v33 = vld [vmem:[%s6518_s25 + $0x68] sm:$0x1] }
 0x104   : > { %9202 = vst [vmem:[#allocation13_spill] sm:$0xff] %v8092_v14  ;;  %v3763_v14 = vrot.slane %v3762_v21, 4  ;;  %v3777_v17 = vrot.slane %v3775_v25, 5  ;;  %v5684_v19 = vrot.slane %v5668_v28, 9  ;;  %v9207_v49 = vsel %vm6562_vm4, %v8015_v26, %v8008_v62  ;;  %v5603_v25 = vld [vmem:[%s6518_s25 + $0x6c] sm:$0xf] }
 0x105   : > { %6232 = vmatmul.mubr.msk.bf16.gmra.mxu1 %vm704_vm3, %v9201_v7  ;;  %v3785_v7 = vrot.slane %v3783_v23, 5  ;;  %v8127_v24 = vpop.f32.mrf.mxu1  ;;  %v8151_v21 = vsel %vm6848_vm7, %v5683_v35, %v4407_v39  ;;  %v8155_v1 = vsel %vm6848_vm7, %v4409_v37, %v4410_v4  ;;  %v8158_v62 = vcombine.low %v3720_v34, %v3730_v44  ;;  %v5669_v4 = vld [vmem:[%s6518_s25 + $0x60] sm:$0xe]  ;;  %v5609_v44 = vld [vmem:[%s6518_s25 + $0x84] sm:$0xf] }
 0x106   : > { %6235 = vmatprep.mubr.msk.bf16.mxu1 %vm704_vm3, %v9203_v43  ;;  %v3744_v43 = vsel %vm6562_vm4, %v3739_v45, %v8023_v10  ;;  %9205 = vst [vmem:[#allocation15_spill] sm:$0xff] %v8127_v24  ;;  %v9208_v45 = vsel %vm6562_vm4, %v8006_v3, %v7942_v46  ;;  %v4416_v46 = vrot.slane %v4414_v59, 4  ;;  %v4417_v3 = vrot.slane %v8080_v16, 5 }
 0x107   : > { %v8145_v23 = vcombine.low %v9208_v45, %v9207_v49  ;;  %9209 = vst [vmem:[#allocation11_spill] sm:$0xff] %v8158_v62  ;;  %v3786_v26 = vor.u32 %v3785_v7, %v3782_v50  ;;  %v8165_v28 = vcombine.low %v3744_v43, %v3754_v18  ;;  %v8167_v39 = vrot.slane %v3789_v60, 5 }
 0x108   : > { %v8133_v10 = vpop.f32.mrf.mxu0  ;;  %v8169_v35 = vrot.slane %v3793_v8, 4  ;;  %v3799_v37 = vshll.u32 %v8130_v33, 16  ;;  %v9211_v34 = vcombine.low %v7766_v54, %v7781_v56  ;;  %v3768_v50 = vsel %vm6562_vm4, %v3763_v14, %v8070_v11  ;;  %v5606_v54 = vld [vmem:[%s6518_s25 + $0x78] sm:$0xf] }
 0x109   : > { %9206 = vst [vmem:[#allocation9_spill] sm:$0xff] %v8133_v10  ;;  %9210 = vst [vmem:[#allocation16_spill] sm:$0xff] %v8165_v28  ;;  %v3778_v7 = vsel %vm6562_vm4, %v3773_v51, %v3777_v17  ;;  %v8189_v43 = vsel %vm6848_vm7, %v5684_v19, %v4414_v59  ;;  %v9213_v56 = vcombine.low %v7773_v29, %v7794_v42  ;;  %v3804_v60 = vshrl.u32 %v5603_v25, 16  ;;  %v8201_v51 = vld [vmem:[%s6518_s25 + $0x7c] sm:$0xf]  ;;  %v6432_v59 = vld [vmem:[%s6518_s25 + $0xc0] sm:$0xff]  }
 0x10a   : > { %6270 = vmatmul.mubr.msk.bf16.gmra.mxu0 %vm704_vm3, %v6429_v2  ;;  %v8163_v2 = vld [vmem:[%s6518_s25 + $0x70] sm:$0xf]  ;;  %v8196_v18 = vpop.f32.mrf.mxu0  ;;  %v3807_v8 = vshll.u32 %v5603_v25, 16  ;;  %v8206_v17 = vsel %vm6848_vm7, %v4416_v46, %v4417_v3  ;;  %v8208_v29 = vrot.slane %v3786_v26, 4  ;;  %v5685_v42 = vrot.slane %v5669_v4, 9 }
 0x10b   : > { %6273 = vmatprep.mubr.msk.bf16.mxu0 %vm704_vm3, %v6430_v41  ;;  %v6431_v41 = vld [vmem:[%s6518_s25 + $0xb4] sm:$0xff]   ;;  %9214 = vst [vmem:[#allocation18_spill] sm:$0xff] %v8196_v18  ;;  %v3813_v11 = vshll.u32 %v8163_v2, 16  ;;  %v3817_v14 = vshrl.u32 %v8163_v2, 16  ;;  %v4421_v19 = vrot.slane %v8101_v36, 5  ;;  %v8211_v49 = vcombine.low %v3768_v50, %v3778_v7 }
 0x10c   : > { %v3796_v45 = vor.u32 %v8169_v35, %v8167_v39  ;;  %v8215_v25 = vrot.slane %v3799_v37, 5  ;;  %v3828_v46 = vshrl.u32 %v5606_v54, 16  ;;  %v3831_v3 = vshll.u32 %v5606_v54, 16  ;;  %v8227_v4 = vld [vmem:[%s6518_s25 + $0x88] sm:$0xf]  ;;  %v8230_v35 = vpop.f32.mrf.mxu0 }
 0x10d   : > { %6236 = vmatmul.mubr.msk.bf16.gmra.mxu1 %vm704_vm3, %v9211_v34  ;;  %v8177_v16 = vpop.f32.mrf.mxu1  ;;  %9215 = vst [vmem:[#allocation19_spill] sm:$0xff] %v8211_v49  ;;  %v4424_v34 = vrot.slane %v8130_v33, 5  ;;  %v3837_v36 = vshll.u32 %v8201_v51, 16  ;;  %v3841_v26 = vshrl.u32 %v8201_v51, 16  ;;  %9217 = vst [vmem:[#allocation21_spill] sm:$0xff] %v8230_v35  ;;  %v3806_v33 = vrot.slane %v3804_v60, 4 }
 0x10e   : > { %9212 = vst [vmem:[#allocation17_spill] sm:$0xff] %v8177_v16  ;;  %6239 = vmatprep.mubr.msk.bf16.mxu1 %vm704_vm3, %v9213_v56  ;;  %v8219_v56 = vld [vmem:[%s6518_s25 + $0x74] sm:$0x1]  ;;  %v3809_v37 = vrot.slane %v3807_v8, 5  ;;  %v8232_v50 = vrot.slane %v3813_v11, 5  ;;  %v3819_v7 = vrot.slane %v3817_v14, 4  ;;  %v9218_v54 = vcombine.low %v7785_v30, %v7801_v55  ;;  %v8260_v49 = vpop.f32.mrf.mxu0 }
 0x10f   : > { %v8222_v58 = vpop.f32.mrf.mxu1  ;;  %v4423_v16 = vrot.slane %v4421_v19, 4  ;;  %v8245_v60 = vld [vmem:[%s6518_s25 + $0x80] sm:$0x1]  ;;  %v8248_v8 = vld [vmem:[%s6518_s25 + $0x6c] sm:$0xe]  ;;  %v3852_v11 = vshrl.u32 %v5609_v44, 16 }
 0x110   : > { %9216 = vst [vmem:[#allocation20_spill] sm:$0xff] %v8222_v58  ;;  %v8241_v58 = vsel %vm6848_vm7, %v5685_v42, %v4421_v19  ;;  %v3855_v14 = vshll.u32 %v5609_v44, 16  ;;  %v3865_v24 = vshrl.u32 %v8227_v4, 16  ;;  %v3830_v19 = vrot.slane %v3828_v46, 4  ;;  %9220 = vst [vmem:[#allocation23_spill] sm:$0xff] %v8260_v49 }
 0x111   : > { %v8256_v42 = vpop.f32.mrf.mxu1  ;;  %v3833_v35 = vrot.slane %v3831_v3, 5  ;;  %v8258_v18 = vrot.slane %v3837_v36, 5  ;;  %v3843_v10 = vrot.slane %v3841_v26, 4  ;;  %v9221_v44 = vcombine.low %v7805_v15, %v7833_v32  ;;  %v8279_v32 = vld [vmem:[%s6518_s25 + $0x8c] sm:$0x1] }
 0x112   : > { %6274 = vmatmul.mubr.msk.bf16.gmra.mxu0 %vm704_vm3, %v6431_v41  ;;  %v3823_v41 = vshll.u32 %v8219_v56, 16  ;;  %9219 = vst [vmem:[#allocation22_spill] sm:$0xff] %v8256_v42  ;;  %v3810_v30 = vor.u32 %v3809_v37, %v3806_v33  ;;  %v3820_v55 = vor.u32 %v3819_v7, %v8232_v50  ;;  %v3847_v46 = vshll.u32 %v8245_v60, 16  ;;  %v5671_v33 = vld [vmem:[%s6518_s25 + $0x78] sm:$0xe] }
 0x113   : > { %6277 = vmatprep.mubr.msk.bf16.mxu0 %vm704_vm3, %v6432_v59  ;;  %v3861_v59 = vshll.u32 %v8227_v4, 16  ;;  %v8270_v3 = vrot.slane %v3796_v45, 4  ;;  %v8274_v36 = vsel %vm6848_vm7, %v4423_v16, %v4424_v34  ;;  %v5686_v26 = vrot.slane %v8248_v8, 9  ;;  %v8284_v42 = vpop.f32.mrf.mxu1  ;;  %v5612_v8 = vld [vmem:[%s6518_s25 + $0x90] sm:$0xf] }
 0x114   : > { %v4435_v15 = vrot.slane %v8201_v51, 5  ;;  %v3854_v37 = vrot.slane %v3852_v11, 4  ;;  %v3857_v7 = vrot.slane %v3855_v14, 5  ;;  %9222 = vst [vmem:[#allocation24_spill] sm:$0xff] %v8284_v42  ;;  %v3825_v45 = vrot.slane %v3823_v41, 5 }
 0x115   : > { %6240 = vmatmul.mubr.msk.bf16.gmra.mxu1 %vm704_vm3, %v9218_v54  ;;  %v4428_v54 = vrot.slane %v8163_v2, 5  ;;  %v8282_v2 = vrot.slane %v3861_v59, 5  ;;  %v4431_v49 = vrot.slane %v8219_v56, 5  ;;  %v3834_v16 = vor.u32 %v3833_v35, %v3830_v19  ;;  %v8293_v59 = vld [vmem:[%s6518_s25 + $0x94] sm:$0xf] }
 0x116   : > { %6243 = vmatprep.mubr.msk.bf16.mxu1 %vm704_vm3, %v9221_v44  ;;  %v3867_v44 = vrot.slane %v3865_v24, 4  ;;  %v3844_v34 = vor.u32 %v3843_v10, %v8258_v18  ;;  %v3811_v51 = vrot.slane %v3810_v30, 4  ;;  %v3821_v11 = vrot.slane %v3820_v55, 4 }
 0x117   : > { %v4430_v62 = vrot.slane %v4428_v54, 4  ;;  %v3849_v14 = vrot.slane %v3847_v46, 5  ;;  %v9223_v24 = vcombine.low %v7926_v61, %v7930_v40  ;;  %v5687_v56 = vrot.slane %v5671_v33, 9 }
 0x118   : > { %v4437_v35 = vrot.slane %v4435_v15, 4  ;;  %v4438_v10 = vrot.slane %v8245_v60, 5  ;;  %v3871_v41 = vshll.u32 %v8279_v32, 16  ;;  %v3868_v30 = vor.u32 %v3867_v44, %v8282_v2 }
 0x119   : > { %v3876_v55 = vshrl.u32 %v5612_v8, 16  ;;  %v3879_v46 = vshll.u32 %v5612_v8, 16  ;;  %v9225_v61 = vcombine.low %v7845_v9, %v7850_v47  ;;  %v3835_v40 = vrot.slane %v3834_v16, 4 }
 0x11a   : > { %v8289_v28 = vpop.f32.mrf.mxu0  ;;  %6278 = vmatmul.mubr.msk.bf16.gmra.mxu0 %vm704_vm3, %v6433_v13  ;;  %v3858_v13 = vor.u32 %v3857_v7, %v3854_v37  ;;  %v3845_v33 = vrot.slane %v3844_v34, 4  ;;  %v3885_v60 = vshll.u32 %v8293_v59, 16  ;;  %v3802_v37 = vsel %vm6562_vm4, %v8270_v3, %v8215_v25 }
 0x11b   : > { %6317 = vmatprep.mubr.msk.bf16.mxu0 %vm704_vm3, %v9223_v24  ;;  %v3889_v24 = vshrl.u32 %v8293_v59, 16  ;;  %v3816_v9 = vsel %vm6562_vm4, %v3811_v51, %v8232_v50  ;;  %v8325_v47 = vsel %vm6848_vm7, %v5686_v26, %v4428_v54  ;;  %v8329_v7 = vsel %vm6848_vm7, %v4430_v62, %v4431_v49  ;;  %v5672_v54 = vld [vmem:[%s6518_s25 + $0x84] sm:$0xe]  ;;  %v9264_v31 = vld [vmem:[#allocation24_spill] sm:$0xff] }
 0x11c   : > { %v8301_v19 = vpop.f32.mrf.mxu0  ;;  %v8337_v25 = vsel %vm6848_vm7, %v5687_v56, %v4435_v15  ;;  %v8341_v50 = vsel %vm6848_vm7, %v4437_v35, %v4438_v10  ;;  %v3873_v3 = vrot.slane %v3871_v41, 5  ;;  %v3859_v62 = vrot.slane %v3858_v13, 4  ;;  %v8365_v13 = vld [vmem:[%s6518_s25 + $0x98] sm:$0x1] }
 0x11d   : > { %9224 = vst [vmem:[#allocation25_spill] sm:$0xff] %v8301_v19  ;;  %v8304_v42 = vpop.f32.mrf.mxu1  ;;  %6244 = vmatmul.mubr.msk.bf16.gmra.mxu1 %vm704_vm3, %v9225_v61  ;;  %v3869_v49 = vrot.slane %v3868_v30, 4  ;;  %v3878_v16 = vrot.slane %v3876_v55, 4  ;;  %v3881_v34 = vrot.slane %v3879_v46, 5  ;;  %v3840_v15 = vsel %vm6562_vm4, %v3835_v40, %v8258_v18  ;;  %v5615_v30 = vld [vmem:[%s6518_s25 + $0x9c] sm:$0xf] }
 0x11e   : > { %v8312_v19 = vpop.f32.mrf.mxu0  ;;  %6283 = vmatprep.mubr.msk.bf16.mxu1 %vm704_vm3, %v7996_v27  ;;  %v3826_v27 = vsel %vm6562_vm4, %v3821_v11, %v3825_v45  ;;  %v3850_v45 = vsel %vm6562_vm4, %v3845_v33, %v3849_v14  ;;  %v8353_v51 = vrot.slane %v3885_v60, 5  ;;  %v3891_v11 = vrot.slane %v3889_v24, 4  ;;  %v8396_v24 = vld [vmem:[%s6518_s25 + $0xa0] sm:$0xf] }
 0x11f   : > { %v8331_v44 = vpop.f32.mrf.mxu1  ;;  %v9226_v35 = vcombine.low %v7966_v48, %v7970_v38  ;;  %v5701_v10 = vcombine.low %v8189_v43, %v8206_v17  ;;  %v5702_v41 = vcombine.low %v8241_v58, %v8274_v36  ;;  %v5688_v18 = vrot.slane %v5672_v54, 9 }
 0x120   : > { %v8344_v26 = vpop.f32.mrf.mxu0  ;;  %v4442_v14 = vrot.slane %v8227_v4, 5  ;;  %v9227_v48 = vcombine.low %v8049_v6, %v8053_v22  ;;  %v9228_v38 = vsel %vm6562_vm4, %v8208_v29, %v8167_v39  ;;  %v8381_v61 = vcombine.low %v3816_v9, %v3826_v27  ;;  %v5673_v29 = vld [vmem:[%s6518_s25 + $0x90] sm:$0xe]  ;;  %v9235_v4 = vld [vmem:[#allocation2_spill] sm:$0xff] }
 0x121   : > { %v8346_v8 = vpop.f32.mrf.mxu1  ;;  %v8379_v46 = vcombine.low %v9228_v38, %v3802_v37  ;;  %v8387_v60 = vcombine.low %v3840_v15, %v3850_v45  ;;  %v3864_v6 = vsel %vm6562_vm4, %v3859_v62, %v8282_v2  ;;  %v3874_v22 = vsel %vm6562_vm4, %v3869_v49, %v3873_v3 }
 0x122   : > { %v6115_v56 = vpop.f32.mrf.mxu0  ;;  %6318 = vmatmul.mubr.msk.bf16.vlgmr.msra.gmra.mxu0 %vm704_vm3, %v9226_v35  ;;  %v3882_v39 = vor.u32 %v3881_v34, %v3878_v16  ;;  %v3892_v9 = vor.u32 %v3891_v11, %v8353_v51  ;;  %v3895_v27 = vshll.u32 %v8365_v13, 16  ;;  %v3900_v54 = vshrl.u32 %v5615_v30, 16 }
 0x123   : > { %v8368_v55 = vpop.f32.mrf.mxu1  ;;  %6321 = vmatprep.mubr.msk.bf16.mxu0 %vm704_vm3, %v9227_v48  ;;  %v3903_v15 = vshll.u32 %v5615_v30, 16  ;;  %v8407_v3 = vsel %vm6848_vm7, %v5688_v18, %v4442_v14  ;;  %v4444_v62 = vrot.slane %v4442_v14, 4  ;;  %v4445_v49 = vrot.slane %v8279_v32, 5 }
 0x124   : > { %v1508_v33 = vpop.f32.mrf.mxu0  ;;  %v5689_v16 = vrot.slane %v5673_v29, 9  ;;  %v4449_v34 = vrot.slane %v8293_v59, 5  ;;  %v3909_v11 = vshll.u32 %v8396_v24, 16  ;;  %v3913_v35 = vshrl.u32 %v8396_v24, 16 }
 0x125   : > { %v6081_v37 = vpop.f32.mrf.mxu1  ;;  %6284 = vmatmul.mubr.msk.bf16.vlgmr.msra.gmra.mxu1 %vm704_vm3, %v7998_v57  ;;  %v8416_v48 = vcombine.low %v3864_v6, %v3874_v22  ;;  %v8418_v18 = vrot.slane %v3882_v39, 4  ;;  %v3893_v32 = vrot.slane %v3892_v9, 4  ;;  %v3897_v38 = vrot.slane %v3895_v27, 5  ;;  %v5618_v22 = vld [vmem:[%s6518_s25 + $0xa8] sm:$0xf] }
 0x126   : > { %v1092_v45 = vadd.f32 %v6081_v37, %v7894_v5  ;;  %v6116_v2 = vpop.f32.mrf.mxu0  ;;  %6287 = vmatprep.mubr.msk.bf16.mxu1 %vm704_vm3, %v8145_v23  ;;  %v3902_v29 = vrot.slane %v3900_v54, 4  ;;  %v3905_v59 = vrot.slane %v3903_v15, 5  ;;  %v4452_v6 = vrot.slane %v8365_v13, 5  ;;  %v8444_v27 = vld [vmem:[%s6518_s25 + $0xac] sm:$0xf] }
 0x127   : > { %v1083_v57 = vpop.f32.mrf.mxu1  ;;  %v3915_v9 = vrot.slane %v3913_v35, 4  ;;  %v9232_v35 = vld [vmem:[#allocation8_spill] sm:$0xff] }
 0x128   : > { %v8413_v5 = vadd.f32 %v6115_v56, %v1092_v45  ;;  %v1084_v23 = vadd.f32 %v1083_v57, %v7918_v20  ;;  %v1511_v30 = vpop.f32.mrf.mxu0  ;;  %v9229_v45 = vcombine.low %v8086_v63, %v8112_v52  ;;  %v8429_v20 = vsel %vm6848_vm7, %v4444_v62, %v4445_v49  ;;  %v5674_v62 = vld [vmem:[%s6518_s25 + $0x9c] sm:$0xe] }
 0x129   : > { %v6082_v14 = vpop.f32.mrf.mxu1  ;;  %v4451_v63 = vrot.slane %v4449_v34, 4  ;;  %v8441_v52 = vrot.slane %v3909_v11, 5  ;;  %v4456_v49 = vrot.slane %v8396_v24, 5  ;;  %v3933_v24 = vshll.u32 %v8444_v27, 16 }
 0x12a   : > { %v8420_v37 = vadd.f32 %v1508_v33, %v1084_v23  ;;  %v1095_v40 = vadd.f32 %v6082_v14, %v7937_v53  ;;  %v6119_v56 = vpop.f32.mrf.mxu0  ;;  %6322 = vmatmul.mubr.msk.bf16.gmra.mxu0 %vm704_vm3, %v9229_v45  ;;  %v9230_v33 = vcombine.low %v8151_v21, %v8155_v1  ;;  %v8439_v53 = vsel %vm6848_vm7, %v5689_v16, %v4449_v34  ;;  %v5617_v1 = vld [vmem:[%s6518_s25 + $0xa4] sm:$0x1]  ;;  %v9231_v16 = vld [vmem:[#allocation11_spill] sm:$0xff] }
 0x12b   : > { %v1086_v39 = vpop.f32.mrf.mxu1  ;;  %v3888_v21 = vsel %vm6562_vm4, %v8418_v18, %v8353_v51  ;;  %v3924_v34 = vshrl.u32 %v5618_v22, 16  ;;  %v9233_v51 = vld [vmem:[#allocation16_spill] sm:$0xff]  ;;  %v3937_v18 = vshrl.u32 %v8444_v27, 16 }
 0x12c   : > { %6325 = vmatprep.mubr.msk.bf16.mxu0 %vm704_vm3, %v9230_v33  ;;  %v8446_v54 = vadd.f32 %v6116_v2, %v1095_v40  ;;  %v1087_v13 = vadd.f32 %v1086_v39, %v7982_v12  ;;  %v1524_v15 = vpop.f32.mrf.mxu0  ;;  %v3898_v40 = vsel %vm6562_vm4, %v3893_v32, %v3897_v38  ;;  %v3906_v2 = vor.u32 %v3905_v59, %v3902_v29  ;;  %v9234_v59 = vld [vmem:[#allocation12_spill] sm:$0xff] }
 0x12d   : > { %v6085_v57 = vpop.f32.mrf.mxu1  ;;  %6288 = vmatmul.mubr.msk.bf16.gmra.mxu1 %vm704_vm3, %v9231_v16  ;;  %v3927_v12 = vshll.u32 %v5618_v22, 16  ;;  %v8469_v39 = vsel %vm6848_vm7, %v4451_v63, %v4452_v6  ;;  %v3916_v32 = vor.u32 %v3915_v9, %v8441_v52  ;;  %v3919_v38 = vshll.u32 %v5617_v1, 16 }
 0x12e   : > { %v8460_v11 = vadd.f32 %v1511_v30, %v1087_v13  ;;  %v1108_v23 = vadd.f32 %v6085_v57, %v9232_v35  ;;  %v6120_v14 = vpop.f32.mrf.mxu0  ;;  %6291 = vmatprep.mubr.msk.bf16.mxu1 %vm704_vm3, %v9233_v51  ;;  %v5690_v30 = vrot.slane %v5674_v62, 9  ;;  %v4458_v13 = vrot.slane %v4456_v49, 4 }
 0x12f   : > { %v1099_v45 = vpop.f32.mrf.mxu1  ;;  %v4459_v57 = vrot.slane %v5617_v1, 5  ;;  %v8477_v51 = vrot.slane %v3906_v2, 4  ;;  %v3926_v6 = vrot.slane %v3924_v34, 4  ;;  %v3929_v63 = vrot.slane %v3927_v12, 5  ;;  %v8487_v1 = vld [vmem:[%s6518_s25 + $0xb0] sm:$0x1] }
 0x130   : > { %v8472_v29 = vadd.f32 %v6119_v56, %v1108_v23  ;;  %v1100_v22 = vadd.f32 %v1099_v45, %v9234_v59  ;;  %v1527_v33 = vpop.f32.mrf.mxu0  ;;  %v8489_v23 = vrot.slane %v3933_v24, 5  ;;  %v3939_v2 = vrot.slane %v3937_v18, 4  ;;  %v9236_v12 = vld [vmem:[#allocation14_spill] sm:$0xff] }
 0x131   : > { %v6086_v16 = vpop.f32.mrf.mxu1  ;;  %v8499_v43 = vrot.slane %v3916_v32, 4  ;;  %v8501_v17 = vrot.slane %v3919_v38, 5  ;;  %v8509_v58 = vsel %vm6848_vm7, %v5690_v30, %v4456_v49  ;;  %v8513_v36 = vsel %vm6848_vm7, %v4458_v13, %v4459_v57  ;;  %v8525_v30 = vld [vmem:[%s6518_s25 + $0xb8] sm:$0xf] }
 0x132   : > { %v8479_v9 = vadd.f32 %v1524_v15, %v1100_v22  ;;  %v1111_v62 = vadd.f32 %v6086_v16, %v9235_v4  ;;  %v6123_v56 = vpop.f32.mrf.mxu0  ;;  %6326 = vmatmul.mubr.msk.bf16.gmra.mxu0 %vm704_vm3, %v5701_v10  ;;  %v8495_v15 = vcombine.low %v3888_v21, %v3898_v40  ;;  %v5675_v10 = vld [vmem:[%s6518_s25 + $0xa8] sm:$0xe]  ;;  %v3930_v32 = vor.u32 %v3929_v63, %v3926_v6  ;;  %v9238_v22 = vld [vmem:[#allocation9_spill] sm:$0xff] }
 0x133   : > { %v1102_v45 = vpop.f32.mrf.mxu1  ;;  %6329 = vmatprep.mubr.msk.bf16.mxu0 %vm704_vm3, %v5702_v41  ;;  %v5621_v41 = vld [vmem:[%s6518_s25 + $0xb4] sm:$0xf]  ;;  %v9237_v40 = vld [vmem:[#allocation19_spill] sm:$0xff]  ;;  %v3943_v38 = vshll.u32 %v8487_v1, 16  ;;  %v4463_v49 = vrot.slane %v8444_v27, 5  ;;  %v3940_v16 = vor.u32 %v3939_v2, %v8489_v23  ;;  %v3922_v27 = vsel %vm6562_vm4, %v8499_v43, %v8501_v17 }
 0x134   : > { %v8504_v34 = vadd.f32 %v6120_v14, %v1111_v62  ;;  %v1103_v24 = vadd.f32 %v1102_v45, %v9236_v12  ;;  %v1540_v18 = vpop.f32.mrf.mxu0  ;;  %v5691_v62 = vrot.slane %v5675_v10, 9  ;;  %v3948_v6 = vshrl.u32 %v5621_v41, 16 }
 0x135   : > { %v6089_v21 = vpop.f32.mrf.mxu1  ;;  %6292 = vmatmul.mubr.msk.bf16.gmra.mxu1 %vm704_vm3, %v9237_v40  ;;  %v3951_v63 = vshll.u32 %v5621_v41, 16  ;;  %v3957_v2 = vshll.u32 %v8525_v30, 16  ;;  %v3961_v10 = vshrl.u32 %v8525_v30, 16  ;;  %v5624_v40 = vld [vmem:[%s6518_s25 + $0xc0] sm:$0xf]  ;;  %v3931_v4 = vrot.slane %v3930_v32, 4 }
 0x136   : > { %v8527_v59 = vadd.f32 %v1527_v33, %v1103_v24  ;;  %v1124_v13 = vadd.f32 %v6089_v21, %v9238_v22  ;;  %v6124_v57 = vpop.f32.mrf.mxu0  ;;  %6295 = vmatprep.mubr.msk.bf16.mxu1 %vm704_vm3, %v8379_v46  ;;  %v9240_v24 = vld [vmem:[#allocation18_spill] sm:$0xff]  ;;  %v3945_v43 = vrot.slane %v3943_v38, 5  ;;  %v4465_v17 = vrot.slane %v4463_v49, 4 }
 0x137   : > { %v1115_v45 = vpop.f32.mrf.mxu1  ;;  %v4466_v33 = vrot.slane %v8487_v1, 5  ;;  %v8555_v14 = vsel %vm6848_vm7, %v5691_v62, %v4463_v49  ;;  %v8558_v32 = vld [vmem:[%s6518_s25 + $0xc4] sm:$0xf]  ;;  %v9244_v1 = vcombine.low %v8337_v25, %v8341_v50  ;;  %v8570_v62 = vrot.slane %v3957_v2, 5 }
 0x138   : > { %v8539_v12 = vadd.f32 %v6123_v56, %v1124_v13  ;;  %v1116_v21 = vadd.f32 %v1115_v45, %v9240_v24  ;;  %v1543_v46 = vpop.f32.mrf.mxu0  ;;  %v9242_v56 = vld [vmem:[#allocation21_spill] sm:$0xff]  ;;  %v9243_v45 = vcombine.low %v8325_v47, %v8329_v7  ;;  %v3941_v24 = vrot.slane %v3940_v16, 4  ;;  %v9245_v16 = vld [vmem:[#allocation23_spill] sm:$0xff] }
 0x139   : > { %v6090_v22 = vpop.f32.mrf.mxu1  ;;  %v3972_v47 = vshrl.u32 %v5624_v40, 16  ;;  %v3975_v7 = vshll.u32 %v5624_v40, 16  ;;  %v3936_v25 = vsel %vm6562_vm4, %v3931_v4, %v8489_v23  ;;  %v8579_v50 = vsel %vm6848_vm7, %v4465_v17, %v4466_v33  ;;  %v5676_v40 = vld [vmem:[%s6518_s25 + $0xb4] sm:$0xe] }
 0x13a   : > { %9239 = vst [vmem:[#allocation11_spill] sm:$0xff] %v8539_v12  ;;  %v8546_v35 = vadd.f32 %v1540_v18, %v1116_v21  ;;  %v1127_v41 = vadd.f32 %v6090_v22, %v9242_v56  ;;  %v6127_v13 = vpop.f32.mrf.mxu0  ;;  %6330 = vmatmul.mubr.msk.bf16.gmra.mxu0 %vm704_vm3, %v9243_v45  ;;  %v8565_v18 = vld [vmem:[%s6518_s25 + $0xbc] sm:$0x1]  ;;  %v3950_v21 = vrot.slane %v3948_v6, 4  ;;  %v3953_v22 = vrot.slane %v3951_v63, 5 }
 0x13b   : > { %v1118_v38 = vpop.f32.mrf.mxu1  ;;  %6333 = vmatprep.mubr.msk.bf16.mxu0 %vm704_vm3, %v9244_v1  ;;  %v3985_v6 = vshrl.u32 %v8558_v32, 16  ;;  %v3967_v23 = vshll.u32 %v8565_v18, 16  ;;  %v4470_v17 = vrot.slane %v8525_v30, 5  ;;  %v9246_v1 = vld [vmem:[#allocation25_spill] sm:$0xff] }
 0x13c   : > { %9241 = vst [vmem:[#allocation8_spill] sm:$0xff] %v8546_v35  ;;  %v8567_v56 = vadd.f32 %v6124_v57, %v1127_v41  ;;  %v1119_v45 = vadd.f32 %v1118_v38, %v9245_v16  ;;  %v1556_v49 = vpop.f32.mrf.mxu0  ;;  %v3963_v35 = vrot.slane %v3961_v10, 4  ;;  %v3981_v57 = vshll.u32 %v8558_v32, 16 }
 0x13d   : > { %v6093_v12 = vpop.f32.mrf.mxu1  ;;  %6296 = vmatmul.mubr.msk.bf16.gmra.mxu1 %vm704_vm3, %v8381_v61  ;;  %v3946_v61 = vsel %vm6562_vm4, %v3941_v24, %v3945_v43  ;;  %v3954_v33 = vor.u32 %v3953_v22, %v3950_v21  ;;  %v3974_v41 = vrot.slane %v3972_v47, 4  ;;  %v3977_v38 = vrot.slane %v3975_v7, 5 }
 0x13e   : > { %v8583_v63 = vadd.f32 %v1543_v46, %v1119_v45  ;;  %v1140_v2 = vadd.f32 %v6093_v12, %v8289_v28  ;;  %v6128_v10 = vpop.f32.mrf.mxu0  ;;  %6299 = vmatprep.mubr.msk.bf16.mxu1 %vm704_vm3, %v8387_v60  ;;  %v9247_v60 = vsel %vm6562_vm4, %v8477_v51, %v8441_v52  ;;  %v3964_v24 = vor.u32 %v3963_v35, %v8570_v62 }
 0x13f   : > { %v1131_v4 = vpop.f32.mrf.mxu1  ;;  %v8601_v43 = vcombine.low %v9247_v60, %v3922_v27  ;;  %v8604_v30 = vcombine.low %v3936_v25, %v3946_v61  ;;  %v8608_v22 = vrot.slane %v3981_v57, 5  ;;  %v3987_v47 = vrot.slane %v3985_v6, 4  ;;  %v5626_v27 = vld [vmem:[%s6518_s25 + $0xc8] sm:$0x1] }
 0x140   : > { %v8593_v46 = vadd.f32 %v6127_v13, %v1140_v2  ;;  %v1132_v28 = vadd.f32 %v1131_v4, %v9246_v1  ;;  %v1559_v12 = vpop.f32.mrf.mxu0  ;;  %v5708_v13 = vcombine.low %v8555_v14, %v8579_v50  ;;  %v9248_v52 = vcombine.low %v8407_v3, %v8429_v20  ;;  %v5627_v14 = vld [vmem:[%s6518_s25 + $0xcc] sm:$0xf]  ;;  %v8629_v20 = vld [vmem:[%s6518_s25 + $0xd0] sm:$0xf]  ;;  %v5677_v4 = vld [vmem:[%s6518_s25 + $0xc0] sm:$0xe] }
 0x141   : > { %v6094_v21 = vpop.f32.mrf.mxu1  ;;  %v8617_v35 = vrot.slane %v3967_v23, 5  ;;  %v5692_v51 = vrot.slane %v5676_v40, 9  ;;  %v9249_v50 = vcombine.low %v8439_v53, %v8469_v39  ;;  %v4473_v57 = vrot.slane %v8565_v18, 5 }
 0x142   : > { %v8610_v7 = vadd.f32 %v1556_v49, %v1132_v28  ;;  %v1143_v16 = vadd.f32 %v6094_v21, %v8312_v19  ;;  %v6131_v45 = vpop.f32.mrf.mxu0  ;;  %6334 = vmatmul.mubr.msk.bf16.gmra.mxu0 %vm704_vm3, %v9248_v52  ;;  %v8625_v49 = vrot.slane %v3954_v33, 4  ;;  %v4472_v19 = vrot.slane %v4470_v17, 4 }
 0x143   : > { %v1134_v25 = vpop.f32.mrf.mxu1  ;;  %6337 = vmatprep.mubr.msk.bf16.mxu0 %vm704_vm3, %v9249_v50  ;;  %v3978_v3 = vor.u32 %v3977_v38, %v3974_v41  ;;  %v8634_v23 = vrot.slane %v3964_v24, 4  ;;  %v4477_v53 = vrot.slane %v8558_v32, 5  ;;  %v3988_v33 = vor.u32 %v3987_v47, %v8608_v22 }
 0x144   : > { %v8631_v6 = vadd.f32 %v6128_v10, %v1143_v16  ;;  %v1135_v2 = vadd.f32 %v1134_v25, %v8344_v26  ;;  %v1572_v61 = vpop.f32.mrf.mxu0  ;;  %v3991_v18 = vshll.u32 %v5626_v27, 16  ;;  %v3996_v40 = vshrl.u32 %v5627_v14, 16  ;;  %v9252_v10 = vld [vmem:[#allocation4_spill] sm:$0xff]  ;;  %v9253_v16 = vld [vmem:[#allocation3_spill] sm:$0xff] }
 0x145   : > { %v6097_v39 = vpop.f32.mrf.mxu1  ;;  %6300 = vmatmul.mubr.msk.bf16.gmra.mxu1 %vm704_vm3, %v8416_v48  ;;  %v3999_v41 = vshll.u32 %v5627_v14, 16  ;;  %v4005_v28 = vshll.u32 %v8629_v20, 16  ;;  %v4009_v32 = vshrl.u32 %v8629_v20, 16  ;;  %v4471_v48 = vsel %vm6848_vm7, %v5692_v51, %v4470_v17  ;;  %v9254_v17 = vld [vmem:[#allocation6_spill] sm:$0xff] }
 0x146   : > { %9250 = vst [vmem:[#allocation16_spill] sm:$0xff] %v8631_v6  ;;  %v8641_v38 = vadd.f32 %v1559_v12, %v1135_v2  ;;  %v1156_v1 = vadd.f32 %v6097_v39, %v9252_v10  ;;  %v6132_v26 = vpop.f32.mrf.mxu0  ;;  %6303 = vmatprep.mubr.msk.bf16.mxu1 %vm704_vm3, %v8495_v15  ;;  %v4474_v24 = vsel %vm6848_vm7, %v4472_v19, %v4473_v57  ;;  %v3979_v21 = vrot.slane %v3978_v3, 4 }
 0x147   : > { %v1147_v60 = vpop.f32.mrf.mxu1  ;;  %v5693_v12 = vrot.slane %v5677_v4, 9  ;;  %v4479_v25 = vrot.slane %v4477_v53, 4  ;;  %v4480_v15 = vrot.slane %v5626_v27, 5  ;;  %v3989_v2 = vrot.slane %v3988_v33, 4  ;;  %v5629_v33 = vld [vmem:[%s6518_s25 + $0xd4] sm:$0x1] }
 0x148   : > { %9251 = vst [vmem:[#allocation12_spill] sm:$0xff] %v8641_v38  ;;  %v8652_v47 = vadd.f32 %v6131_v45, %v1156_v1  ;;  %v1148_v52 = vadd.f32 %v1147_v60, %v9253_v16  ;;  %v1575_v14 = vpop.f32.mrf.mxu0  ;;  %v3993_v39 = vrot.slane %v3991_v18, 5  ;;  %v3998_v10 = vrot.slane %v3996_v40, 4  ;;  %v9256_v18 = vld [vmem:[#allocation5_spill] sm:$0xff] }
 0x149   : > { %v6098_v50 = vpop.f32.mrf.mxu1  ;;  %v4001_v38 = vrot.slane %v3999_v41, 5  ;;  %v9255_v45 = vcombine.low %v8509_v58, %v8513_v36  ;;  %v8662_v57 = vrot.slane %v4005_v28, 5  ;;  %v4011_v27 = vrot.slane %v4009_v32, 4 }
 0x14a   : > { %v8655_v6 = vadd.f32 %v1572_v61, %v1148_v52  ;;  %v1159_v51 = vadd.f32 %v6098_v50, %v9254_v17  ;;  %v6135_v19 = vpop.f32.mrf.mxu0  ;;  %v3960_v61 = vsel %vm6562_vm4, %v8625_v49, %v8570_v62  ;;  %v3970_v4 = vsel %vm6562_vm4, %v8634_v23, %v8617_v35  ;;  %v5678_v62 = vld [vmem:[%s6518_s25 + $0xcc] sm:$0xe] }
 0x14b   : > { %6338 = vmatmul.mubr.msk.bf16.gmra.mxu0 %vm704_vm3, %v9255_v45  ;;  %v1150_v3 = vpop.f32.mrf.mxu1  ;;  %v4484_v58 = vrot.slane %v8629_v20, 5  ;;  %v4481_v1 = vsel %vm6848_vm7, %v4479_v25, %v4480_v15  ;;  %v5709_v35 = vcombine.low %v4471_v48, %v4474_v24  ;;  %v3984_v20 = vsel %vm6562_vm4, %v3979_v21, %v8608_v22  ;;  %v9258_v25 = vld [vmem:[#allocation10_spill] sm:$0xff] }
 0x14c   : > { %6341 = vmatprep.mubr.msk.bf16.mxu0 %vm704_vm3, %v5708_v13  ;;  %v8675_v36 = vadd.f32 %v6132_v26, %v1159_v51  ;;  %v1151_v40 = vadd.f32 %v1150_v3, %v9256_v18  ;;  %v1588_v41 = vpop.f32.mrf.mxu0  ;;  %v4478_v13 = vsel %vm6848_vm7, %v5693_v12, %v4477_v53  ;;  %v3994_v23 = vsel %vm6562_vm4, %v3989_v2, %v3993_v39  ;;  %v9257_v53 = vld [vmem:[#allocation7_spill] sm:$0xff] }
 0x14d   : > { %v6101_v49 = vpop.f32.mrf.mxu1  ;;  %6304 = vmatmul.mubr.msk.bf16.gmra.mxu1 %vm704_vm3, %v8601_v43  ;;  %v4002_v26 = vor.u32 %v4001_v38, %v3998_v10  ;;  %v4012_v12 = vor.u32 %v4011_v27, %v8662_v57  ;;  %v4015_v43 = vshll.u32 %v5629_v33, 16  ;;  %v5710_v24 = vcombine.low %v4478_v13, %v4481_v1 }
 0x14e   : > { %v8690_v28 = vadd.f32 %v1575_v14, %v1151_v40  ;;  %v1172_v32 = vadd.f32 %v6101_v49, %v9257_v53  ;;  %v6136_v60 = vpop.f32.mrf.mxu0  ;;  %6307 = vmatprep.mubr.msk.bf16.mxu1 %vm704_vm3, %v8604_v30  ;;  %v5694_v16 = vrot.slane %v5678_v62, 9  ;;  %v4486_v52 = vrot.slane %v4484_v58, 4  ;;  %v9259_v30 = vld [vmem:[#allocation13_spill] sm:$0xff] }
 0x14f   : > { %v1163_v48 = vpop.f32.mrf.mxu1  ;;  %v4487_v22 = vrot.slane %v5629_v33, 5  ;;  %v5644_v50 = vcombine.low %v3960_v61, %v3970_v4  ;;  %v5645_v2 = vcombine.low %v3984_v20, %v3994_v23  ;;  %v4003_v39 = vrot.slane %v4002_v26, 4  ;;  %v9260_v33 = vld [vmem:[#allocation15_spill] sm:$0xff]  ;;  %v9261_v62 = vld [vmem:[#allocation17_spill] sm:$0xff]  ;;  %v9262_v26 = vld [vmem:[#allocation20_spill] sm:$0xff] }
 0x150   : > { %v8696_v21 = vadd.f32 %v6135_v19, %v1172_v32  ;;  %v1164_v38 = vadd.f32 %v1163_v48, %v9258_v25  ;;  %v1591_v14 = vpop.f32.mrf.mxu0  ;;  %v4013_v45 = vrot.slane %v4012_v12, 4  ;;  %v4017_v27 = vrot.slane %v4015_v43, 5  ;;  %v9263_v43 = vld [vmem:[#allocation22_spill] sm:$0xff] }
 0x151   : > { %v6102_v15 = vpop.f32.mrf.mxu1  ;;  %v4485_v19 = vsel %vm6848_vm7, %v5694_v16, %v4484_v58  ;;  %v4488_v61 = vsel %vm6848_vm7, %v4486_v52, %v4487_v22  ;;  %v4008_v13 = vsel %vm6562_vm4, %v4003_v39, %v8662_v57 }
 0x152   : > { %v8699_v10 = vadd.f32 %v1588_v41, %v1164_v38  ;;  %v1175_v17 = vadd.f32 %v6102_v15, %v9259_v30  ;;  %v6139_v51 = vpop.f32.mrf.mxu0  ;;  %v4018_v0 = vsel %vm6562_vm4, %v4013_v45, %v4017_v27 }
 0x153   : > { %6342 = vmatmul.mubr.msk.bf16.gmra.mxu0 %vm704_vm3, %v5709_v35  ;;  %v1166_v3 = vpop.f32.mrf.mxu1  ;;  %v5711_v35 = vcombine.low %v4485_v19, %v4488_v61  ;;  %v5646_v12 = vcombine.low %v4008_v13, %v4018_v0 }
 0x154   : > { %6345 = vmatprep.mubr.msk.bf16.mxu0 %vm704_vm3, %v5710_v24  ;;  %v8708_v4 = vadd.f32 %v6136_v60, %v1175_v17  ;;  %v1167_v18 = vadd.f32 %v1166_v3, %v9260_v33  ;;  %v1604_v40 = vpop.f32.mrf.mxu0 }
 0x155   : > { %v6105_v41 = vpop.f32.mrf.mxu1  ;;  %6308 = vmatmul.mubr.msk.bf16.gmra.mxu1 %vm704_vm3, %v5644_v50 }
 0x156   : > { %v8715_v1 = vadd.f32 %v1591_v14, %v1167_v18  ;;  %v1188_v49 = vadd.f32 %v6105_v41, %v9261_v62  ;;  %v6140_v58 = vpop.f32.mrf.mxu0  ;;  %6311 = vmatprep.mubr.msk.bf16.mxu1 %vm704_vm3, %v5645_v2 }
 0x157   : > { %v1179_v20 = vpop.f32.mrf.mxu1 }
 0x158   : > { %v8721_v23 = vadd.f32 %v6139_v51, %v1188_v49  ;;  %v1180_v53 = vadd.f32 %v1179_v20, %v9262_v26  ;;  %v1607_v32 = vpop.f32.mrf.mxu0 }
 0x159   : > { %v6106_v60 = vpop.f32.mrf.mxu1 }
 0x15a   : > { %v8724_v57 = vadd.f32 %v1604_v40, %v1180_v53  ;;  %v1191_v48 = vadd.f32 %v6106_v60, %v9263_v43  ;;  %v6143_v24 = vpop.f32.mrf.mxu0 }
 0x15b   : > { %6346 = vmatmul.mubr.msk.bf16.gmra.mxu0 %vm704_vm3, %v5711_v35  ;;  %v1182_v16 = vpop.f32.mrf.mxu1 }
 0x15c   : > { %v8728_v52 = vadd.f32 %v6140_v58, %v1191_v48  ;;  %v1183_v22 = vadd.f32 %v1182_v16, %v9264_v31  ;;  %v1620_v25 = vpop.f32.mrf.mxu0 }
 0x15d   : > { %v6109_v38 = vpop.f32.mrf.mxu1  ;;  %6312 = vmatmul.mubr.msk.bf16.gmra.mxu1 %vm704_vm3, %v5646_v12 }
 0x15e   : > { %v8732_v14 = vadd.f32 %v1607_v32, %v1183_v22  ;;  %v1204_v15 = vadd.f32 %v6109_v38, %v8304_v42  ;;  %v6144_v50 = vpop.f32.mrf.mxu0 }
 0x15f   : > { %v1195_v2 = vpop.f32.mrf.mxu1 }
 0x160   : > { %v8735_v39 = vadd.f32 %v6143_v24, %v1204_v15  ;;  %v1196_v30 = vadd.f32 %v1195_v2, %v8331_v44  ;;  %v1623_v17 = vpop.f32.mrf.mxu0 }
 0x161   : > { %v6110_v51 = vpop.f32.mrf.mxu1 }
 0x162   : > { %v8738_v45 = vadd.f32 %v1620_v25, %v1196_v30  ;;  %v1207_v27 = vadd.f32 %v6110_v51, %v8346_v8  ;;  %v6183_v3 = vpop.f32.mrf.mxu0  ;;  %v9265_v30 = vld [vmem:[#allocation11_spill] sm:$0xff] }
 0x163   : > { %v1198_v19 = vpop.f32.mrf.mxu1 }
 0x164   : > { %v8741_v61 = vadd.f32 %v6144_v50, %v1207_v27  ;;  %v1199_v33 = vadd.f32 %v1198_v19, %v8368_v55  ;;  %v2596_v18 = vpop.f32.mrf.mxu0 }
 0x165   : > { %v6149_v42 = vpop.f32.mrf.mxu1 }
 0x166   : > { %v8744_v40 = vadd.f32 %v1623_v17, %v1199_v33  ;;  %v1999_v41 = vadd.f32 %v6149_v42, %v8413_v5  ;;  %v6184_v13 = vpop.f32.mrf.mxu0 }
 0x167   : > { %v1870_v44 = vpop.f32.mrf.mxu1 }
 0x168   : > { %v8747_v62 = vadd.f32 %v6183_v3, %v1999_v41  ;;  %v1997_v49 = vadd.f32 %v1870_v44, %v8420_v37  ;;  %v2599_v58 = vpop.f32.mrf.mxu0  ;;  %v9266_v3 = vld [vmem:[#allocation8_spill] sm:$0xff] }
 0x169   : > { %v6150_v8 = vpop.f32.mrf.mxu1 }
 0x16a   : > { %v8750_v0 = vadd.f32 %v2596_v18, %v1997_v49  ;;  %v2000_v35 = vadd.f32 %v6150_v8, %v8446_v54  ;;  %v6187_v20 = vpop.f32.mrf.mxu0 }
 0x16b   : > { %v1873_v55 = vpop.f32.mrf.mxu1 }
 0x16c   : > { %v8753_v26 = vadd.f32 %v6184_v13, %v2000_v35  ;;  %v1998_v53 = vadd.f32 %v1873_v55, %v8460_v11  ;;  %v2612_v32 = vpop.f32.mrf.mxu0 }
 0x16d   : > { %v6153_v5 = vpop.f32.mrf.mxu1 }
 0x16e   : > { %v8756_v60 = vadd.f32 %v2599_v58, %v1998_v53  ;;  %v2003_v12 = vadd.f32 %v6153_v5, %v8472_v29  ;;  %v6188_v43 = vpop.f32.mrf.mxu0 }
 0x16f   : > { %v1886_v37 = vpop.f32.mrf.mxu1 }
 0x170   : > { %v8759_v48 = vadd.f32 %v6187_v20, %v2003_v12  ;;  %v2001_v24 = vadd.f32 %v1886_v37, %v8479_v9  ;;  %v2615_v16 = vpop.f32.mrf.mxu0 }
 0x171   : > { %v6154_v54 = vpop.f32.mrf.mxu1 }
 0x172   : > { %v8762_v31 = vadd.f32 %v2612_v32, %v2001_v24  ;;  %v2004_v22 = vadd.f32 %v6154_v54, %v8504_v34  ;;  %v6191_v25 = vpop.f32.mrf.mxu0  ;;  %v9268_v54 = vld [vmem:[#allocation12_spill] sm:$0xff] }
 0x173   : > { %v1889_v11 = vpop.f32.mrf.mxu1 }
 0x174   : > { %v8765_v38 = vadd.f32 %v6188_v43, %v2004_v22  ;;  %v2002_v15 = vadd.f32 %v1889_v11, %v8527_v59  ;;  %v2628_v50 = vpop.f32.mrf.mxu0  ;;  %v9267_v43 = vld [vmem:[#allocation16_spill] sm:$0xff] }
 0x175   : > { %v6157_v29 = vpop.f32.mrf.mxu1 }
 0x176   : > { %v8768_v2 = vadd.f32 %v2615_v16, %v2002_v15  ;;  %v2007_v17 = vadd.f32 %v6157_v29, %v9265_v30  ;;  %v6192_v51 = vpop.f32.mrf.mxu0 }
 0x177   : > { %v1902_v9 = vpop.f32.mrf.mxu1 }
 0x178   : > { %v8771_v27 = vadd.f32 %v6191_v25, %v2007_v17  ;;  %v2005_v19 = vadd.f32 %v1902_v9, %v9266_v3  ;;  %v2631_v33 = vpop.f32.mrf.mxu0 }
 0x179   : > { %v6158_v34 = vpop.f32.mrf.mxu1 }
 0x17a   : > { %v8774_v18 = vadd.f32 %v2628_v50, %v2005_v19  ;;  %v2008_v42 = vadd.f32 %v6158_v34, %v8567_v56  ;;  %v6195_v41 = vpop.f32.mrf.mxu0 }
 0x17b   : > { %v1905_v59 = vpop.f32.mrf.mxu1 }
 0x17c   : > { %v8777_v13 = vadd.f32 %v6192_v51, %v2008_v42  ;;  %v2006_v44 = vadd.f32 %v1905_v59, %v8583_v63  ;;  %v2644_v49 = vpop.f32.mrf.mxu0 }
 0x17d   : > { %v6161_v58 = vpop.f32.mrf.mxu1 }
 0x17e   : > { %v8780_v8 = vadd.f32 %v2631_v33, %v2006_v44  ;;  %v2011_v35 = vadd.f32 %v6161_v58, %v8593_v46  ;;  %v6196_v20 = vpop.f32.mrf.mxu0 }
 0x17f   : > { %v1918_v55 = vpop.f32.mrf.mxu1 }
 0x180   : > { %v8783_v53 = vadd.f32 %v6195_v41, %v2011_v35  ;;  %v2009_v32 = vadd.f32 %v1918_v55, %v8610_v7  ;;  %v2647_v5 = vpop.f32.mrf.mxu0 }
 0x181   : > { %v6162_v56 = vpop.f32.mrf.mxu1 }
 0x182   : > { %v8786_v12 = vadd.f32 %v2644_v49, %v2009_v32  ;;  %v2012_v37 = vadd.f32 %v6162_v56, %v9267_v43  ;;  %v6199_v24 = vpop.f32.mrf.mxu0 }
 0x183   : > { %v1921_v63 = vpop.f32.mrf.mxu1 }
 0x184   : > { %v8789_v16 = vadd.f32 %v6196_v20, %v2012_v37  ;;  %v2010_v22 = vadd.f32 %v1921_v63, %v9268_v54  ;;  %v2660_v25 = vpop.f32.mrf.mxu0 }
 0x185   : > { %v6165_v46 = vpop.f32.mrf.mxu1 }
 0x186   : > { %v8792_v11 = vadd.f32 %v2647_v5, %v2010_v22  ;;  %v2015_v15 = vadd.f32 %v6165_v46, %v8652_v47  ;;  %v6200_v50 = vpop.f32.mrf.mxu0 }
 0x187   : > { %v1934_v7 = vpop.f32.mrf.mxu1 }
 0x188   : > { %v8795_v29 = vadd.f32 %v6199_v24, %v2015_v15  ;;  %v2013_v30 = vadd.f32 %v1934_v7, %v8655_v6  ;;  %v2663_v17 = vpop.f32.mrf.mxu0 }
 0x189   : > { %v6166_v51 = vpop.f32.mrf.mxu1 }
 0x18a   : > { %v8798_v9 = vadd.f32 %v2660_v25, %v2013_v30  ;;  %v2016_v3 = vadd.f32 %v6166_v51, %v8675_v36  ;;  %v6203_v19 = vpop.f32.mrf.mxu0 }
 0x18b   : > { %v1937_v33 = vpop.f32.mrf.mxu1 }
 0x18c   : > { %v8801_v34 = vadd.f32 %v6200_v50, %v2016_v3  ;;  %v2014_v42 = vadd.f32 %v1937_v33, %v8690_v28  ;;  %v2676_v41 = vpop.f32.mrf.mxu0 }
 0x18d   : > { %v6169_v47 = vpop.f32.mrf.mxu1 }
 0x18e   : > { %v8804_v59 = vadd.f32 %v2663_v17, %v2014_v42  ;;  %v2019_v44 = vadd.f32 %v6169_v47, %v8696_v21  ;;  %v6204_v49 = vpop.f32.mrf.mxu0 }
 0x18f   : > { %v1950_v6 = vpop.f32.mrf.mxu1 }
 0x190   : > { %v8807_v58 = vadd.f32 %v6203_v19, %v2019_v44  ;;  %v2017_v35 = vadd.f32 %v1950_v6, %v8699_v10  ;;  %v2679_v20 = vpop.f32.mrf.mxu0 }
 0x191   : > { %v6170_v36 = vpop.f32.mrf.mxu1 }
 0x192   : > { %v8810_v55 = vadd.f32 %v2676_v41, %v2017_v35  ;;  %v2020_v32 = vadd.f32 %v6170_v36, %v8708_v4  ;;  %v6207_v5 = vpop.f32.mrf.mxu0 }
 0x193   : > { %v1953_v28 = vpop.f32.mrf.mxu1 }
 0x194   : > { %9269 = vst [vmem:[#allocation2_spill] sm:$0xff] %v8810_v55  ;;  %v8813_v56 = vadd.f32 %v6204_v49, %v2020_v32  ;;  %v2018_v43 = vadd.f32 %v1953_v28, %v8715_v1  ;;  %v2692_v37 = vpop.f32.mrf.mxu0 }
 0x195   : > { %v6173_v21 = vpop.f32.mrf.mxu1 }
 0x196   : > { %9270 = vst [vmem:[#allocation14_spill] sm:$0xff] %v8813_v56  ;;  %v8816_v24 = vadd.f32 %v2679_v20, %v2018_v43  ;;  %v2023_v63 = vadd.f32 %v6173_v21, %v8721_v23  ;;  %v6208_v54 = vpop.f32.mrf.mxu0 }
 0x197   : > { %v1966_v10 = vpop.f32.mrf.mxu1 }
 0x198   : > { %9271 = vst [vmem:[#allocation19_spill] sm:$0xff] %v8816_v24  ;;  %v8819_v22 = vadd.f32 %v6207_v5, %v2023_v63  ;;  %v2021_v25 = vadd.f32 %v1966_v10, %v8724_v57  ;;  %v2695_v46 = vpop.f32.mrf.mxu0 }
 0x199   : > { %v6174_v4 = vpop.f32.mrf.mxu1 }
 0x19a   : > { %v8822_v15 = vadd.f32 %v2692_v37, %v2021_v25  ;;  %v2024_v50 = vadd.f32 %v6174_v4, %v8728_v52  ;;  %v6211_v7 = vpop.f32.mrf.mxu0 }
 0x19b   : > { %v1969_v1 = vpop.f32.mrf.mxu1 }
 0x19c   : > { %9272 = vst [vmem:[#allocation9_spill] sm:$0xff] %v8822_v15  ;;  %v8825_v30 = vadd.f32 %v6208_v54, %v2024_v50  ;;  %v2022_v17 = vadd.f32 %v1969_v1, %v8732_v14  ;;  %v2708_v51 = vpop.f32.mrf.mxu0 }
 0x19d   : > { %v6177_v23 = vpop.f32.mrf.mxu1 }
 0x19e   : > { %9273 = vst [vmem:[#allocation18_spill] sm:$0xff] %v8825_v30  ;;  %v8828_v3 = vadd.f32 %v2695_v46, %v2022_v17  ;;  %v2027_v19 = vadd.f32 %v6177_v23, %v8735_v39  ;;  %v6212_v33 = vpop.f32.mrf.mxu0 }
 0x19f   : > { %v1982_v57 = vpop.f32.mrf.mxu1 }
 0x1a0   : > { %9274 = vst [vmem:[#allocation21_spill] sm:$0xff] %v8828_v3  ;;  %v8831_v42 = vadd.f32 %v6211_v7, %v2027_v19  ;;  %v2025_v41 = vadd.f32 %v1982_v57, %v8738_v45  ;;  %v2711_v47 = vpop.f32.mrf.mxu0 }
 0x1a1   : > { %v6178_v52 = vpop.f32.mrf.mxu1 }
 0x1a2   : > { %v8834_v44 = vadd.f32 %v2708_v51, %v2025_v41  ;;  %v2028_v49 = vadd.f32 %v6178_v52, %v8741_v61  ;;  %v6251_v6 = vpop.f32.mrf.mxu0 }
 0x1a3   : > { %v1985_v14 = vpop.f32.mrf.mxu1 }
 0x1a4   : > { %9275 = vst [vmem:[#allocation23_spill] sm:$0xff] %v8834_v44  ;;  %v8837_v35 = vadd.f32 %v6212_v33, %v2028_v49  ;;  %v2026_v20 = vadd.f32 %v1985_v14, %v8744_v40  ;;  %v3428_v36 = vpop.f32.mrf.mxu0 }
 0x1a5   : > { %v6217_v39 = vpop.f32.mrf.mxu1 }
 0x1a6   : > { %9276 = vst [vmem:[#allocation25_spill] sm:$0xff] %v8837_v35  ;;  %v8840_v32 = vadd.f32 %v2711_v47, %v2026_v20  ;;  %v3195_v5 = vadd.f32 %v6217_v39, %v8747_v62  ;;  %v8843_v28 = vpop.f32.mrf.mxu0 }
 0x1a7   : > { %v3066_v45 = vpop.f32.mrf.mxu1 }
 0x1a8   : > { %9277 = vst [vmem:[#allocation4_spill] sm:$0xff] %v8840_v32  ;;  %v8845_v43 = vadd.f32 %v6251_v6, %v3195_v5  ;;  %v3193_v37 = vadd.f32 %v3066_v45, %v8750_v0  ;;  %v8848_v61 = vpop.f32.mrf.mxu0 }
 0x1a9   : > { %v8850_v21 = vpop.f32.mrf.mxu1 }
 0x1aa   : > { %v8852_v63 = vadd.f32 %v3428_v36, %v3193_v37  ;;  %v6255_v40 = vpop.f32.mrf.mxu0 }
 0x1ab   : > { %v8854_v54 = vpop.f32.mrf.mxu1 }
 0x1ac   : > { %v8856_v10 = vpop.f32.mrf.mxu0 }
 0x1ad   : > { %v6221_v25 = vpop.f32.mrf.mxu1 }
 0x1ae   : > { %v3199_v62 = vadd.f32 %v6221_v25, %v8759_v48  ;;  %v8859_v46 = vpop.f32.mrf.mxu0 }
 0x1af   : > { %v8861_v4 = vpop.f32.mrf.mxu1 }
 0x1b0   : > { %v8863_v50 = vadd.f32 %v6255_v40, %v3199_v62  ;;  %v8865_v0 = vpop.f32.mrf.mxu0 }
 0x1b1   : > { %v8867_v7 = vpop.f32.mrf.mxu1 }
 0x1b2   : > { %v6259_v1 = vpop.f32.mrf.mxu0 }
 0x1b3   : > { %v8869_v17 = vpop.f32.mrf.mxu1 }
 0x1b4   : > { %v8871_v51 = vpop.f32.mrf.mxu0 }
 0x1b5   : > { %v6225_v23 = vpop.f32.mrf.mxu1 }
 0x1b6   : > { %v3203_v19 = vadd.f32 %v6225_v23, %v8771_v27  ;;  %v8874_v33 = vpop.f32.mrf.mxu0 }
 0x1b7   : > { %v8876_v48 = vpop.f32.mrf.mxu1 }
 0x1b8   : > { %v8878_v57 = vadd.f32 %v6259_v1, %v3203_v19  ;;  %v8880_v41 = vpop.f32.mrf.mxu0 }
 0x1b9   : > { %v8882_v47 = vpop.f32.mrf.mxu1 }
 0x1ba   : > { %v6263_v52 = vpop.f32.mrf.mxu0 }
 0x1bb   : > { %v8884_v49 = vpop.f32.mrf.mxu1 }
 0x1bc   : > { %v8886_v6 = vpop.f32.mrf.mxu0 }
 0x1bd   : > { %v6229_v14 = vpop.f32.mrf.mxu1 }
 0x1be   : > { %v3207_v20 = vadd.f32 %v6229_v14, %v8783_v53  ;;  %v8889_v36 = vpop.f32.mrf.mxu0 }
 0x1bf   : > { %v8891_v27 = vpop.f32.mrf.mxu1 }
 0x1c0   : > { %v8893_v39 = vadd.f32 %v6263_v52, %v3207_v20  ;;  %v8895_v5 = vpop.f32.mrf.mxu0 }
 0x1c1   : > { %v8897_v45 = vpop.f32.mrf.mxu1 }
 0x1c2   : > { %v6267_v37 = vpop.f32.mrf.mxu0 }
 0x1c3   : > { %v8899_v40 = vpop.f32.mrf.mxu1 }
 0x1c4   : > { %v8901_v25 = vpop.f32.mrf.mxu0 }
 0x1c5   : > { %v6233_v62 = vpop.f32.mrf.mxu1 }
 0x1c6   : > { %v3211_v1 = vadd.f32 %v6233_v62, %v8795_v29  ;;  %v8904_v23 = vpop.f32.mrf.mxu0 }
 0x1c7   : > { %v8906_v53 = vpop.f32.mrf.mxu1 }
 0x1c8   : > { %v8908_v19 = vadd.f32 %v6267_v37, %v3211_v1  ;;  %v8910_v52 = vpop.f32.mrf.mxu0 }
 0x1c9   : > { %9278 = vst [vmem:[#allocation3_spill] sm:$0xff] %v8910_v52  ;;  %v8912_v14 = vpop.f32.mrf.mxu1 }
 0x1ca   : > { %v6271_v20 = vpop.f32.mrf.mxu0 }
 0x1cb   : > { %v8914_v32 = vpop.f32.mrf.mxu1 }
 0x1cc   : > { %v8916_v35 = vpop.f32.mrf.mxu0 }
 0x1cd   : > { %9279 = vst [vmem:[#allocation6_spill] sm:$0xff] %v8916_v35  ;;  %v6237_v44 = vpop.f32.mrf.mxu1 }
 0x1ce   : > { %v3215_v3 = vadd.f32 %v6237_v44, %v8807_v58  ;;  %v8919_v30 = vpop.f32.mrf.mxu0 }
 0x1cf   : > { %9280 = vst [vmem:[#allocation5_spill] sm:$0xff] %v8919_v30  ;;  %v8921_v29 = vpop.f32.mrf.mxu1 }
 0x1d0   : > { %v8923_v62 = vadd.f32 %v6271_v20, %v3215_v3  ;;  %v8925_v37 = vpop.f32.mrf.mxu0 }
 0x1d1   : > { %9282 = vst [vmem:[#allocation10_spill] sm:$0xff] %v8925_v37  ;;  %v8927_v1 = vpop.f32.mrf.mxu1 }
 0x1d2   : > { %9281 = vst [vmem:[#allocation7_spill] sm:$0xff] %v8923_v62  ;;  %9283 = vst [vmem:[#allocation13_spill] sm:$0xff] %v8927_v1  ;;  %v6275_v15 = vpop.f32.mrf.mxu0 }
 0x1d3   : > { %v8929_v24 = vpop.f32.mrf.mxu1 }
 0x1d4   : > { %9284 = vst [vmem:[#allocation15_spill] sm:$0xff] %v8929_v24  ;;  %v8931_v56 = vpop.f32.mrf.mxu0 }
 0x1d5   : > { %9285 = vst [vmem:[#allocation17_spill] sm:$0xff] %v8931_v56  ;;  %v6241_v55 = vpop.f32.mrf.mxu1 }
 0x1d6   : > { %v3219_v35 = vadd.f32 %v6241_v55, %v8819_v22  ;;  %v8934_v52 = vpop.f32.mrf.mxu0 }
 0x1d7   : > { %9286 = vst [vmem:[#allocation20_spill] sm:$0xff] %v8934_v52  ;;  %v8936_v58 = vpop.f32.mrf.mxu1 }
 0x1d8   : > { %v8938_v44 = vadd.f32 %v6275_v15, %v3219_v35  ;;  %v8940_v3 = vpop.f32.mrf.mxu0 }
 0x1d9   : > { %9288 = vst [vmem:[#allocation24_spill] sm:$0xff] %v8940_v3  ;;  %v8942_v20 = vpop.f32.mrf.mxu1 }
 0x1da   : > { %9287 = vst [vmem:[#allocation22_spill] sm:$0xff] %v8938_v44  ;;  %9289 = vst [vmem:[#allocation11_spill] sm:$0xff] %v8942_v20  ;;  %v6279_v37 = vpop.f32.mrf.mxu0 }
 0x1db   : > { %v8944_v62 = vpop.f32.mrf.mxu1 }
 0x1dc   : > { %9290 = vst [vmem:[#allocation8_spill] sm:$0xff] %v8944_v62  ;;  %v8946_v30 = vpop.f32.mrf.mxu0 }
 0x1dd   : > { %9291 = vst [vmem:[#allocation16_spill] sm:$0xff] %v8946_v30  ;;  %v6245_v24 = vpop.f32.mrf.mxu1  ;;  %v3196_v30 = vadd.f32 %v8850_v21, %v8753_v26  ;;  %v3197_v21 = vadd.f32 %v8861_v4, %v8762_v31 }
 0x1de   : > { %v3223_v56 = vadd.f32 %v6245_v24, %v8831_v42  ;;  %v8949_v1 = vpop.f32.mrf.mxu0  ;;  %v3194_v24 = vadd.f32 %v8854_v54, %v8756_v60  ;;  %v3200_v60 = vadd.f32 %v8867_v7, %v8765_v38 }
 0x1df   : > { %9292 = vst [vmem:[#allocation12_spill] sm:$0xff] %v8949_v1  ;;  %v8951_v55 = vpop.f32.mrf.mxu1  ;;  %v3559_v38 = vadd.f32 %v8856_v10, %v3197_v21  ;;  %v3204_v21 = vadd.f32 %v8882_v47, %v8777_v13 }
 0x1e0   : > { %9293 = vst [vmem:[#allocation26_spill] sm:$0xff] %v8951_v55  ;;  %v8953_v22 = vadd.f32 %v6279_v37, %v3223_v56  ;;  %v8955_v15 = vpop.f32.mrf.mxu0  ;;  %v3558_v56 = vadd.f32 %v8843_v28, %v3196_v30  ;;  %v3562_v7 = vadd.f32 %v8859_v46, %v3200_v60 }
 0x1e1   : > { %9295 = vst [vmem:[#allocation28_spill] sm:$0xff] %v8955_v15  ;;  %v8957_v35 = vpop.f32.mrf.mxu1 }
 0x1e2   : > { %9294 = vst [vmem:[#allocation27_spill] sm:$0xff] %v8953_v22  ;;  %9296 = vst [vmem:[#allocation29_spill] sm:$0xff] %v8957_v35  ;;  %v6319_v3 = vpop.f32.mrf.mxu0 }
 0x1e3   : > { %v8959_v44 = vpop.f32.mrf.mxu1 }
 0x1e4   : > { %9297 = vst [vmem:[#allocation30_spill] sm:$0xff] %v8959_v44  ;;  %v4624_v52 = vpop.f32.mrf.mxu0  ;;  %v3556_v44 = vadd.f32 %v8848_v61, %v3194_v24 }
 0x1e5   : > { %v6285_v62 = vpop.f32.mrf.mxu1 }
 0x1e6   : > { %v6320_v42 = vpop.f32.mrf.mxu0  ;;  %v4283_v37 = vadd.f32 %v6285_v62, %v8845_v43 }
 0x1e7   : > { %v4154_v1 = vpop.f32.mrf.mxu1 }
 0x1e8   : > { %v4281_v15 = vadd.f32 %v4154_v1, %v8852_v63  ;;  %v4627_v22 = vpop.f32.mrf.mxu0  ;;  %v4753_v20 = vadd.f32 %v6319_v3, %v4283_v37  ;;  %v3198_v63 = vadd.f32 %v8869_v17, %v8768_v2 }
 0x1e9   : > { %v6286_v35 = vpop.f32.mrf.mxu1 }
 0x1ea   : > { %v4284_v55 = vadd.f32 %v6286_v35, %v3558_v56  ;;  %v6323_v26 = vpop.f32.mrf.mxu0  ;;  %v4751_v30 = vadd.f32 %v4624_v52, %v4281_v15  ;;  %v3560_v35 = vadd.f32 %v8865_v0, %v3198_v63  ;;  %v4982_v56 = vmul.f32 %v4753_v20, %v4753_v20 }
 0x1eb   : > { %v4157_v54 = vpop.f32.mrf.mxu1 }
 0x1ec   : > { %v4754_v28 = vadd.f32 %v6320_v42, %v4284_v55  ;;  %v4282_v43 = vadd.f32 %v4157_v54, %v3556_v44  ;;  %v4640_v62 = vpop.f32.mrf.mxu0  ;;  %v4980_v3 = vmul.f32 %v4751_v30, %v4751_v30 }
 0x1ed   : > { %v6289_v61 = vpop.f32.mrf.mxu1 }
 0x1ee   : > { %v5803_v31 = vpack.c.bf16 %v4754_v28, %v4753_v20  ;;  %v4752_v4 = vadd.f32 %v4627_v22, %v4282_v43  ;;  %v6324_v1 = vpop.f32.mrf.mxu0  ;;  %v4287_v52 = vadd.f32 %v6289_v61, %v8863_v50  ;;  %v3201_v22 = vadd.f32 %v8876_v48, %v8774_v18 }
 0x1ef   : > { %v4170_v44 = vpop.f32.mrf.mxu1  ;;  %v4983_v60 = vmul.f32 %v4754_v28, %v4754_v28 }
 0x1f0   : > { %5875 = vst [vmem:[%s8979_s18 + $0x8] sm:$0xff] %v5803_v31   ;;  %v5798_v2 = vpack.c.bf16 %v4752_v4, %v4751_v30  ;;  %v4943_v17 = vadd.f32 %v4752_v4, %v4751_v30  ;;  %v4981_v55 = vmul.f32 %v4752_v4, %v4752_v4  ;;  %v4643_v15 = vpop.f32.mrf.mxu0  ;;  %v4285_v24 = vadd.f32 %v4170_v44, %v3559_v38 }
 0x1f1   : > { %v6290_v42 = vpop.f32.mrf.mxu1  ;;  %v4757_v54 = vadd.f32 %v6323_v26, %v4287_v52  ;;  %v3563_v31 = vadd.f32 %v8871_v51, %v3201_v22  ;;  %v3566_v52 = vadd.f32 %v8874_v33, %v3204_v21 }
 0x1f2   : > { %5799 = vst [vmem:[%s8979_s18] sm:$0xff] %v5798_v2   ;;  %v4944_v10 = vadd.f32 %v4943_v17, %v4753_v20  ;;  %v5012_v46 = vadd.f32 %v4981_v55, %v4980_v3  ;;  %v4288_v37 = vadd.f32 %v6290_v42, %v3562_v7  ;;  %v6327_v50 = vpop.f32.mrf.mxu0  ;;  %v4755_v30 = vadd.f32 %v4640_v62, %v4285_v24 }
 0x1f3   : > { %v4173_v43 = vpop.f32.mrf.mxu1  ;;  %v3202_v20 = vadd.f32 %v8884_v49, %v8780_v8  ;;  %v4986_v24 = vmul.f32 %v4757_v54, %v4757_v54 }
 0x1f4   : > { %v5013_v61 = vadd.f32 %v5012_v46, %v4982_v56  ;;  %v4945_v0 = vadd.f32 %v4944_v10, %v4754_v28  ;;  %v4758_v63 = vadd.f32 %v6324_v1, %v4288_v37  ;;  %v4286_v18 = vadd.f32 %v4173_v43, %v3560_v35  ;;  %v4656_v48 = vpop.f32.mrf.mxu0 }
 0x1f5   : > { %v6293_v4 = vpop.f32.mrf.mxu1  ;;  %v4984_v7 = vmul.f32 %v4755_v30, %v4755_v30  ;;  %v3564_v55 = vadd.f32 %v8880_v41, %v3202_v20  ;;  %v3205_v35 = vadd.f32 %v8891_v27, %v8786_v12 }
 0x1f6   : > { %v4946_v38 = vadd.f32 %v4945_v0, %v4755_v30  ;;  %v5014_v44 = vadd.f32 %v5013_v61, %v4983_v60  ;;  %v5813_v13 = vpack.c.bf16 %v4758_v63, %v4757_v54  ;;  %v6328_v47 = vpop.f32.mrf.mxu0  ;;  %v4756_v26 = vadd.f32 %v4643_v15, %v4286_v18 }
 0x1f7   : > { %v4186_v62 = vpop.f32.mrf.mxu1  ;;  %v4291_v1 = vadd.f32 %v6293_v4, %v8878_v57  ;;  %v3208_v15 = vadd.f32 %v8897_v45, %v8789_v16  ;;  %v4987_v41 = vmul.f32 %v4758_v63, %v4758_v63  ;;  %v3567_v27 = vadd.f32 %v8886_v6, %v3205_v35 }
 0x1f8   : > { %v5015_v28 = vadd.f32 %v5014_v44, %v4984_v7  ;;  %5877 = vst [vmem:[%s8979_s18 + $0x18] sm:$0xff] %v5813_v13   ;;  %v4289_v3 = vadd.f32 %v4186_v62, %v3563_v31  ;;  %v4659_v51 = vpop.f32.mrf.mxu0  ;;  %v5808_v2 = vpack.c.bf16 %v4756_v26, %v4755_v30  ;;  %v4947_v17 = vadd.f32 %v4946_v38, %v4756_v26 }
 0x1f9   : > { %v4985_v8 = vmul.f32 %v4756_v26, %v4756_v26  ;;  %v6294_v49 = vpop.f32.mrf.mxu1  ;;  %v4761_v46 = vadd.f32 %v6327_v50, %v4291_v1  ;;  %v3206_v16 = vadd.f32 %v8899_v40, %v8792_v11  ;;  %v3570_v0 = vadd.f32 %v8889_v36, %v3208_v15 }
 0x1fa   : > { %v4292_v33 = vadd.f32 %v6294_v49, %v3566_v52  ;;  %v6331_v22 = vpop.f32.mrf.mxu0  ;;  %5876 = vst [vmem:[%s8979_s18 + $0x10] sm:$0xff] %v5808_v2   ;;  %v4948_v42 = vadd.f32 %v4947_v17, %v4757_v54  ;;  %v4759_v56 = vadd.f32 %v4656_v48, %v4289_v3  ;;  %v3209_v36 = vadd.f32 %v8906_v53, %v8798_v9 }
 0x1fb   : > { %v5016_v57 = vadd.f32 %v5015_v28, %v4985_v8  ;;  %v4189_v10 = vpop.f32.mrf.mxu1  ;;  %v3568_v40 = vadd.f32 %v8895_v5, %v3206_v16  ;;  %v3212_v13 = vadd.f32 %v8912_v14, %v8801_v34  ;;  %v4990_v62 = vmul.f32 %v4761_v46, %v4761_v46 }
 0x1fc   : > { %v4762_v37 = vadd.f32 %v6328_v47, %v4292_v33  ;;  %v4290_v21 = vadd.f32 %v4189_v10, %v3564_v55  ;;  %v4672_v60 = vpop.f32.mrf.mxu0  ;;  %v4949_v43 = vadd.f32 %v4948_v42, %v4758_v63  ;;  %v4988_v50 = vmul.f32 %v4759_v56, %v4759_v56 }
 0x1fd   : > { %v5017_v30 = vadd.f32 %v5016_v57, %v4986_v24  ;;  %v6297_v12 = vpop.f32.mrf.mxu1  ;;  %v3571_v53 = vadd.f32 %v8901_v25, %v3209_v36  ;;  %v3210_v34 = vadd.f32 %v8914_v32, %v8804_v59  ;;  %v3574_v15 = vadd.f32 %v8904_v23, %v3212_v13  ;;  %v9298_v32 = vld [vmem:[#allocation3_spill] sm:$0xff] }
 0x1fe   : > { %v5823_v45 = vpack.c.bf16 %v4762_v37, %v4761_v46  ;;  %v4760_v61 = vadd.f32 %v4659_v51, %v4290_v21  ;;  %v6332_v54 = vpop.f32.mrf.mxu0  ;;  %v4950_v18 = vadd.f32 %v4949_v43, %v4759_v56  ;;  %v4295_v63 = vadd.f32 %v6297_v12, %v8893_v39  ;;  %v9301_v43 = vld [vmem:[#allocation13_spill] sm:$0xff] }
 0x1ff   : > { %v5018_v48 = vadd.f32 %v5017_v30, %v4987_v41  ;;  %v4202_v31 = vpop.f32.mrf.mxu1  ;;  %v4991_v5 = vmul.f32 %v4762_v37, %v4762_v37  ;;  %v9299_v41 = vld [vmem:[#allocation2_spill] sm:$0xff] }
 0x200   : > { %5879 = vst [vmem:[%s8979_s18 + $0x28] sm:$0xff] %v5823_v45   ;;  %v5818_v20 = vpack.c.bf16 %v4760_v61, %v4759_v56  ;;  %v4989_v4 = vmul.f32 %v4760_v61, %v4760_v61  ;;  %v4293_v38 = vadd.f32 %v4202_v31, %v3567_v27  ;;  %v4675_v6 = vpop.f32.mrf.mxu0  ;;  %v4951_v44 = vadd.f32 %v4950_v18, %v4760_v61  ;;  %v9300_v30 = vld [vmem:[#allocation14_spill] sm:$0xff] }
 0x201   : > { %v5019_v7 = vadd.f32 %v5018_v48, %v4988_v50  ;;  %v6298_v11 = vpop.f32.mrf.mxu1  ;;  %v4765_v3 = vadd.f32 %v6331_v22, %v4295_v63  ;;  %v3213_v23 = vadd.f32 %v8921_v29, %v9299_v41  ;;  %v3216_v12 = vadd.f32 %v9301_v43, %v9300_v30  ;;  %v9312_v43 = vld [vmem:[#allocation21_spill] sm:$0xff] }
 0x202   : > { %5878 = vst [vmem:[%s8979_s18 + $0x20] sm:$0xff] %v5818_v20   ;;  %v4296_v47 = vadd.f32 %v6298_v11, %v3570_v0  ;;  %v6335_v26 = vpop.f32.mrf.mxu0  ;;  %v4952_v52 = vadd.f32 %v4951_v44, %v4761_v46  ;;  %v4763_v39 = vadd.f32 %v4672_v60, %v4293_v38  ;;  %v3572_v60 = vadd.f32 %v9298_v32, %v3210_v34  ;;  %v9302_v38 = vld [vmem:[#allocation6_spill] sm:$0xff]  ;;  %v9304_v44 = vld [vmem:[#allocation15_spill] sm:$0xff] }
 0x203   : > { %v5020_v28 = vadd.f32 %v5019_v7, %v4989_v4  ;;  %v4205_v1 = vpop.f32.mrf.mxu1  ;;  %v4994_v45 = vmul.f32 %v4765_v3, %v4765_v3  ;;  %v9303_v7 = vld [vmem:[#allocation19_spill] sm:$0xff] }
 0x204   : > { %v4766_v51 = vadd.f32 %v6332_v54, %v4296_v47  ;;  %v4294_v2 = vadd.f32 %v4205_v1, %v3568_v40  ;;  %v4688_v17 = vpop.f32.mrf.mxu0  ;;  %v4953_v49 = vadd.f32 %v4952_v52, %v4762_v37  ;;  %v4992_v22 = vmul.f32 %v4763_v39, %v4763_v39  ;;  %v9305_v47 = vld [vmem:[#allocation5_spill] sm:$0xff] }
 0x205   : > { %v5021_v8 = vadd.f32 %v5020_v28, %v4990_v62  ;;  %v6301_v9 = vpop.f32.mrf.mxu1  ;;  %v3214_v11 = vadd.f32 %v9304_v44, %v9303_v7  ;;  %v3578_v62 = vadd.f32 %v9305_v47, %v3216_v12  ;;  %v9313_v12 = vld [vmem:[#allocation8_spill] sm:$0xff] }
 0x206   : > { %v5833_v14 = vpack.c.bf16 %v4766_v51, %v4765_v3  ;;  %v4764_v55 = vadd.f32 %v4675_v6, %v4294_v2  ;;  %v6336_v35 = vpop.f32.mrf.mxu0  ;;  %v4954_v33 = vadd.f32 %v4953_v49, %v4763_v39  ;;  %v4299_v10 = vadd.f32 %v6301_v9, %v8908_v19 }
 0x207   : > { %v5022_v24 = vadd.f32 %v5021_v8, %v4991_v5  ;;  %v4218_v42 = vpop.f32.mrf.mxu1  ;;  %v4995_v20 = vmul.f32 %v4766_v51, %v4766_v51  ;;  %v3575_v6 = vadd.f32 %v9302_v38, %v3213_v23  ;;  %v9311_v23 = vld [vmem:[#allocation17_spill] sm:$0xff] }
 0x208   : > { %5881 = vst [vmem:[%s8979_s18 + $0x38] sm:$0xff] %v5833_v14   ;;  %v5828_v57 = vpack.c.bf16 %v4764_v55, %v4763_v39  ;;  %v4993_v56 = vmul.f32 %v4764_v55, %v4764_v55  ;;  %v4297_v46 = vadd.f32 %v4218_v42, %v3571_v53  ;;  %v4691_v25 = vpop.f32.mrf.mxu0  ;;  %v4955_v21 = vadd.f32 %v4954_v33, %v4764_v55  ;;  %v9307_v53 = vld [vmem:[#allocation10_spill] sm:$0xff]  ;;  %v9308_v14 = vld [vmem:[#allocation9_spill] sm:$0xff] }
 0x209   : > { %v5023_v37 = vadd.f32 %v5022_v24, %v4992_v22  ;;  %v6302_v59 = vpop.f32.mrf.mxu1  ;;  %v4769_v18 = vadd.f32 %v6335_v26, %v4299_v10  ;;  %v3576_v34 = vadd.f32 %v9307_v53, %v3214_v11  ;;  %v3217_v55 = vadd.f32 %v8936_v58, %v9308_v14  ;;  %v9316_v11 = vld [vmem:[#allocation24_spill] sm:$0xff] }
 0x20a   : > { %5880 = vst [vmem:[%s8979_s18 + $0x30] sm:$0xff] %v5828_v57   ;;  %v4300_v27 = vadd.f32 %v6302_v59, %v3574_v15  ;;  %v4956_v61 = vadd.f32 %v4955_v21, %v4765_v3  ;;  %v4767_v19 = vadd.f32 %v4688_v17, %v4297_v46  ;;  %v9310_v15 = vld [vmem:[#allocation11_spill] sm:$0xff] }
 0x20b   : > { %v6339_v16 = vpop.f32.mrf.mxu0  ;;  %v5024_v54 = vadd.f32 %v5023_v37, %v4993_v56  ;;  %v4221_v0 = vpop.f32.mrf.mxu1  ;;  %v4998_v42 = vmul.f32 %v4769_v18, %v4769_v18  ;;  %v3579_v30 = vadd.f32 %v9311_v23, %v3217_v55 }
 0x20c   : > { %v4770_v50 = vadd.f32 %v6336_v35, %v4300_v27  ;;  %v4298_v48 = vadd.f32 %v4221_v0, %v3572_v60  ;;  %v4957_v63 = vadd.f32 %v4956_v61, %v4766_v51  ;;  %v4996_v26 = vmul.f32 %v4767_v19, %v4767_v19  ;;  %v9306_v51 = vld [vmem:[#allocation7_spill] sm:$0xff]  ;;  %v9309_v35 = vld [vmem:[#allocation18_spill] sm:$0xff] }
 0x20d   : > { %v4704_v31 = vpop.f32.mrf.mxu0  ;;  %v5025_v4 = vadd.f32 %v5024_v54, %v4994_v45  ;;  %v6305_v29 = vpop.f32.mrf.mxu1  ;;  %v3220_v33 = vadd.f32 %v9310_v15, %v9309_v35  ;;  %v3218_v27 = vadd.f32 %v9313_v12, %v9312_v43  ;;  %v9321_v35 = vld [vmem:[#allocation16_spill] sm:$0xff] }
 0x20e   : > { %v5843_v40 = vpack.c.bf16 %v4770_v50, %v4769_v18  ;;  %v4768_v36 = vadd.f32 %v4691_v25, %v4298_v48  ;;  %v4958_v52 = vadd.f32 %v4957_v63, %v4767_v19  ;;  %v4303_v2 = vadd.f32 %v6305_v29, %v9306_v51 }
 0x20f   : > { %v6340_v13 = vpop.f32.mrf.mxu0  ;;  %v5026_v28 = vadd.f32 %v5025_v4, %v4995_v20  ;;  %v4234_v39 = vpop.f32.mrf.mxu1  ;;  %v4999_v32 = vmul.f32 %v4770_v50, %v4770_v50 }
 0x210   : > { %5883 = vst [vmem:[%s8979_s18 + $0x48] sm:$0xff] %v5843_v40   ;;  %v5838_v1 = vpack.c.bf16 %v4768_v36, %v4767_v19  ;;  %v4997_v3 = vmul.f32 %v4768_v36, %v4768_v36  ;;  %v4301_v17 = vadd.f32 %v4234_v39, %v3575_v6  ;;  %v4959_v49 = vadd.f32 %v4958_v52, %v4768_v36  ;;  %v9314_v19 = vld [vmem:[#allocation20_spill] sm:$0xff]  ;;  %v9317_v36 = vld [vmem:[#allocation23_spill] sm:$0xff]  ;;  %v9320_v52 = vld [vmem:[#allocation29_spill] sm:$0xff] }
 0x211   : > { %v4707_v5 = vpop.f32.mrf.mxu0  ;;  %v5027_v8 = vadd.f32 %v5026_v28, %v4996_v26  ;;  %v6306_v9 = vpop.f32.mrf.mxu1  ;;  %v4773_v25 = vadd.f32 %v6339_v16, %v4303_v2  ;;  %v3582_v0 = vadd.f32 %v9314_v19, %v3220_v33  ;;  %v3580_v40 = vadd.f32 %v9316_v11, %v3218_v27  ;;  %v9322_v33 = vld [vmem:[#allocation4_spill] sm:$0xff] }
 0x212   : > { %5882 = vst [vmem:[%s8979_s18 + $0x40] sm:$0xff] %v5838_v1   ;;  %v4304_v22 = vadd.f32 %v6306_v9, %v3578_v62  ;;  %v4960_v57 = vadd.f32 %v4959_v49, %v4769_v18  ;;  %v4771_v10 = vadd.f32 %v4704_v31, %v4301_v17  ;;  %v9319_v62 = vld [vmem:[#allocation25_spill] sm:$0xff]  ;;  %v9326_v27 = vld [vmem:[#allocation28_spill] sm:$0xff] }
 0x213   : > { %v6343_v24 = vpop.f32.mrf.mxu0  ;;  %v5028_v56 = vadd.f32 %v5027_v8, %v4997_v3  ;;  %v4237_v46 = vpop.f32.mrf.mxu1  ;;  %v3224_v26 = vadd.f32 %v9320_v52, %v9319_v62  ;;  %v5002_v1 = vmul.f32 %v4773_v25, %v4773_v25 }
 0x214   : > { %v4774_v37 = vadd.f32 %v6340_v13, %v4304_v22  ;;  %v4302_v21 = vadd.f32 %v4237_v46, %v3576_v34  ;;  %v4961_v41 = vadd.f32 %v4960_v57, %v4770_v50  ;;  %v5000_v16 = vmul.f32 %v4771_v10, %v4771_v10  ;;  %v9315_v50 = vld [vmem:[#allocation22_spill] sm:$0xff] }
 0x215   : > { %v4720_v59 = vpop.f32.mrf.mxu0  ;;  %v5029_v60 = vadd.f32 %v5028_v56, %v4998_v42  ;;  %v6309_v58 = vpop.f32.mrf.mxu1  ;;  %v9318_v13 = vld [vmem:[#allocation26_spill] sm:$0xff] }
 0x216   : > { %v5853_v45 = vpack.c.bf16 %v4774_v37, %v4773_v25  ;;  %v4772_v61 = vadd.f32 %v4707_v5, %v4302_v21  ;;  %v4962_v18 = vadd.f32 %v4961_v41, %v4771_v10  ;;  %v4307_v63 = vadd.f32 %v6309_v58, %v9315_v50  ;;  %v9323_v22 = vld [vmem:[#allocation30_spill] sm:$0xff] }
 0x217   : > { %v6344_v54 = vpop.f32.mrf.mxu0  ;;  %v5030_v48 = vadd.f32 %v5029_v60, %v4999_v32  ;;  %v4250_v31 = vpop.f32.mrf.mxu1  ;;  %v3221_v47 = vadd.f32 %v9318_v13, %v9317_v36  ;;  %v5003_v9 = vmul.f32 %v4774_v37, %v4774_v37  ;;  %v3222_v42 = vadd.f32 %v9323_v22, %v9322_v33 }
 0x218   : > { %5885 = vst [vmem:[%s8979_s18 + $0x58] sm:$0xff] %v5853_v45   ;;  %v5848_v20 = vpack.c.bf16 %v4772_v61, %v4771_v10  ;;  %v5001_v4 = vmul.f32 %v4772_v61, %v4772_v61  ;;  %v4305_v29 = vadd.f32 %v4250_v31, %v3579_v30  ;;  %v4963_v7 = vadd.f32 %v4962_v18, %v4772_v61  ;;  %v9324_v10 = vld [vmem:[#allocation12_spill] sm:$0xff] }
 0x219   : > { %v4723_v38 = vpop.f32.mrf.mxu0  ;;  %v5031_v6 = vadd.f32 %v5030_v48, %v5000_v16  ;;  %v6310_v44 = vpop.f32.mrf.mxu1  ;;  %v4777_v5 = vadd.f32 %v6343_v24, %v4307_v63  ;;  %v3583_v15 = vadd.f32 %v9321_v35, %v3221_v47  ;;  %v3586_v46 = vadd.f32 %v9324_v10, %v3224_v26 }
 0x21a   : > { %5884 = vst [vmem:[%s8979_s18 + $0x50] sm:$0xff] %v5848_v20   ;;  %v4308_v28 = vadd.f32 %v6310_v44, %v3582_v0  ;;  %v4964_v3 = vadd.f32 %v4963_v7, %v4773_v25  ;;  %v4775_v2 = vadd.f32 %v4720_v59, %v4305_v29  ;;  %v3584_v45 = vadd.f32 %v9326_v27, %v3222_v42 }
 0x21b   : > { %v6347_v39 = vpop.f32.mrf.mxu0  ;;  %v5032_v51 = vadd.f32 %v5031_v6, %v5001_v4  ;;  %v4253_v17 = vpop.f32.mrf.mxu1 }
 0x21c   : > { %v4778_v8 = vadd.f32 %v6344_v54, %v4308_v28  ;;  %v4306_v49 = vadd.f32 %v4253_v17, %v3580_v40  ;;  %v4965_v34 = vadd.f32 %v4964_v3, %v4774_v37  ;;  %v5004_v24 = vmul.f32 %v4775_v2, %v4775_v2  ;;  %v9325_v37 = vld [vmem:[#allocation27_spill] sm:$0xff] }
 0x21d   : > { %v5033_v53 = vadd.f32 %v5032_v51, %v5002_v1  ;;  %v6313_v14 = vpop.f32.mrf.mxu1  ;;  %v4736_v55 = vpop.f32.mrf.mxu0  ;;  %v5006_v54 = vmul.f32 %v4777_v5, %v4777_v5 }
 0x21e   : > { %v5863_v57 = vpack.c.bf16 %v4778_v8, %v4777_v5  ;;  %v4776_v56 = vadd.f32 %v4723_v38, %v4306_v49  ;;  %v4966_v25 = vadd.f32 %v4965_v34, %v4775_v2  ;;  %v4311_v41 = vadd.f32 %v6313_v14, %v9325_v37 }
 0x21f   : > { %v5034_v21 = vadd.f32 %v5033_v53, %v5003_v9  ;;  %v4266_v59 = vpop.f32.mrf.mxu1  ;;  %v6348_v12 = vpop.f32.mrf.mxu0  ;;  %v5007_v4 = vmul.f32 %v4778_v8, %v4778_v8 }
 0x220   : > { %5887 = vst [vmem:[%s8979_s18 + $0x68] sm:$0xff] %v5863_v57   ;;  %v5858_v32 = vpack.c.bf16 %v4776_v56, %v4775_v2  ;;  %v5005_v60 = vmul.f32 %v4776_v56, %v4776_v56  ;;  %v4309_v58 = vadd.f32 %v4266_v59, %v3583_v15  ;;  %v4967_v30 = vadd.f32 %v4966_v25, %v4776_v56 }
 0x221   : > { %v5035_v23 = vadd.f32 %v5034_v21, %v5004_v24  ;;  %v6314_v43 = vpop.f32.mrf.mxu1  ;;  %v4781_v48 = vadd.f32 %v6347_v39, %v4311_v41  ;;  %v4739_v29 = vpop.f32.mrf.mxu0 }
 0x222   : > { %5886 = vst [vmem:[%s8979_s18 + $0x60] sm:$0xff] %v5858_v32   ;;  %v4312_v61 = vadd.f32 %v6314_v43, %v3586_v46  ;;  %v4968_v19 = vadd.f32 %v4967_v30, %v4777_v5  ;;  %v4779_v18 = vadd.f32 %v4736_v55, %v4309_v58 }
 0x223   : > { %v5036_v0 = vadd.f32 %v5035_v23, %v5005_v60  ;;  %v4269_v16 = vpop.f32.mrf.mxu1  ;;  %v5010_v62 = vmul.f32 %v4781_v48, %v4781_v48 }
 0x224   : > { %v4782_v31 = vadd.f32 %v6348_v12, %v4312_v61  ;;  %v4310_v20 = vadd.f32 %v4269_v16, %v3584_v45  ;;  %v4969_v63 = vadd.f32 %v4968_v19, %v4778_v8  ;;  %v5008_v44 = vmul.f32 %v4779_v18, %v4779_v18 }
 0x225   : > { %v5037_v50 = vadd.f32 %v5036_v0, %v5006_v54 }
 0x226   : > { %v5873_v38 = vpack.c.bf16 %v4782_v31, %v4781_v48  ;;  %v4780_v6 = vadd.f32 %v4739_v29, %v4310_v20  ;;  %v4970_v7 = vadd.f32 %v4969_v63, %v4779_v18  ;;  %v5011_v28 = vmul.f32 %v4782_v31, %v4782_v31 }
 0x227   : > { %v5038_v11 = vadd.f32 %v5037_v50, %v5007_v4 }
 0x228   : > { %5889 = vst [vmem:[%s8979_s18 + $0x78] sm:$0xff] %v5873_v38   ;;  %v5868_v40 = vpack.c.bf16 %v4780_v6, %v4779_v18  ;;  %v5009_v36 = vmul.f32 %v4780_v6, %v4780_v6  ;;  %v4971_v47 = vadd.f32 %v4970_v7, %v4780_v6 }
 0x229   : > { %v5039_v13 = vadd.f32 %v5038_v11, %v5008_v44 }
 0x22a   : > { %5888 = vst [vmem:[%s8979_s18 + $0x70] sm:$0xff] %v5868_v40   ;;  %v4972_v52 = vadd.f32 %v4971_v47, %v4781_v48 }
 0x22b   : > { %v5040_v26 = vadd.f32 %v5039_v13, %v5009_v36 }
 0x22c   : > { %v4973_v39 = vadd.f32 %v4972_v52, %v4782_v31 }
 0x22d   : > { %v5041_v1 = vadd.f32 %v5040_v26, %v5010_v62 }
 0x22e   : > { %v4974_v3 = vrot.slane %v4973_v39, 4 }
 0x22f   : > { %v5042_v51 = vadd.f32 %v5041_v1, %v5011_v28 }
 0x230   : > { %v4975_v2 = vadd.f32 %v4974_v3, %v4973_v39 }
 0x231   : > { %v5043_v17 = vrot.slane %v5042_v51, 4 }
 0x232   : > { %v4976_v5 = vrot.slane %v4975_v2, 2 }
 0x233   : > { %v5044_v8 = vadd.f32 %v5043_v17, %v5042_v51 }
 0x234   : > { %v4977_v49 = vadd.f32 %v4976_v5, %v4975_v2 }
 0x235   : > { %v5045_v9 = vrot.slane %v5044_v8, 2 }
 0x236   : > { %v4978_v53 = vrot.slane %v4977_v49, 1 }
 0x237   : > { %v5046_v34 = vadd.f32 %v5045_v9, %v5044_v8 }
 0x238   : > { %v4979_v55 = vadd.f32 %v4978_v53, %v4977_v49 }
 0x239   : > { %v5047_v14 = vrot.slane %v5046_v34, 1 }
 0x23b   : > { %v5048_v35 = vadd.f32 %v5047_v14, %v5046_v34 }
 0x23d   : > { %v5049_v15 = vsel %vm753_vm0, %v4979_v55, %v5048_v35 }
 0x23e   : > { %5050 = vst [vmem:[%s212_s22] sm:$0xff] %v5049_v15 }
 0x23f PF: > { %s14_s14 = sadd.s32 1, %s6458_s14   ;;  %s9327_s12 = smov %s6454_s13 }
 0x240   : > { %p11_p5 = scmp.ge.s32.totalorder %s14_s14, 4   ;;  %s9328_s13 = smov %s9330_s15 }
 0x242   :  { %13 = sbr.rel (!%p11_p5) target bundleno = 2 (0x2), region = 81 }

</bundles_post_ra>
